<compile_context>
chip_gen: v7x
topology: tpu7x:2x2x1
jax: 0.10.0
libtpu: 0.0.40
codegen_flags: <defaults>
</compile_context>

<pallas_src>
import math
from collections import OrderedDict

import jax
import jax.numpy as jnp
from jax.experimental import pallas as pl
from jax.experimental.pallas import tpu as pltpu

CP = 128  # every channel axis is zero-padded to one full lane width


def _conv_out(size, k, s, pad):
    return (size + 2 * pad - k) // s + 1


# ---------------------------------------------------------------------------
# Stride-phase decomposition (plain-JAX glue, ~1x input size, no im2col blow-up)
# ---------------------------------------------------------------------------
def _phase_stack(x, k, s, pad, pad_value=0.0):
    """NHWC -> [sp*sp, N, U, V, C] with
       phases[p*sp+q, n, u, v, :] == x_spatially_padded[n, s*u + p, s*v + q, :].

    Inside the kernel every conv/pool tap then becomes a contiguous static slice
    (no strided loads, no per-tap HBM copies)."""
    N, H, W, C = x.shape
    xp = x
    if pad:
        xp = jnp.pad(x, ((0, 0), (pad, pad), (pad, pad), (0, 0)),
                     constant_values=pad_value)
    Hp, Wp = H + 2 * pad, W + 2 * pad
    OH, OW = (Hp - k) // s + 1, (Wp - k) // s + 1
    amax = (k - 1) // s
    U, V = OH + amax, OW + amax
    sp = min(s, k)
    out = []
    for p in range(sp):
        for q in range(sp):
            ph = xp[:, p::s, q::s, :][:, :U, :V, :]
            du, dv = U - ph.shape[1], V - ph.shape[2]
            if du or dv:  # never-read slack rows/cols; keeps index math uniform
                ph = jnp.pad(ph, ((0, 0), (0, du), (0, dv), (0, 0)),
                             constant_values=pad_value)
            out.append(ph)
    return jnp.stack(out, axis=0)


# ---------------------------------------------------------------------------
# Fused direct-conv kernel: bf16 MXU taps -> f32 acc -> +shift (+res) (+ReLU)
# ---------------------------------------------------------------------------
def _make_conv_kernel(k, s, OW, relu, has_res):
    sp = min(s, k)

    def body(ph_ref, w_ref, b_ref, res_ref, o_ref):
        n = pl.program_id(0)
        h = pl.program_id(1)
        acc = None
        for i in range(k):
            p, a = i % s, i // s
            for j in range(k):
                q, b = j % s, j // s
                # contiguous [OW, 128] bf16 window for tap (i, j)
                win = ph_ref[p * sp + q, n, h + a, pl.ds(b, OW), :]
                d = jnp.dot(win, w_ref[i * k + j],
                            preferred_element_type=jnp.float32)
                acc = d if acc is None else acc + d
        y = acc + b_ref[...]
        if res_ref is not None:
            y = y + res_ref[0, 0]
        if relu:
            y = jnp.maximum(y, 0.0)
        o_ref[0, 0] = y

    if has_res:
        def kernel(ph_ref, w_ref, b_ref, res_ref, o_ref):
            body(ph_ref, w_ref, b_ref, res_ref, o_ref)
    else:
        def kernel(ph_ref, w_ref, b_ref, o_ref):   # no zero-residual stream
            body(ph_ref, w_ref, b_ref, None, o_ref)
    return kernel


def conv2d(x, cfg, res=None):
    """x: [N,H,W,CP] f32; cfg["w"]: [k*k,CP,CP] bf16 (BN scale folded),
    cfg["b"]: [1,CP] f32; res: optional [N,OH,OW,CP] f32 added before ReLU."""
    k, s, pad, relu = cfg["k"], cfg["stride"], cfg["pad"], cfg["relu"]
    N, H, W, C = x.shape
    OH, OW = _conv_out(H, k, s, pad), _conv_out(W, k, s, pad)
    phases = _phase_stack(x.astype(jnp.bfloat16), k, s, pad)  # bf16 MXU inputs

    in_specs = [
        pl.BlockSpec(phases.shape, lambda n, h: (0, 0, 0, 0, 0)),  # VMEM-resident
        pl.BlockSpec(cfg["w"].shape, lambda n, h: (0, 0, 0)),      # VMEM-resident
        pl.BlockSpec((1, C), lambda n, h: (0, 0)),
    ]
    inputs = [phases, cfg["w"], cfg["b"]]
    if res is not None:
        in_specs.append(pl.BlockSpec((1, 1, OW, C), lambda n, h: (n, h, 0, 0)))
        inputs.append(res)

    return pl.pallas_call(
        _make_conv_kernel(k, s, OW, relu, res is not None),
        out_shape=jax.ShapeDtypeStruct((N, OH, OW, C), jnp.float32),
        grid=(N, OH),
        in_specs=in_specs,
        out_specs=pl.BlockSpec((1, 1, OW, C), lambda n, h: (n, h, 0, 0)),
        compiler_params=pltpu.CompilerParams(
            dimension_semantics=("parallel", "parallel")),
    )(*inputs)


# ---------------------------------------------------------------------------
# MaxPool: lane-dense VPU max-tree over the window taps
# ---------------------------------------------------------------------------
def _make_pool_kernel(k, s, OW):
    sp = min(s, k)

    def kernel(ph_ref, o_ref):
        n = pl.program_id(0)
        h = pl.program_id(1)
        m = None
        for i in range(k):
            p, a = i % s, i // s
            for j in range(k):
                q, b = j % s, j // s
                win = ph_ref[p * sp + q, n, h + a, pl.ds(b, OW), :]
                m = win if m is None else jnp.maximum(m, win)
        o_ref[0, 0] = m

    return kernel


def maxpool2d(x, k, s, pad):
    N, H, W, C = x.shape
    OH, OW = _conv_out(H, k, s, pad), _conv_out(W, k, s, pad)
    neg = float(jnp.finfo(x.dtype).min)  # pool runs in f32 (bf16-overflow safe)
    phases = _phase_stack(x, k, s, pad, pad_value=neg)
    return pl.pallas_call(
        _make_pool_kernel(k, s, OW),
        out_shape=jax.ShapeDtypeStruct((N, OH, OW, C), x.dtype),
        grid=(N, OH),
        in_specs=[pl.BlockSpec(phases.shape, lambda n, h: (0, 0, 0, 0, 0))],
        out_specs=pl.BlockSpec((1, 1, OW, C), lambda n, h: (n, h, 0, 0)),
        compiler_params=pltpu.CompilerParams(
            dimension_semantics=("parallel", "parallel")),
    )(phases)


# ---------------------------------------------------------------------------
# Fused tiny tail: adjust 1x1 + extra block 1 + extra block 2 in ONE pallas_call
# ---------------------------------------------------------------------------
def _make_tail_kernel(N, S0, S1, S2):
    bf16, f32 = jnp.bfloat16, jnp.float32

    def conv1x1(load, w_ref, b_ref, dst_ref, S, relu):
        for n in range(N):
            for h in range(S):
                y = jnp.dot(load(n, h), w_ref[0],
                            preferred_element_type=f32) + b_ref[...]
                if relu:
                    y = jnp.maximum(y, 0.0)
                dst_ref[n, h] = y

    def conv3x3_s2p1(src_ref, w_ref, b_ref, dst_ref, S_in, S_out):
        for n in range(N):
            for oy in range(S_out):
                for ox in range(S_out):
                    acc = None
                    for i in range(3):
                        for j in range(3):
                            iy, ix = 2 * oy + i - 1, 2 * ox + j - 1
                            if 0 <= iy < S_in and 0 <= ix < S_in:  # zero-pad taps skipped
                                a = src_ref[n, iy, pl.ds(ix, 1), :].astype(bf16)
                                d = jnp.dot(a, w_ref[i * 3 + j],
                                            preferred_element_type=f32)
                                acc = d if acc is None else acc + d
                    dst_ref[n, oy, pl.ds(ox, 1), :] = jnp.maximum(
                        acc + b_ref[...], 0.0)

    def kernel(x_ref, wa, ba, w11, b11, w12, b12, w21, b21, w22, b22,
               o0_ref, o1_ref, o2_ref, h1_ref, h2_ref):
        # adjust_layer: 1x1 conv + (zero) bias, no ReLU
        conv1x1(lambda n, h: x_ref[n, h], wa, ba, o0_ref, S0, False)
        # extra block 1: 1x1 + ReLU -> 3x3 stride-2 pad-1 + ReLU
        conv1x1(lambda n, h: o0_ref[n, h].astype(bf16), w11, b11, h1_ref, S0, True)
        conv3x3_s2p1(h1_ref, w12, b12, o1_ref, S0, S1)
        # extra block 2: 1x1 + ReLU -> 3x3 stride-2 pad-1 + ReLU
        conv1x1(lambda n, h: o1_ref[n, h].astype(bf16), w21, b21, h2_ref, S1, True)
        conv3x3_s2p1(h2_ref, w22, b22, o2_ref, S1, S2)

    return kernel


def tail_forward(x, params):
    N, S0, _, C = x.shape
    S1 = _conv_out(S0, 3, 2, 1)
    S2 = _conv_out(S1, 3, 2, 1)
    adj = params["adjust"]
    e1, e2 = params["extra"]
    return pl.pallas_call(
        _make_tail_kernel(N, S0, S1, S2),
        out_shape=(jax.ShapeDtypeStruct((N, S0, S0, C), jnp.float32),
                   jax.ShapeDtypeStruct((N, S1, S1, C), jnp.float32),
                   jax.ShapeDtypeStruct((N, S2, S2, C), jnp.float32)),
        scratch_shapes=[pltpu.VMEM((N, S0, S0, C), jnp.float32),
                        pltpu.VMEM((N, S1, S1, C), jnp.float32)],
    )(x.astype(jnp.bfloat16),
      adj["w"], adj["b"],
      e1["c1"]["w"], e1["c1"]["b"], e1["c2"]["w"], e1["c2"]["b"],
      e2["c1"]["w"], e2["c1"]["b"], e2["c2"]["w"], e2["c2"]["b"])


# ---------------------------------------------------------------------------
# Deterministic parameter construction (synthetic; mirrors module __init__)
# ---------------------------------------------------------------------------
class KeyGen:
    def __init__(self, key):
        self.key = key

    def __call__(self):
        self.key, k = jax.random.split(self.key)
        return k


def _xavier_conv(kg, kh, kw, cin, cout):
    bound = math.sqrt(6.0 / (cin * kh * kw + cout * kh * kw))
    return jax.random.uniform(kg(), (kh, kw, cin, cout), jnp.float32, -bound, bound)


def _bn_vectors(kg, c, eps=1e-5):
    gamma = 1.0 + 0.1 * jax.random.normal(kg(), (c,), jnp.float32)
    beta = 0.1 * jax.random.normal(kg(), (c,), jnp.float32)
    mean = 0.05 * jax.random.normal(kg(), (c,), jnp.float32)
    var = jnp.abs(1.0 + 0.1 * jax.random.normal(kg(), (c,), jnp.float32))
    scale = gamma / jnp.sqrt(var + eps)
    shift = beta - mean * scale
    return scale, shift


def _fold_pad_weight(w, scale):
    """Fold BN scale into the weight, pad Cin/Cout to 128 lanes, cast to bf16."""
    kh, kw, cin, cout = w.shape
    wf = w * scale.reshape(1, 1, 1, cout)
    wp = jnp.zeros((kh, kw, CP, CP), jnp.float32).at[:, :, :cin, :cout].set(wf)
    return wp.reshape(kh * kw, CP, CP).astype(jnp.bfloat16)


def _pad_shift(shift):
    return jnp.zeros((1, CP), jnp.float32).at[0, :shift.shape[0]].set(shift)


def _conv_param(kg, k, cin, cout, *, stride, pad, relu, bn):
    w = _xavier_conv(kg, k, k, cin, cout)
    if bn:
        scale, shift = _bn_vectors(kg, cout)
    else:  # plain conv: xavier weight, zero bias (_xavier_init)
        scale = jnp.ones((cout,), jnp.float32)
        shift = jnp.zeros((cout,), jnp.float32)
    return {"w": _fold_pad_weight(w, scale), "b": _pad_shift(shift),
            "k": k, "stride": stride, "pad": pad, "relu": relu}


def _bottleneck_params(kg, cin, width, stride):
    cout = 4 * width
    p = {
        "conv1": _conv_param(kg, 1, cin, width, stride=1, pad=0, relu=True, bn=True),
        "conv2": _conv_param(kg, 3, width, width, stride=stride, pad=1, relu=True, bn=True),
        # ReLU of conv3 is applied AFTER the residual add (fused in the kernel)
        "conv3": _conv_param(kg, 1, width, cout, stride=1, pad=0, relu=True, bn=True),
    }
    if stride != 1 or cin != cout:
        p["ds"] = _conv_param(kg, 1, cin, cout, stride=stride, pad=0, relu=False, bn=True)
    return p


def init_params(key, out_channels=16):
    kg = KeyGen(key)
    return {
        # features[:7] = conv1, bn1, relu, maxpool, layer1, layer2, layer3
        "stem": _conv_param(kg, 7, 3, 8, stride=2, pad=3, relu=True, bn=True),
        "layer1": _bottleneck_params(kg, 8, 4, stride=1),    # -> 16 ch
        "layer2": _bottleneck_params(kg, 16, 8, stride=2),   # -> 32 ch
        # conv4_block1: conv1 / conv2 / downsample strides forced to (1, 1)
        "layer3": _bottleneck_params(kg, 32, 16, stride=1),  # -> 64 ch (= in_channels)
        "adjust": _conv_param(kg, 1, 64, out_channels, stride=1, pad=0,
                              relu=False, bn=False),
        "extra": [
            {"c1": _conv_param(kg, 1, out_channels, 8, stride=1, pad=0,
                               relu=True, bn=False),
             "c2": _conv_param(kg, 3, 8, out_channels, stride=2, pad=1,
                               relu=True, bn=False)}
            for _ in range(2)
        ],
    }


# ---------------------------------------------------------------------------
# Forward pass (same semantics as ResnetSSD_BASELINE_BACKBONE.forward)
# ---------------------------------------------------------------------------
def bottleneck_forward(x, p):
    out = conv2d(x, p["conv1"])
    out = conv2d(out, p["conv2"])
    identity = conv2d(x, p["ds"]) if "ds" in p else x
    return conv2d(out, p["conv3"], res=identity)  # relu(bn3(conv3) + identity)


def _pad_channels(x):
    c = x.shape[-1]
    if c == CP:
        return x
    return jnp.pad(x, ((0, 0), (0, 0), (0, 0), (0, CP - c)))


def forward(params, x_nchw, out_channels=16):
    x = jnp.transpose(x_nchw, (0, 2, 3, 1)).astype(jnp.float32)  # NCHW -> NHWC
    x = _pad_channels(x)                                         # lane-pad to 128
    # self.features(x)
    x = conv2d(x, params["stem"])
    x = maxpool2d(x, 3, 2, 1)
    x = bottleneck_forward(x, params["layer1"])
    x = bottleneck_forward(x, params["layer2"])
    x = bottleneck_forward(x, params["layer3"])
    # self.adjust_layer(x) + the two extra SSD blocks, fused into one kernel
    o0, o1, o2 = tail_forward(x, params)
    return OrderedDict(
        (str(i), jnp.transpose(v[..., :out_channels], (0, 3, 1, 2)))
        for i, v in enumerate([o0, o1, o2]))


if __name__ == "__main__":
    key = jax.random.PRNGKey(0)
    pkey, xkey = jax.random.split(key)
    params = init_params(pkey, out_channels=16)
    x = jax.random.normal(xkey, (2, 3, 32, 32), jnp.float32)

    out = forward(params, x, out_channels=16)
    jax.block_until_ready(out)

    expected = {"0": (2, 16, 4, 4), "1": (2, 16, 2, 2), "2": (2, 16, 1, 1)}
    for kk, shp in expected.items():
        assert out[kk].shape == shp, (kk, out[kk].shape)
        assert bool(jnp.all(jnp.isfinite(out[kk]))), kk
    print("KERNEL_OK")
</pallas_src>

<mosaic_0001>
module attributes {stable_mosaic.version = 11 : i64} {
  func.func @kernel(%arg0: i32, %arg1: i32, %arg2: memref<4x2x19x19x128xbf16, #tpu.memory_space<vmem>>, %arg3: memref<49x128x128xbf16, #tpu.memory_space<vmem>>, %arg4: memref<1x128xf32, #tpu.memory_space<vmem>>, %arg5: memref<1x1x16x128xf32, #tpu.memory_space<vmem>>) attributes {dimension_semantics = [#tpu.dimension_semantics<parallel>, #tpu.dimension_semantics<parallel>], iteration_bounds = array<i64: 2, 16>, scalar_prefetch = 0 : i64, scratch_operands = 0 : i64, tpu.core_type = #tpu.core_type<tc>, window_params = [{pipeline_mode = #tpu.pipeline_mode<synchronous>, transform_indices = @transform_0, window_bounds = array<i64: 4, 2, 19, 19, 128>}, {pipeline_mode = #tpu.pipeline_mode<synchronous>, transform_indices = @transform_1, window_bounds = array<i64: 49, 128, 128>}, {pipeline_mode = #tpu.pipeline_mode<synchronous>, transform_indices = @transform_2, window_bounds = array<i64: 1, 128>}, {transform_indices = @transform_3, window_bounds = array<i64: 1, 1, 16, 128>}]} {
    %c0_i32 = arith.constant 0 : i32
    %0 = arith.addi %arg1, %c0_i32 : i32
    %c0 = arith.constant 0 : index
    %1 = arith.index_cast %arg0 : i32 to index
    %2 = arith.index_cast %0 : i32 to index
    %c0_0 = arith.constant 0 : index
    %c0_1 = arith.constant 0 : index
    %3 = vector.load %arg2[%c0, %1, %2, %c0_0, %c0_1] : memref<4x2x19x19x128xbf16, #tpu.memory_space<vmem>>, vector<1x1x1x16x128xbf16>
    %4 = vector.shape_cast %3 : vector<1x1x1x16x128xbf16> to vector<16x128xbf16>
    %c0_2 = arith.constant 0 : index
    %c0_3 = arith.constant 0 : index
    %c0_4 = arith.constant 0 : index
    %5 = vector.load %arg3[%c0_2, %c0_3, %c0_4] : memref<49x128x128xbf16, #tpu.memory_space<vmem>>, vector<1x128x128xbf16>
    %6 = vector.shape_cast %5 : vector<1x128x128xbf16> to vector<128x128xbf16>
    %cst = arith.constant dense<0.000000e+00> : vector<16x128xf32>
    %7 = tpu.matmul %4, %6, %cst {dimension_numbers = #tpu.dot_dimension_numbers<[1], [0], [0], [1], [0, 0, 1, 1], [], []>} : vector<16x128xbf16>, vector<128x128xbf16>, vector<16x128xf32> -> vector<16x128xf32>
    %c0_i32_5 = arith.constant 0 : i32
    %8 = arith.addi %arg1, %c0_i32_5 : i32
    %c1 = arith.constant 1 : index
    %9 = arith.index_cast %arg0 : i32 to index
    %10 = arith.index_cast %8 : i32 to index
    %c0_6 = arith.constant 0 : index
    %c0_7 = arith.constant 0 : index
    %11 = vector.load %arg2[%c1, %9, %10, %c0_6, %c0_7] : memref<4x2x19x19x128xbf16, #tpu.memory_space<vmem>>, vector<1x1x1x16x128xbf16>
    %12 = vector.shape_cast %11 : vector<1x1x1x16x128xbf16> to vector<16x128xbf16>
    %c1_8 = arith.constant 1 : index
    %c0_9 = arith.constant 0 : index
    %c0_10 = arith.constant 0 : index
    %13 = vector.load %arg3[%c1_8, %c0_9, %c0_10] : memref<49x128x128xbf16, #tpu.memory_space<vmem>>, vector<1x128x128xbf16>
    %14 = vector.shape_cast %13 : vector<1x128x128xbf16> to vector<128x128xbf16>
    %cst_11 = arith.constant dense<0.000000e+00> : vector<16x128xf32>
    %15 = tpu.matmul %12, %14, %cst_11 {dimension_numbers = #tpu.dot_dimension_numbers<[1], [0], [0], [1], [0, 0, 1, 1], [], []>} : vector<16x128xbf16>, vector<128x128xbf16>, vector<16x128xf32> -> vector<16x128xf32>
    %16 = arith.addf %7, %15 : vector<16x128xf32>
    %c0_i32_12 = arith.constant 0 : i32
    %17 = arith.addi %arg1, %c0_i32_12 : i32
    %c0_13 = arith.constant 0 : index
    %18 = arith.index_cast %arg0 : i32 to index
    %19 = arith.index_cast %17 : i32 to index
    %c1_14 = arith.constant 1 : index
    %c0_15 = arith.constant 0 : index
    %20 = vector.load %arg2[%c0_13, %18, %19, %c1_14, %c0_15] : memref<4x2x19x19x128xbf16, #tpu.memory_space<vmem>>, vector<1x1x1x16x128xbf16>
    %21 = vector.shape_cast %20 : vector<1x1x1x16x128xbf16> to vector<16x128xbf16>
    %c2 = arith.constant 2 : index
    %c0_16 = arith.constant 0 : index
    %c0_17 = arith.constant 0 : index
    %22 = vector.load %arg3[%c2, %c0_16, %c0_17] : memref<49x128x128xbf16, #tpu.memory_space<vmem>>, vector<1x128x128xbf16>
    %23 = vector.shape_cast %22 : vector<1x128x128xbf16> to vector<128x128xbf16>
    %cst_18 = arith.constant dense<0.000000e+00> : vector<16x128xf32>
    %24 = tpu.matmul %21, %23, %cst_18 {dimension_numbers = #tpu.dot_dimension_numbers<[1], [0], [0], [1], [0, 0, 1, 1], [], []>} : vector<16x128xbf16>, vector<128x128xbf16>, vector<16x128xf32> -> vector<16x128xf32>
    %25 = arith.addf %16, %24 : vector<16x128xf32>
    %c0_i32_19 = arith.constant 0 : i32
    %26 = arith.addi %arg1, %c0_i32_19 : i32
    %c1_20 = arith.constant 1 : index
    %27 = arith.index_cast %arg0 : i32 to index
    %28 = arith.index_cast %26 : i32 to index
    %c1_21 = arith.constant 1 : index
    %c0_22 = arith.constant 0 : index
    %29 = vector.load %arg2[%c1_20, %27, %28, %c1_21, %c0_22] : memref<4x2x19x19x128xbf16, #tpu.memory_space<vmem>>, vector<1x1x1x16x128xbf16>
    %30 = vector.shape_cast %29 : vector<1x1x1x16x128xbf16> to vector<16x128xbf16>
    %c3 = arith.constant 3 : index
    %c0_23 = arith.constant 0 : index
    %c0_24 = arith.constant 0 : index
    %31 = vector.load %arg3[%c3, %c0_23, %c0_24] : memref<49x128x128xbf16, #tpu.memory_space<vmem>>, vector<1x128x128xbf16>
    %32 = vector.shape_cast %31 : vector<1x128x128xbf16> to vector<128x128xbf16>
    %cst_25 = arith.constant dense<0.000000e+00> : vector<16x128xf32>
    %33 = tpu.matmul %30, %32, %cst_25 {dimension_numbers = #tpu.dot_dimension_numbers<[1], [0], [0], [1], [0, 0, 1, 1], [], []>} : vector<16x128xbf16>, vector<128x128xbf16>, vector<16x128xf32> -> vector<16x128xf32>
    %34 = arith.addf %25, %33 : vector<16x128xf32>
    %c0_i32_26 = arith.constant 0 : i32
    %35 = arith.addi %arg1, %c0_i32_26 : i32
    %c0_27 = arith.constant 0 : index
    %36 = arith.index_cast %arg0 : i32 to index
    %37 = arith.index_cast %35 : i32 to index
    %c2_28 = arith.constant 2 : index
    %c0_29 = arith.constant 0 : index
    %38 = vector.load %arg2[%c0_27, %36, %37, %c2_28, %c0_29] : memref<4x2x19x19x128xbf16, #tpu.memory_space<vmem>>, vector<1x1x1x16x128xbf16>
    %39 = vector.shape_cast %38 : vector<1x1x1x16x128xbf16> to vector<16x128xbf16>
    %c4 = arith.constant 4 : index
    %c0_30 = arith.constant 0 : index
    %c0_31 = arith.constant 0 : index
    %40 = vector.load %arg3[%c4, %c0_30, %c0_31] : memref<49x128x128xbf16, #tpu.memory_space<vmem>>, vector<1x128x128xbf16>
    %41 = vector.shape_cast %40 : vector<1x128x128xbf16> to vector<128x128xbf16>
    %cst_32 = arith.constant dense<0.000000e+00> : vector<16x128xf32>
    %42 = tpu.matmul %39, %41, %cst_32 {dimension_numbers = #tpu.dot_dimension_numbers<[1], [0], [0], [1], [0, 0, 1, 1], [], []>} : vector<16x128xbf16>, vector<128x128xbf16>, vector<16x128xf32> -> vector<16x128xf32>
    %43 = arith.addf %34, %42 : vector<16x128xf32>
    %c0_i32_33 = arith.constant 0 : i32
    %44 = arith.addi %arg1, %c0_i32_33 : i32
    %c1_34 = arith.constant 1 : index
    %45 = arith.index_cast %arg0 : i32 to index
    %46 = arith.index_cast %44 : i32 to index
    %c2_35 = arith.constant 2 : index
    %c0_36 = arith.constant 0 : index
    %47 = vector.load %arg2[%c1_34, %45, %46, %c2_35, %c0_36] : memref<4x2x19x19x128xbf16, #tpu.memory_space<vmem>>, vector<1x1x1x16x128xbf16>
    %48 = vector.shape_cast %47 : vector<1x1x1x16x128xbf16> to vector<16x128xbf16>
    %c5 = arith.constant 5 : index
    %c0_37 = arith.constant 0 : index
    %c0_38 = arith.constant 0 : index
    %49 = vector.load %arg3[%c5, %c0_37, %c0_38] : memref<49x128x128xbf16, #tpu.memory_space<vmem>>, vector<1x128x128xbf16>
    %50 = vector.shape_cast %49 : vector<1x128x128xbf16> to vector<128x128xbf16>
    %cst_39 = arith.constant dense<0.000000e+00> : vector<16x128xf32>
    %51 = tpu.matmul %48, %50, %cst_39 {dimension_numbers = #tpu.dot_dimension_numbers<[1], [0], [0], [1], [0, 0, 1, 1], [], []>} : vector<16x128xbf16>, vector<128x128xbf16>, vector<16x128xf32> -> vector<16x128xf32>
    %52 = arith.addf %43, %51 : vector<16x128xf32>
    %c0_i32_40 = arith.constant 0 : i32
    %53 = arith.addi %arg1, %c0_i32_40 : i32
    %c0_41 = arith.constant 0 : index
    %54 = arith.index_cast %arg0 : i32 to index
    %55 = arith.index_cast %53 : i32 to index
    %c3_42 = arith.constant 3 : index
    %c0_43 = arith.constant 0 : index
    %56 = vector.load %arg2[%c0_41, %54, %55, %c3_42, %c0_43] : memref<4x2x19x19x128xbf16, #tpu.memory_space<vmem>>, vector<1x1x1x16x128xbf16>
    %57 = vector.shape_cast %56 : vector<1x1x1x16x128xbf16> to vector<16x128xbf16>
    %c6 = arith.constant 6 : index
    %c0_44 = arith.constant 0 : index
    %c0_45 = arith.constant 0 : index
    %58 = vector.load %arg3[%c6, %c0_44, %c0_45] : memref<49x128x128xbf16, #tpu.memory_space<vmem>>, vector<1x128x128xbf16>
    %59 = vector.shape_cast %58 : vector<1x128x128xbf16> to vector<128x128xbf16>
    %cst_46 = arith.constant dense<0.000000e+00> : vector<16x128xf32>
    %60 = tpu.matmul %57, %59, %cst_46 {dimension_numbers = #tpu.dot_dimension_numbers<[1], [0], [0], [1], [0, 0, 1, 1], [], []>} : vector<16x128xbf16>, vector<128x128xbf16>, vector<16x128xf32> -> vector<16x128xf32>
    %61 = arith.addf %52, %60 : vector<16x128xf32>
    %c0_i32_47 = arith.constant 0 : i32
    %62 = arith.addi %arg1, %c0_i32_47 : i32
    %c2_48 = arith.constant 2 : index
    %63 = arith.index_cast %arg0 : i32 to index
    %64 = arith.index_cast %62 : i32 to index
    %c0_49 = arith.constant 0 : index
    %c0_50 = arith.constant 0 : index
    %65 = vector.load %arg2[%c2_48, %63, %64, %c0_49, %c0_50] : memref<4x2x19x19x128xbf16, #tpu.memory_space<vmem>>, vector<1x1x1x16x128xbf16>
    %66 = vector.shape_cast %65 : vector<1x1x1x16x128xbf16> to vector<16x128xbf16>
    %c7 = arith.constant 7 : index
    %c0_51 = arith.constant 0 : index
    %c0_52 = arith.constant 0 : index
    %67 = vector.load %arg3[%c7, %c0_51, %c0_52] : memref<49x128x128xbf16, #tpu.memory_space<vmem>>, vector<1x128x128xbf16>
    %68 = vector.shape_cast %67 : vector<1x128x128xbf16> to vector<128x128xbf16>
    %cst_53 = arith.constant dense<0.000000e+00> : vector<16x128xf32>
    %69 = tpu.matmul %66, %68, %cst_53 {dimension_numbers = #tpu.dot_dimension_numbers<[1], [0], [0], [1], [0, 0, 1, 1], [], []>} : vector<16x128xbf16>, vector<128x128xbf16>, vector<16x128xf32> -> vector<16x128xf32>
    %70 = arith.addf %61, %69 : vector<16x128xf32>
    %c0_i32_54 = arith.constant 0 : i32
    %71 = arith.addi %arg1, %c0_i32_54 : i32
    %c3_55 = arith.constant 3 : index
    %72 = arith.index_cast %arg0 : i32 to index
    %73 = arith.index_cast %71 : i32 to index
    %c0_56 = arith.constant 0 : index
    %c0_57 = arith.constant 0 : index
    %74 = vector.load %arg2[%c3_55, %72, %73, %c0_56, %c0_57] : memref<4x2x19x19x128xbf16, #tpu.memory_space<vmem>>, vector<1x1x1x16x128xbf16>
    %75 = vector.shape_cast %74 : vector<1x1x1x16x128xbf16> to vector<16x128xbf16>
    %c8 = arith.constant 8 : index
    %c0_58 = arith.constant 0 : index
    %c0_59 = arith.constant 0 : index
    %76 = vector.load %arg3[%c8, %c0_58, %c0_59] : memref<49x128x128xbf16, #tpu.memory_space<vmem>>, vector<1x128x128xbf16>
    %77 = vector.shape_cast %76 : vector<1x128x128xbf16> to vector<128x128xbf16>
    %cst_60 = arith.constant dense<0.000000e+00> : vector<16x128xf32>
    %78 = tpu.matmul %75, %77, %cst_60 {dimension_numbers = #tpu.dot_dimension_numbers<[1], [0], [0], [1], [0, 0, 1, 1], [], []>} : vector<16x128xbf16>, vector<128x128xbf16>, vector<16x128xf32> -> vector<16x128xf32>
    %79 = arith.addf %70, %78 : vector<16x128xf32>
    %c0_i32_61 = arith.constant 0 : i32
    %80 = arith.addi %arg1, %c0_i32_61 : i32
    %c2_62 = arith.constant 2 : index
    %81 = arith.index_cast %arg0 : i32 to index
    %82 = arith.index_cast %80 : i32 to index
    %c1_63 = arith.constant 1 : index
    %c0_64 = arith.constant 0 : index
    %83 = vector.load %arg2[%c2_62, %81, %82, %c1_63, %c0_64] : memref<4x2x19x19x128xbf16, #tpu.memory_space<vmem>>, vector<1x1x1x16x128xbf16>
    %84 = vector.shape_cast %83 : vector<1x1x1x16x128xbf16> to vector<16x128xbf16>
    %c9 = arith.constant 9 : index
    %c0_65 = arith.constant 0 : index
    %c0_66 = arith.constant 0 : index
    %85 = vector.load %arg3[%c9, %c0_65, %c0_66] : memref<49x128x128xbf16, #tpu.memory_space<vmem>>, vector<1x128x128xbf16>
    %86 = vector.shape_cast %85 : vector<1x128x128xbf16> to vector<128x128xbf16>
    %cst_67 = arith.constant dense<0.000000e+00> : vector<16x128xf32>
    %87 = tpu.matmul %84, %86, %cst_67 {dimension_numbers = #tpu.dot_dimension_numbers<[1], [0], [0], [1], [0, 0, 1, 1], [], []>} : vector<16x128xbf16>, vector<128x128xbf16>, vector<16x128xf32> -> vector<16x128xf32>
    %88 = arith.addf %79, %87 : vector<16x128xf32>
    %c0_i32_68 = arith.constant 0 : i32
    %89 = arith.addi %arg1, %c0_i32_68 : i32
    %c3_69 = arith.constant 3 : index
    %90 = arith.index_cast %arg0 : i32 to index
    %91 = arith.index_cast %89 : i32 to index
    %c1_70 = arith.constant 1 : index
    %c0_71 = arith.constant 0 : index
    %92 = vector.load %arg2[%c3_69, %90, %91, %c1_70, %c0_71] : memref<4x2x19x19x128xbf16, #tpu.memory_space<vmem>>, vector<1x1x1x16x128xbf16>
    %93 = vector.shape_cast %92 : vector<1x1x1x16x128xbf16> to vector<16x128xbf16>
    %c10 = arith.constant 10 : index
    %c0_72 = arith.constant 0 : index
    %c0_73 = arith.constant 0 : index
    %94 = vector.load %arg3[%c10, %c0_72, %c0_73] : memref<49x128x128xbf16, #tpu.memory_space<vmem>>, vector<1x128x128xbf16>
    %95 = vector.shape_cast %94 : vector<1x128x128xbf16> to vector<128x128xbf16>
    %cst_74 = arith.constant dense<0.000000e+00> : vector<16x128xf32>
    %96 = tpu.matmul %93, %95, %cst_74 {dimension_numbers = #tpu.dot_dimension_numbers<[1], [0], [0], [1], [0, 0, 1, 1], [], []>} : vector<16x128xbf16>, vector<128x128xbf16>, vector<16x128xf32> -> vector<16x128xf32>
    %97 = arith.addf %88, %96 : vector<16x128xf32>
    %c0_i32_75 = arith.constant 0 : i32
    %98 = arith.addi %arg1, %c0_i32_75 : i32
    %c2_76 = arith.constant 2 : index
    %99 = arith.index_cast %arg0 : i32 to index
    %100 = arith.index_cast %98 : i32 to index
    %c2_77 = arith.constant 2 : index
    %c0_78 = arith.constant 0 : index
    %101 = vector.load %arg2[%c2_76, %99, %100, %c2_77, %c0_78] : memref<4x2x19x19x128xbf16, #tpu.memory_space<vmem>>, vector<1x1x1x16x128xbf16>
    %102 = vector.shape_cast %101 : vector<1x1x1x16x128xbf16> to vector<16x128xbf16>
    %c11 = arith.constant 11 : index
    %c0_79 = arith.constant 0 : index
    %c0_80 = arith.constant 0 : index
    %103 = vector.load %arg3[%c11, %c0_79, %c0_80] : memref<49x128x128xbf16, #tpu.memory_space<vmem>>, vector<1x128x128xbf16>
    %104 = vector.shape_cast %103 : vector<1x128x128xbf16> to vector<128x128xbf16>
    %cst_81 = arith.constant dense<0.000000e+00> : vector<16x128xf32>
    %105 = tpu.matmul %102, %104, %cst_81 {dimension_numbers = #tpu.dot_dimension_numbers<[1], [0], [0], [1], [0, 0, 1, 1], [], []>} : vector<16x128xbf16>, vector<128x128xbf16>, vector<16x128xf32> -> vector<16x128xf32>
    %106 = arith.addf %97, %105 : vector<16x128xf32>
    %c0_i32_82 = arith.constant 0 : i32
    %107 = arith.addi %arg1, %c0_i32_82 : i32
    %c3_83 = arith.constant 3 : index
    %108 = arith.index_cast %arg0 : i32 to index
    %109 = arith.index_cast %107 : i32 to index
    %c2_84 = arith.constant 2 : index
    %c0_85 = arith.constant 0 : index
    %110 = vector.load %arg2[%c3_83, %108, %109, %c2_84, %c0_85] : memref<4x2x19x19x128xbf16, #tpu.memory_space<vmem>>, vector<1x1x1x16x128xbf16>
    %111 = vector.shape_cast %110 : vector<1x1x1x16x128xbf16> to vector<16x128xbf16>
    %c12 = arith.constant 12 : index
    %c0_86 = arith.constant 0 : index
    %c0_87 = arith.constant 0 : index
    %112 = vector.load %arg3[%c12, %c0_86, %c0_87] : memref<49x128x128xbf16, #tpu.memory_space<vmem>>, vector<1x128x128xbf16>
    %113 = vector.shape_cast %112 : vector<1x128x128xbf16> to vector<128x128xbf16>
    %cst_88 = arith.constant dense<0.000000e+00> : vector<16x128xf32>
    %114 = tpu.matmul %111, %113, %cst_88 {dimension_numbers = #tpu.dot_dimension_numbers<[1], [0], [0], [1], [0, 0, 1, 1], [], []>} : vector<16x128xbf16>, vector<128x128xbf16>, vector<16x128xf32> -> vector<16x128xf32>
    %115 = arith.addf %106, %114 : vector<16x128xf32>
    %c0_i32_89 = arith.constant 0 : i32
    %116 = arith.addi %arg1, %c0_i32_89 : i32
    %c2_90 = arith.constant 2 : index
    %117 = arith.index_cast %arg0 : i32 to index
    %118 = arith.index_cast %116 : i32 to index
    %c3_91 = arith.constant 3 : index
    %c0_92 = arith.constant 0 : index
    %119 = vector.load %arg2[%c2_90, %117, %118, %c3_91, %c0_92] : memref<4x2x19x19x128xbf16, #tpu.memory_space<vmem>>, vector<1x1x1x16x128xbf16>
    %120 = vector.shape_cast %119 : vector<1x1x1x16x128xbf16> to vector<16x128xbf16>
    %c13 = arith.constant 13 : index
    %c0_93 = arith.constant 0 : index
    %c0_94 = arith.constant 0 : index
    %121 = vector.load %arg3[%c13, %c0_93, %c0_94] : memref<49x128x128xbf16, #tpu.memory_space<vmem>>, vector<1x128x128xbf16>
    %122 = vector.shape_cast %121 : vector<1x128x128xbf16> to vector<128x128xbf16>
    %cst_95 = arith.constant dense<0.000000e+00> : vector<16x128xf32>
    %123 = tpu.matmul %120, %122, %cst_95 {dimension_numbers = #tpu.dot_dimension_numbers<[1], [0], [0], [1], [0, 0, 1, 1], [], []>} : vector<16x128xbf16>, vector<128x128xbf16>, vector<16x128xf32> -> vector<16x128xf32>
    %124 = arith.addf %115, %123 : vector<16x128xf32>
    %c1_i32 = arith.constant 1 : i32
    %125 = arith.addi %arg1, %c1_i32 : i32
    %c0_96 = arith.constant 0 : index
    %126 = arith.index_cast %arg0 : i32 to index
    %127 = arith.index_cast %125 : i32 to index
    %c0_97 = arith.constant 0 : index
    %c0_98 = arith.constant 0 : index
    %128 = vector.load %arg2[%c0_96, %126, %127, %c0_97, %c0_98] : memref<4x2x19x19x128xbf16, #tpu.memory_space<vmem>>, vector<1x1x1x16x128xbf16>
    %129 = vector.shape_cast %128 : vector<1x1x1x16x128xbf16> to vector<16x128xbf16>
    %c14 = arith.constant 14 : index
    %c0_99 = arith.constant 0 : index
    %c0_100 = arith.constant 0 : index
    %130 = vector.load %arg3[%c14, %c0_99, %c0_100] : memref<49x128x128xbf16, #tpu.memory_space<vmem>>, vector<1x128x128xbf16>
    %131 = vector.shape_cast %130 : vector<1x128x128xbf16> to vector<128x128xbf16>
    %cst_101 = arith.constant dense<0.000000e+00> : vector<16x128xf32>
    %132 = tpu.matmul %129, %131, %cst_101 {dimension_numbers = #tpu.dot_dimension_numbers<[1], [0], [0], [1], [0, 0, 1, 1], [], []>} : vector<16x128xbf16>, vector<128x128xbf16>, vector<16x128xf32> -> vector<16x128xf32>
    %133 = arith.addf %124, %132 : vector<16x128xf32>
    %c1_i32_102 = arith.constant 1 : i32
    %134 = arith.addi %arg1, %c1_i32_102 : i32
    %c1_103 = arith.constant 1 : index
    %135 = arith.index_cast %arg0 : i32 to index
    %136 = arith.index_cast %134 : i32 to index
    %c0_104 = arith.constant 0 : index
    %c0_105 = arith.constant 0 : index
    %137 = vector.load %arg2[%c1_103, %135, %136, %c0_104, %c0_105] : memref<4x2x19x19x128xbf16, #tpu.memory_space<vmem>>, vector<1x1x1x16x128xbf16>
    %138 = vector.shape_cast %137 : vector<1x1x1x16x128xbf16> to vector<16x128xbf16>
    %c15 = arith.constant 15 : index
    %c0_106 = arith.constant 0 : index
    %c0_107 = arith.constant 0 : index
    %139 = vector.load %arg3[%c15, %c0_106, %c0_107] : memref<49x128x128xbf16, #tpu.memory_space<vmem>>, vector<1x128x128xbf16>
    %140 = vector.shape_cast %139 : vector<1x128x128xbf16> to vector<128x128xbf16>
    %cst_108 = arith.constant dense<0.000000e+00> : vector<16x128xf32>
    %141 = tpu.matmul %138, %140, %cst_108 {dimension_numbers = #tpu.dot_dimension_numbers<[1], [0], [0], [1], [0, 0, 1, 1], [], []>} : vector<16x128xbf16>, vector<128x128xbf16>, vector<16x128xf32> -> vector<16x128xf32>
    %142 = arith.addf %133, %141 : vector<16x128xf32>
    %c1_i32_109 = arith.constant 1 : i32
    %143 = arith.addi %arg1, %c1_i32_109 : i32
    %c0_110 = arith.constant 0 : index
    %144 = arith.index_cast %arg0 : i32 to index
    %145 = arith.index_cast %143 : i32 to index
    %c1_111 = arith.constant 1 : index
    %c0_112 = arith.constant 0 : index
    %146 = vector.load %arg2[%c0_110, %144, %145, %c1_111, %c0_112] : memref<4x2x19x19x128xbf16, #tpu.memory_space<vmem>>, vector<1x1x1x16x128xbf16>
    %147 = vector.shape_cast %146 : vector<1x1x1x16x128xbf16> to vector<16x128xbf16>
    %c16 = arith.constant 16 : index
    %c0_113 = arith.constant 0 : index
    %c0_114 = arith.constant 0 : index
    %148 = vector.load %arg3[%c16, %c0_113, %c0_114] : memref<49x128x128xbf16, #tpu.memory_space<vmem>>, vector<1x128x128xbf16>
    %149 = vector.shape_cast %148 : vector<1x128x128xbf16> to vector<128x128xbf16>
    %cst_115 = arith.constant dense<0.000000e+00> : vector<16x128xf32>
    %150 = tpu.matmul %147, %149, %cst_115 {dimension_numbers = #tpu.dot_dimension_numbers<[1], [0], [0], [1], [0, 0, 1, 1], [], []>} : vector<16x128xbf16>, vector<128x128xbf16>, vector<16x128xf32> -> vector<16x128xf32>
    %151 = arith.addf %142, %150 : vector<16x128xf32>
    %c1_i32_116 = arith.constant 1 : i32
    %152 = arith.addi %arg1, %c1_i32_116 : i32
    %c1_117 = arith.constant 1 : index
    %153 = arith.index_cast %arg0 : i32 to index
    %154 = arith.index_cast %152 : i32 to index
    %c1_118 = arith.constant 1 : index
    %c0_119 = arith.constant 0 : index
    %155 = vector.load %arg2[%c1_117, %153, %154, %c1_118, %c0_119] : memref<4x2x19x19x128xbf16, #tpu.memory_space<vmem>>, vector<1x1x1x16x128xbf16>
    %156 = vector.shape_cast %155 : vector<1x1x1x16x128xbf16> to vector<16x128xbf16>
    %c17 = arith.constant 17 : index
    %c0_120 = arith.constant 0 : index
    %c0_121 = arith.constant 0 : index
    %157 = vector.load %arg3[%c17, %c0_120, %c0_121] : memref<49x128x128xbf16, #tpu.memory_space<vmem>>, vector<1x128x128xbf16>
    %158 = vector.shape_cast %157 : vector<1x128x128xbf16> to vector<128x128xbf16>
    %cst_122 = arith.constant dense<0.000000e+00> : vector<16x128xf32>
    %159 = tpu.matmul %156, %158, %cst_122 {dimension_numbers = #tpu.dot_dimension_numbers<[1], [0], [0], [1], [0, 0, 1, 1], [], []>} : vector<16x128xbf16>, vector<128x128xbf16>, vector<16x128xf32> -> vector<16x128xf32>
    %160 = arith.addf %151, %159 : vector<16x128xf32>
    %c1_i32_123 = arith.constant 1 : i32
    %161 = arith.addi %arg1, %c1_i32_123 : i32
    %c0_124 = arith.constant 0 : index
    %162 = arith.index_cast %arg0 : i32 to index
    %163 = arith.index_cast %161 : i32 to index
    %c2_125 = arith.constant 2 : index
    %c0_126 = arith.constant 0 : index
    %164 = vector.load %arg2[%c0_124, %162, %163, %c2_125, %c0_126] : memref<4x2x19x19x128xbf16, #tpu.memory_space<vmem>>, vector<1x1x1x16x128xbf16>
    %165 = vector.shape_cast %164 : vector<1x1x1x16x128xbf16> to vector<16x128xbf16>
    %c18 = arith.constant 18 : index
    %c0_127 = arith.constant 0 : index
    %c0_128 = arith.constant 0 : index
    %166 = vector.load %arg3[%c18, %c0_127, %c0_128] : memref<49x128x128xbf16, #tpu.memory_space<vmem>>, vector<1x128x128xbf16>
    %167 = vector.shape_cast %166 : vector<1x128x128xbf16> to vector<128x128xbf16>
    %cst_129 = arith.constant dense<0.000000e+00> : vector<16x128xf32>
    %168 = tpu.matmul %165, %167, %cst_129 {dimension_numbers = #tpu.dot_dimension_numbers<[1], [0], [0], [1], [0, 0, 1, 1], [], []>} : vector<16x128xbf16>, vector<128x128xbf16>, vector<16x128xf32> -> vector<16x128xf32>
    %169 = arith.addf %160, %168 : vector<16x128xf32>
    %c1_i32_130 = arith.constant 1 : i32
    %170 = arith.addi %arg1, %c1_i32_130 : i32
    %c1_131 = arith.constant 1 : index
    %171 = arith.index_cast %arg0 : i32 to index
    %172 = arith.index_cast %170 : i32 to index
    %c2_132 = arith.constant 2 : index
    %c0_133 = arith.constant 0 : index
    %173 = vector.load %arg2[%c1_131, %171, %172, %c2_132, %c0_133] : memref<4x2x19x19x128xbf16, #tpu.memory_space<vmem>>, vector<1x1x1x16x128xbf16>
    %174 = vector.shape_cast %173 : vector<1x1x1x16x128xbf16> to vector<16x128xbf16>
    %c19 = arith.constant 19 : index
    %c0_134 = arith.constant 0 : index
    %c0_135 = arith.constant 0 : index
    %175 = vector.load %arg3[%c19, %c0_134, %c0_135] : memref<49x128x128xbf16, #tpu.memory_space<vmem>>, vector<1x128x128xbf16>
    %176 = vector.shape_cast %175 : vector<1x128x128xbf16> to vector<128x128xbf16>
    %cst_136 = arith.constant dense<0.000000e+00> : vector<16x128xf32>
    %177 = tpu.matmul %174, %176, %cst_136 {dimension_numbers = #tpu.dot_dimension_numbers<[1], [0], [0], [1], [0, 0, 1, 1], [], []>} : vector<16x128xbf16>, vector<128x128xbf16>, vector<16x128xf32> -> vector<16x128xf32>
    %178 = arith.addf %169, %177 : vector<16x128xf32>
    %c1_i32_137 = arith.constant 1 : i32
    %179 = arith.addi %arg1, %c1_i32_137 : i32
    %c0_138 = arith.constant 0 : index
    %180 = arith.index_cast %arg0 : i32 to index
    %181 = arith.index_cast %179 : i32 to index
    %c3_139 = arith.constant 3 : index
    %c0_140 = arith.constant 0 : index
    %182 = vector.load %arg2[%c0_138, %180, %181, %c3_139, %c0_140] : memref<4x2x19x19x128xbf16, #tpu.memory_space<vmem>>, vector<1x1x1x16x128xbf16>
    %183 = vector.shape_cast %182 : vector<1x1x1x16x128xbf16> to vector<16x128xbf16>
    %c20 = arith.constant 20 : index
    %c0_141 = arith.constant 0 : index
    %c0_142 = arith.constant 0 : index
    %184 = vector.load %arg3[%c20, %c0_141, %c0_142] : memref<49x128x128xbf16, #tpu.memory_space<vmem>>, vector<1x128x128xbf16>
    %185 = vector.shape_cast %184 : vector<1x128x128xbf16> to vector<128x128xbf16>
    %cst_143 = arith.constant dense<0.000000e+00> : vector<16x128xf32>
    %186 = tpu.matmul %183, %185, %cst_143 {dimension_numbers = #tpu.dot_dimension_numbers<[1], [0], [0], [1], [0, 0, 1, 1], [], []>} : vector<16x128xbf16>, vector<128x128xbf16>, vector<16x128xf32> -> vector<16x128xf32>
    %187 = arith.addf %178, %186 : vector<16x128xf32>
    %c1_i32_144 = arith.constant 1 : i32
    %188 = arith.addi %arg1, %c1_i32_144 : i32
    %c2_145 = arith.constant 2 : index
    %189 = arith.index_cast %arg0 : i32 to index
    %190 = arith.index_cast %188 : i32 to index
    %c0_146 = arith.constant 0 : index
    %c0_147 = arith.constant 0 : index
    %191 = vector.load %arg2[%c2_145, %189, %190, %c0_146, %c0_147] : memref<4x2x19x19x128xbf16, #tpu.memory_space<vmem>>, vector<1x1x1x16x128xbf16>
    %192 = vector.shape_cast %191 : vector<1x1x1x16x128xbf16> to vector<16x128xbf16>
    %c21 = arith.constant 21 : index
    %c0_148 = arith.constant 0 : index
    %c0_149 = arith.constant 0 : index
    %193 = vector.load %arg3[%c21, %c0_148, %c0_149] : memref<49x128x128xbf16, #tpu.memory_space<vmem>>, vector<1x128x128xbf16>
    %194 = vector.shape_cast %193 : vector<1x128x128xbf16> to vector<128x128xbf16>
    %cst_150 = arith.constant dense<0.000000e+00> : vector<16x128xf32>
    %195 = tpu.matmul %192, %194, %cst_150 {dimension_numbers = #tpu.dot_dimension_numbers<[1], [0], [0], [1], [0, 0, 1, 1], [], []>} : vector<16x128xbf16>, vector<128x128xbf16>, vector<16x128xf32> -> vector<16x128xf32>
    %196 = arith.addf %187, %195 : vector<16x128xf32>
    %c1_i32_151 = arith.constant 1 : i32
    %197 = arith.addi %arg1, %c1_i32_151 : i32
    %c3_152 = arith.constant 3 : index
    %198 = arith.index_cast %arg0 : i32 to index
    %199 = arith.index_cast %197 : i32 to index
    %c0_153 = arith.constant 0 : index
    %c0_154 = arith.constant 0 : index
    %200 = vector.load %arg2[%c3_152, %198, %199, %c0_153, %c0_154] : memref<4x2x19x19x128xbf16, #tpu.memory_space<vmem>>, vector<1x1x1x16x128xbf16>
    %201 = vector.shape_cast %200 : vector<1x1x1x16x128xbf16> to vector<16x128xbf16>
    %c22 = arith.constant 22 : index
    %c0_155 = arith.constant 0 : index
    %c0_156 = arith.constant 0 : index
    %202 = vector.load %arg3[%c22, %c0_155, %c0_156] : memref<49x128x128xbf16, #tpu.memory_space<vmem>>, vector<1x128x128xbf16>
    %203 = vector.shape_cast %202 : vector<1x128x128xbf16> to vector<128x128xbf16>
    %cst_157 = arith.constant dense<0.000000e+00> : vector<16x128xf32>
    %204 = tpu.matmul %201, %203, %cst_157 {dimension_numbers = #tpu.dot_dimension_numbers<[1], [0], [0], [1], [0, 0, 1, 1], [], []>} : vector<16x128xbf16>, vector<128x128xbf16>, vector<16x128xf32> -> vector<16x128xf32>
    %205 = arith.addf %196, %204 : vector<16x128xf32>
    %c1_i32_158 = arith.constant 1 : i32
    %206 = arith.addi %arg1, %c1_i32_158 : i32
    %c2_159 = arith.constant 2 : index
    %207 = arith.index_cast %arg0 : i32 to index
    %208 = arith.index_cast %206 : i32 to index
    %c1_160 = arith.constant 1 : index
    %c0_161 = arith.constant 0 : index
    %209 = vector.load %arg2[%c2_159, %207, %208, %c1_160, %c0_161] : memref<4x2x19x19x128xbf16, #tpu.memory_space<vmem>>, vector<1x1x1x16x128xbf16>
    %210 = vector.shape_cast %209 : vector<1x1x1x16x128xbf16> to vector<16x128xbf16>
    %c23 = arith.constant 23 : index
    %c0_162 = arith.constant 0 : index
    %c0_163 = arith.constant 0 : index
    %211 = vector.load %arg3[%c23, %c0_162, %c0_163] : memref<49x128x128xbf16, #tpu.memory_space<vmem>>, vector<1x128x128xbf16>
    %212 = vector.shape_cast %211 : vector<1x128x128xbf16> to vector<128x128xbf16>
    %cst_164 = arith.constant dense<0.000000e+00> : vector<16x128xf32>
    %213 = tpu.matmul %210, %212, %cst_164 {dimension_numbers = #tpu.dot_dimension_numbers<[1], [0], [0], [1], [0, 0, 1, 1], [], []>} : vector<16x128xbf16>, vector<128x128xbf16>, vector<16x128xf32> -> vector<16x128xf32>
    %214 = arith.addf %205, %213 : vector<16x128xf32>
    %c1_i32_165 = arith.constant 1 : i32
    %215 = arith.addi %arg1, %c1_i32_165 : i32
    %c3_166 = arith.constant 3 : index
    %216 = arith.index_cast %arg0 : i32 to index
    %217 = arith.index_cast %215 : i32 to index
    %c1_167 = arith.constant 1 : index
    %c0_168 = arith.constant 0 : index
    %218 = vector.load %arg2[%c3_166, %216, %217, %c1_167, %c0_168] : memref<4x2x19x19x128xbf16, #tpu.memory_space<vmem>>, vector<1x1x1x16x128xbf16>
    %219 = vector.shape_cast %218 : vector<1x1x1x16x128xbf16> to vector<16x128xbf16>
    %c24 = arith.constant 24 : index
    %c0_169 = arith.constant 0 : index
    %c0_170 = arith.constant 0 : index
    %220 = vector.load %arg3[%c24, %c0_169, %c0_170] : memref<49x128x128xbf16, #tpu.memory_space<vmem>>, vector<1x128x128xbf16>
    %221 = vector.shape_cast %220 : vector<1x128x128xbf16> to vector<128x128xbf16>
    %cst_171 = arith.constant dense<0.000000e+00> : vector<16x128xf32>
    %222 = tpu.matmul %219, %221, %cst_171 {dimension_numbers = #tpu.dot_dimension_numbers<[1], [0], [0], [1], [0, 0, 1, 1], [], []>} : vector<16x128xbf16>, vector<128x128xbf16>, vector<16x128xf32> -> vector<16x128xf32>
    %223 = arith.addf %214, %222 : vector<16x128xf32>
    %c1_i32_172 = arith.constant 1 : i32
    %224 = arith.addi %arg1, %c1_i32_172 : i32
    %c2_173 = arith.constant 2 : index
    %225 = arith.index_cast %arg0 : i32 to index
    %226 = arith.index_cast %224 : i32 to index
    %c2_174 = arith.constant 2 : index
    %c0_175 = arith.constant 0 : index
    %227 = vector.load %arg2[%c2_173, %225, %226, %c2_174, %c0_175] : memref<4x2x19x19x128xbf16, #tpu.memory_space<vmem>>, vector<1x1x1x16x128xbf16>
    %228 = vector.shape_cast %227 : vector<1x1x1x16x128xbf16> to vector<16x128xbf16>
    %c25 = arith.constant 25 : index
    %c0_176 = arith.constant 0 : index
    %c0_177 = arith.constant 0 : index
    %229 = vector.load %arg3[%c25, %c0_176, %c0_177] : memref<49x128x128xbf16, #tpu.memory_space<vmem>>, vector<1x128x128xbf16>
    %230 = vector.shape_cast %229 : vector<1x128x128xbf16> to vector<128x128xbf16>
    %cst_178 = arith.constant dense<0.000000e+00> : vector<16x128xf32>
    %231 = tpu.matmul %228, %230, %cst_178 {dimension_numbers = #tpu.dot_dimension_numbers<[1], [0], [0], [1], [0, 0, 1, 1], [], []>} : vector<16x128xbf16>, vector<128x128xbf16>, vector<16x128xf32> -> vector<16x128xf32>
    %232 = arith.addf %223, %231 : vector<16x128xf32>
    %c1_i32_179 = arith.constant 1 : i32
    %233 = arith.addi %arg1, %c1_i32_179 : i32
    %c3_180 = arith.constant 3 : index
    %234 = arith.index_cast %arg0 : i32 to index
    %235 = arith.index_cast %233 : i32 to index
    %c2_181 = arith.constant 2 : index
    %c0_182 = arith.constant 0 : index
    %236 = vector.load %arg2[%c3_180, %234, %235, %c2_181, %c0_182] : memref<4x2x19x19x128xbf16, #tpu.memory_space<vmem>>, vector<1x1x1x16x128xbf16>
    %237 = vector.shape_cast %236 : vector<1x1x1x16x128xbf16> to vector<16x128xbf16>
    %c26 = arith.constant 26 : index
    %c0_183 = arith.constant 0 : index
    %c0_184 = arith.constant 0 : index
    %238 = vector.load %arg3[%c26, %c0_183, %c0_184] : memref<49x128x128xbf16, #tpu.memory_space<vmem>>, vector<1x128x128xbf16>
    %239 = vector.shape_cast %238 : vector<1x128x128xbf16> to vector<128x128xbf16>
    %cst_185 = arith.constant dense<0.000000e+00> : vector<16x128xf32>
    %240 = tpu.matmul %237, %239, %cst_185 {dimension_numbers = #tpu.dot_dimension_numbers<[1], [0], [0], [1], [0, 0, 1, 1], [], []>} : vector<16x128xbf16>, vector<128x128xbf16>, vector<16x128xf32> -> vector<16x128xf32>
    %241 = arith.addf %232, %240 : vector<16x128xf32>
    %c1_i32_186 = arith.constant 1 : i32
    %242 = arith.addi %arg1, %c1_i32_186 : i32
    %c2_187 = arith.constant 2 : index
    %243 = arith.index_cast %arg0 : i32 to index
    %244 = arith.index_cast %242 : i32 to index
    %c3_188 = arith.constant 3 : index
    %c0_189 = arith.constant 0 : index
    %245 = vector.load %arg2[%c2_187, %243, %244, %c3_188, %c0_189] : memref<4x2x19x19x128xbf16, #tpu.memory_space<vmem>>, vector<1x1x1x16x128xbf16>
    %246 = vector.shape_cast %245 : vector<1x1x1x16x128xbf16> to vector<16x128xbf16>
    %c27 = arith.constant 27 : index
    %c0_190 = arith.constant 0 : index
    %c0_191 = arith.constant 0 : index
    %247 = vector.load %arg3[%c27, %c0_190, %c0_191] : memref<49x128x128xbf16, #tpu.memory_space<vmem>>, vector<1x128x128xbf16>
    %248 = vector.shape_cast %247 : vector<1x128x128xbf16> to vector<128x128xbf16>
    %cst_192 = arith.constant dense<0.000000e+00> : vector<16x128xf32>
    %249 = tpu.matmul %246, %248, %cst_192 {dimension_numbers = #tpu.dot_dimension_numbers<[1], [0], [0], [1], [0, 0, 1, 1], [], []>} : vector<16x128xbf16>, vector<128x128xbf16>, vector<16x128xf32> -> vector<16x128xf32>
    %250 = arith.addf %241, %249 : vector<16x128xf32>
    %c2_i32 = arith.constant 2 : i32
    %251 = arith.addi %arg1, %c2_i32 : i32
    %c0_193 = arith.constant 0 : index
    %252 = arith.index_cast %arg0 : i32 to index
    %253 = arith.index_cast %251 : i32 to index
    %c0_194 = arith.constant 0 : index
    %c0_195 = arith.constant 0 : index
    %254 = vector.load %arg2[%c0_193, %252, %253, %c0_194, %c0_195] : memref<4x2x19x19x128xbf16, #tpu.memory_space<vmem>>, vector<1x1x1x16x128xbf16>
    %255 = vector.shape_cast %254 : vector<1x1x1x16x128xbf16> to vector<16x128xbf16>
    %c28 = arith.constant 28 : index
    %c0_196 = arith.constant 0 : index
    %c0_197 = arith.constant 0 : index
    %256 = vector.load %arg3[%c28, %c0_196, %c0_197] : memref<49x128x128xbf16, #tpu.memory_space<vmem>>, vector<1x128x128xbf16>
    %257 = vector.shape_cast %256 : vector<1x128x128xbf16> to vector<128x128xbf16>
    %cst_198 = arith.constant dense<0.000000e+00> : vector<16x128xf32>
    %258 = tpu.matmul %255, %257, %cst_198 {dimension_numbers = #tpu.dot_dimension_numbers<[1], [0], [0], [1], [0, 0, 1, 1], [], []>} : vector<16x128xbf16>, vector<128x128xbf16>, vector<16x128xf32> -> vector<16x128xf32>
    %259 = arith.addf %250, %258 : vector<16x128xf32>
    %c2_i32_199 = arith.constant 2 : i32
    %260 = arith.addi %arg1, %c2_i32_199 : i32
    %c1_200 = arith.constant 1 : index
    %261 = arith.index_cast %arg0 : i32 to index
    %262 = arith.index_cast %260 : i32 to index
    %c0_201 = arith.constant 0 : index
    %c0_202 = arith.constant 0 : index
    %263 = vector.load %arg2[%c1_200, %261, %262, %c0_201, %c0_202] : memref<4x2x19x19x128xbf16, #tpu.memory_space<vmem>>, vector<1x1x1x16x128xbf16>
    %264 = vector.shape_cast %263 : vector<1x1x1x16x128xbf16> to vector<16x128xbf16>
    %c29 = arith.constant 29 : index
    %c0_203 = arith.constant 0 : index
    %c0_204 = arith.constant 0 : index
    %265 = vector.load %arg3[%c29, %c0_203, %c0_204] : memref<49x128x128xbf16, #tpu.memory_space<vmem>>, vector<1x128x128xbf16>
    %266 = vector.shape_cast %265 : vector<1x128x128xbf16> to vector<128x128xbf16>
    %cst_205 = arith.constant dense<0.000000e+00> : vector<16x128xf32>
    %267 = tpu.matmul %264, %266, %cst_205 {dimension_numbers = #tpu.dot_dimension_numbers<[1], [0], [0], [1], [0, 0, 1, 1], [], []>} : vector<16x128xbf16>, vector<128x128xbf16>, vector<16x128xf32> -> vector<16x128xf32>
    %268 = arith.addf %259, %267 : vector<16x128xf32>
    %c2_i32_206 = arith.constant 2 : i32
    %269 = arith.addi %arg1, %c2_i32_206 : i32
    %c0_207 = arith.constant 0 : index
    %270 = arith.index_cast %arg0 : i32 to index
    %271 = arith.index_cast %269 : i32 to index
    %c1_208 = arith.constant 1 : index
    %c0_209 = arith.constant 0 : index
    %272 = vector.load %arg2[%c0_207, %270, %271, %c1_208, %c0_209] : memref<4x2x19x19x128xbf16, #tpu.memory_space<vmem>>, vector<1x1x1x16x128xbf16>
    %273 = vector.shape_cast %272 : vector<1x1x1x16x128xbf16> to vector<16x128xbf16>
    %c30 = arith.constant 30 : index
    %c0_210 = arith.constant 0 : index
    %c0_211 = arith.constant 0 : index
    %274 = vector.load %arg3[%c30, %c0_210, %c0_211] : memref<49x128x128xbf16, #tpu.memory_space<vmem>>, vector<1x128x128xbf16>
    %275 = vector.shape_cast %274 : vector<1x128x128xbf16> to vector<128x128xbf16>
    %cst_212 = arith.constant dense<0.000000e+00> : vector<16x128xf32>
    %276 = tpu.matmul %273, %275, %cst_212 {dimension_numbers = #tpu.dot_dimension_numbers<[1], [0], [0], [1], [0, 0, 1, 1], [], []>} : vector<16x128xbf16>, vector<128x128xbf16>, vector<16x128xf32> -> vector<16x128xf32>
    %277 = arith.addf %268, %276 : vector<16x128xf32>
    %c2_i32_213 = arith.constant 2 : i32
    %278 = arith.addi %arg1, %c2_i32_213 : i32
    %c1_214 = arith.constant 1 : index
    %279 = arith.index_cast %arg0 : i32 to index
    %280 = arith.index_cast %278 : i32 to index
    %c1_215 = arith.constant 1 : index
    %c0_216 = arith.constant 0 : index
    %281 = vector.load %arg2[%c1_214, %279, %280, %c1_215, %c0_216] : memref<4x2x19x19x128xbf16, #tpu.memory_space<vmem>>, vector<1x1x1x16x128xbf16>
    %282 = vector.shape_cast %281 : vector<1x1x1x16x128xbf16> to vector<16x128xbf16>
    %c31 = arith.constant 31 : index
    %c0_217 = arith.constant 0 : index
    %c0_218 = arith.constant 0 : index
    %283 = vector.load %arg3[%c31, %c0_217, %c0_218] : memref<49x128x128xbf16, #tpu.memory_space<vmem>>, vector<1x128x128xbf16>
    %284 = vector.shape_cast %283 : vector<1x128x128xbf16> to vector<128x128xbf16>
    %cst_219 = arith.constant dense<0.000000e+00> : vector<16x128xf32>
    %285 = tpu.matmul %282, %284, %cst_219 {dimension_numbers = #tpu.dot_dimension_numbers<[1], [0], [0], [1], [0, 0, 1, 1], [], []>} : vector<16x128xbf16>, vector<128x128xbf16>, vector<16x128xf32> -> vector<16x128xf32>
    %286 = arith.addf %277, %285 : vector<16x128xf32>
    %c2_i32_220 = arith.constant 2 : i32
    %287 = arith.addi %arg1, %c2_i32_220 : i32
    %c0_221 = arith.constant 0 : index
    %288 = arith.index_cast %arg0 : i32 to index
    %289 = arith.index_cast %287 : i32 to index
    %c2_222 = arith.constant 2 : index
    %c0_223 = arith.constant 0 : index
    %290 = vector.load %arg2[%c0_221, %288, %289, %c2_222, %c0_223] : memref<4x2x19x19x128xbf16, #tpu.memory_space<vmem>>, vector<1x1x1x16x128xbf16>
    %291 = vector.shape_cast %290 : vector<1x1x1x16x128xbf16> to vector<16x128xbf16>
    %c32 = arith.constant 32 : index
    %c0_224 = arith.constant 0 : index
    %c0_225 = arith.constant 0 : index
    %292 = vector.load %arg3[%c32, %c0_224, %c0_225] : memref<49x128x128xbf16, #tpu.memory_space<vmem>>, vector<1x128x128xbf16>
    %293 = vector.shape_cast %292 : vector<1x128x128xbf16> to vector<128x128xbf16>
    %cst_226 = arith.constant dense<0.000000e+00> : vector<16x128xf32>
    %294 = tpu.matmul %291, %293, %cst_226 {dimension_numbers = #tpu.dot_dimension_numbers<[1], [0], [0], [1], [0, 0, 1, 1], [], []>} : vector<16x128xbf16>, vector<128x128xbf16>, vector<16x128xf32> -> vector<16x128xf32>
    %295 = arith.addf %286, %294 : vector<16x128xf32>
    %c2_i32_227 = arith.constant 2 : i32
    %296 = arith.addi %arg1, %c2_i32_227 : i32
    %c1_228 = arith.constant 1 : index
    %297 = arith.index_cast %arg0 : i32 to index
    %298 = arith.index_cast %296 : i32 to index
    %c2_229 = arith.constant 2 : index
    %c0_230 = arith.constant 0 : index
    %299 = vector.load %arg2[%c1_228, %297, %298, %c2_229, %c0_230] : memref<4x2x19x19x128xbf16, #tpu.memory_space<vmem>>, vector<1x1x1x16x128xbf16>
    %300 = vector.shape_cast %299 : vector<1x1x1x16x128xbf16> to vector<16x128xbf16>
    %c33 = arith.constant 33 : index
    %c0_231 = arith.constant 0 : index
    %c0_232 = arith.constant 0 : index
    %301 = vector.load %arg3[%c33, %c0_231, %c0_232] : memref<49x128x128xbf16, #tpu.memory_space<vmem>>, vector<1x128x128xbf16>
    %302 = vector.shape_cast %301 : vector<1x128x128xbf16> to vector<128x128xbf16>
    %cst_233 = arith.constant dense<0.000000e+00> : vector<16x128xf32>
    %303 = tpu.matmul %300, %302, %cst_233 {dimension_numbers = #tpu.dot_dimension_numbers<[1], [0], [0], [1], [0, 0, 1, 1], [], []>} : vector<16x128xbf16>, vector<128x128xbf16>, vector<16x128xf32> -> vector<16x128xf32>
    %304 = arith.addf %295, %303 : vector<16x128xf32>
    %c2_i32_234 = arith.constant 2 : i32
    %305 = arith.addi %arg1, %c2_i32_234 : i32
    %c0_235 = arith.constant 0 : index
    %306 = arith.index_cast %arg0 : i32 to index
    %307 = arith.index_cast %305 : i32 to index
    %c3_236 = arith.constant 3 : index
    %c0_237 = arith.constant 0 : index
    %308 = vector.load %arg2[%c0_235, %306, %307, %c3_236, %c0_237] : memref<4x2x19x19x128xbf16, #tpu.memory_space<vmem>>, vector<1x1x1x16x128xbf16>
    %309 = vector.shape_cast %308 : vector<1x1x1x16x128xbf16> to vector<16x128xbf16>
    %c34 = arith.constant 34 : index
    %c0_238 = arith.constant 0 : index
    %c0_239 = arith.constant 0 : index
    %310 = vector.load %arg3[%c34, %c0_238, %c0_239] : memref<49x128x128xbf16, #tpu.memory_space<vmem>>, vector<1x128x128xbf16>
    %311 = vector.shape_cast %310 : vector<1x128x128xbf16> to vector<128x128xbf16>
    %cst_240 = arith.constant dense<0.000000e+00> : vector<16x128xf32>
    %312 = tpu.matmul %309, %311, %cst_240 {dimension_numbers = #tpu.dot_dimension_numbers<[1], [0], [0], [1], [0, 0, 1, 1], [], []>} : vector<16x128xbf16>, vector<128x128xbf16>, vector<16x128xf32> -> vector<16x128xf32>
    %313 = arith.addf %304, %312 : vector<16x128xf32>
    %c2_i32_241 = arith.constant 2 : i32
    %314 = arith.addi %arg1, %c2_i32_241 : i32
    %c2_242 = arith.constant 2 : index
    %315 = arith.index_cast %arg0 : i32 to index
    %316 = arith.index_cast %314 : i32 to index
    %c0_243 = arith.constant 0 : index
    %c0_244 = arith.constant 0 : index
    %317 = vector.load %arg2[%c2_242, %315, %316, %c0_243, %c0_244] : memref<4x2x19x19x128xbf16, #tpu.memory_space<vmem>>, vector<1x1x1x16x128xbf16>
    %318 = vector.shape_cast %317 : vector<1x1x1x16x128xbf16> to vector<16x128xbf16>
    %c35 = arith.constant 35 : index
    %c0_245 = arith.constant 0 : index
    %c0_246 = arith.constant 0 : index
    %319 = vector.load %arg3[%c35, %c0_245, %c0_246] : memref<49x128x128xbf16, #tpu.memory_space<vmem>>, vector<1x128x128xbf16>
    %320 = vector.shape_cast %319 : vector<1x128x128xbf16> to vector<128x128xbf16>
    %cst_247 = arith.constant dense<0.000000e+00> : vector<16x128xf32>
    %321 = tpu.matmul %318, %320, %cst_247 {dimension_numbers = #tpu.dot_dimension_numbers<[1], [0], [0], [1], [0, 0, 1, 1], [], []>} : vector<16x128xbf16>, vector<128x128xbf16>, vector<16x128xf32> -> vector<16x128xf32>
    %322 = arith.addf %313, %321 : vector<16x128xf32>
    %c2_i32_248 = arith.constant 2 : i32
    %323 = arith.addi %arg1, %c2_i32_248 : i32
    %c3_249 = arith.constant 3 : index
    %324 = arith.index_cast %arg0 : i32 to index
    %325 = arith.index_cast %323 : i32 to index
    %c0_250 = arith.constant 0 : index
    %c0_251 = arith.constant 0 : index
    %326 = vector.load %arg2[%c3_249, %324, %325, %c0_250, %c0_251] : memref<4x2x19x19x128xbf16, #tpu.memory_space<vmem>>, vector<1x1x1x16x128xbf16>
    %327 = vector.shape_cast %326 : vector<1x1x1x16x128xbf16> to vector<16x128xbf16>
    %c36 = arith.constant 36 : index
    %c0_252 = arith.constant 0 : index
    %c0_253 = arith.constant 0 : index
    %328 = vector.load %arg3[%c36, %c0_252, %c0_253] : memref<49x128x128xbf16, #tpu.memory_space<vmem>>, vector<1x128x128xbf16>
    %329 = vector.shape_cast %328 : vector<1x128x128xbf16> to vector<128x128xbf16>
    %cst_254 = arith.constant dense<0.000000e+00> : vector<16x128xf32>
    %330 = tpu.matmul %327, %329, %cst_254 {dimension_numbers = #tpu.dot_dimension_numbers<[1], [0], [0], [1], [0, 0, 1, 1], [], []>} : vector<16x128xbf16>, vector<128x128xbf16>, vector<16x128xf32> -> vector<16x128xf32>
    %331 = arith.addf %322, %330 : vector<16x128xf32>
    %c2_i32_255 = arith.constant 2 : i32
    %332 = arith.addi %arg1, %c2_i32_255 : i32
    %c2_256 = arith.constant 2 : index
    %333 = arith.index_cast %arg0 : i32 to index
    %334 = arith.index_cast %332 : i32 to index
    %c1_257 = arith.constant 1 : index
    %c0_258 = arith.constant 0 : index
    %335 = vector.load %arg2[%c2_256, %333, %334, %c1_257, %c0_258] : memref<4x2x19x19x128xbf16, #tpu.memory_space<vmem>>, vector<1x1x1x16x128xbf16>
    %336 = vector.shape_cast %335 : vector<1x1x1x16x128xbf16> to vector<16x128xbf16>
    %c37 = arith.constant 37 : index
    %c0_259 = arith.constant 0 : index
    %c0_260 = arith.constant 0 : index
    %337 = vector.load %arg3[%c37, %c0_259, %c0_260] : memref<49x128x128xbf16, #tpu.memory_space<vmem>>, vector<1x128x128xbf16>
    %338 = vector.shape_cast %337 : vector<1x128x128xbf16> to vector<128x128xbf16>
    %cst_261 = arith.constant dense<0.000000e+00> : vector<16x128xf32>
    %339 = tpu.matmul %336, %338, %cst_261 {dimension_numbers = #tpu.dot_dimension_numbers<[1], [0], [0], [1], [0, 0, 1, 1], [], []>} : vector<16x128xbf16>, vector<128x128xbf16>, vector<16x128xf32> -> vector<16x128xf32>
    %340 = arith.addf %331, %339 : vector<16x128xf32>
    %c2_i32_262 = arith.constant 2 : i32
    %341 = arith.addi %arg1, %c2_i32_262 : i32
    %c3_263 = arith.constant 3 : index
    %342 = arith.index_cast %arg0 : i32 to index
    %343 = arith.index_cast %341 : i32 to index
    %c1_264 = arith.constant 1 : index
    %c0_265 = arith.constant 0 : index
    %344 = vector.load %arg2[%c3_263, %342, %343, %c1_264, %c0_265] : memref<4x2x19x19x128xbf16, #tpu.memory_space<vmem>>, vector<1x1x1x16x128xbf16>
    %345 = vector.shape_cast %344 : vector<1x1x1x16x128xbf16> to vector<16x128xbf16>
    %c38 = arith.constant 38 : index
    %c0_266 = arith.constant 0 : index
    %c0_267 = arith.constant 0 : index
    %346 = vector.load %arg3[%c38, %c0_266, %c0_267] : memref<49x128x128xbf16, #tpu.memory_space<vmem>>, vector<1x128x128xbf16>
    %347 = vector.shape_cast %346 : vector<1x128x128xbf16> to vector<128x128xbf16>
    %cst_268 = arith.constant dense<0.000000e+00> : vector<16x128xf32>
    %348 = tpu.matmul %345, %347, %cst_268 {dimension_numbers = #tpu.dot_dimension_numbers<[1], [0], [0], [1], [0, 0, 1, 1], [], []>} : vector<16x128xbf16>, vector<128x128xbf16>, vector<16x128xf32> -> vector<16x128xf32>
    %349 = arith.addf %340, %348 : vector<16x128xf32>
    %c2_i32_269 = arith.constant 2 : i32
    %350 = arith.addi %arg1, %c2_i32_269 : i32
    %c2_270 = arith.constant 2 : index
    %351 = arith.index_cast %arg0 : i32 to index
    %352 = arith.index_cast %350 : i32 to index
    %c2_271 = arith.constant 2 : index
    %c0_272 = arith.constant 0 : index
    %353 = vector.load %arg2[%c2_270, %351, %352, %c2_271, %c0_272] : memref<4x2x19x19x128xbf16, #tpu.memory_space<vmem>>, vector<1x1x1x16x128xbf16>
    %354 = vector.shape_cast %353 : vector<1x1x1x16x128xbf16> to vector<16x128xbf16>
    %c39 = arith.constant 39 : index
    %c0_273 = arith.constant 0 : index
    %c0_274 = arith.constant 0 : index
    %355 = vector.load %arg3[%c39, %c0_273, %c0_274] : memref<49x128x128xbf16, #tpu.memory_space<vmem>>, vector<1x128x128xbf16>
    %356 = vector.shape_cast %355 : vector<1x128x128xbf16> to vector<128x128xbf16>
    %cst_275 = arith.constant dense<0.000000e+00> : vector<16x128xf32>
    %357 = tpu.matmul %354, %356, %cst_275 {dimension_numbers = #tpu.dot_dimension_numbers<[1], [0], [0], [1], [0, 0, 1, 1], [], []>} : vector<16x128xbf16>, vector<128x128xbf16>, vector<16x128xf32> -> vector<16x128xf32>
    %358 = arith.addf %349, %357 : vector<16x128xf32>
    %c2_i32_276 = arith.constant 2 : i32
    %359 = arith.addi %arg1, %c2_i32_276 : i32
    %c3_277 = arith.constant 3 : index
    %360 = arith.index_cast %arg0 : i32 to index
    %361 = arith.index_cast %359 : i32 to index
    %c2_278 = arith.constant 2 : index
    %c0_279 = arith.constant 0 : index
    %362 = vector.load %arg2[%c3_277, %360, %361, %c2_278, %c0_279] : memref<4x2x19x19x128xbf16, #tpu.memory_space<vmem>>, vector<1x1x1x16x128xbf16>
    %363 = vector.shape_cast %362 : vector<1x1x1x16x128xbf16> to vector<16x128xbf16>
    %c40 = arith.constant 40 : index
    %c0_280 = arith.constant 0 : index
    %c0_281 = arith.constant 0 : index
    %364 = vector.load %arg3[%c40, %c0_280, %c0_281] : memref<49x128x128xbf16, #tpu.memory_space<vmem>>, vector<1x128x128xbf16>
    %365 = vector.shape_cast %364 : vector<1x128x128xbf16> to vector<128x128xbf16>
    %cst_282 = arith.constant dense<0.000000e+00> : vector<16x128xf32>
    %366 = tpu.matmul %363, %365, %cst_282 {dimension_numbers = #tpu.dot_dimension_numbers<[1], [0], [0], [1], [0, 0, 1, 1], [], []>} : vector<16x128xbf16>, vector<128x128xbf16>, vector<16x128xf32> -> vector<16x128xf32>
    %367 = arith.addf %358, %366 : vector<16x128xf32>
    %c2_i32_283 = arith.constant 2 : i32
    %368 = arith.addi %arg1, %c2_i32_283 : i32
    %c2_284 = arith.constant 2 : index
    %369 = arith.index_cast %arg0 : i32 to index
    %370 = arith.index_cast %368 : i32 to index
    %c3_285 = arith.constant 3 : index
    %c0_286 = arith.constant 0 : index
    %371 = vector.load %arg2[%c2_284, %369, %370, %c3_285, %c0_286] : memref<4x2x19x19x128xbf16, #tpu.memory_space<vmem>>, vector<1x1x1x16x128xbf16>
    %372 = vector.shape_cast %371 : vector<1x1x1x16x128xbf16> to vector<16x128xbf16>
    %c41 = arith.constant 41 : index
    %c0_287 = arith.constant 0 : index
    %c0_288 = arith.constant 0 : index
    %373 = vector.load %arg3[%c41, %c0_287, %c0_288] : memref<49x128x128xbf16, #tpu.memory_space<vmem>>, vector<1x128x128xbf16>
    %374 = vector.shape_cast %373 : vector<1x128x128xbf16> to vector<128x128xbf16>
    %cst_289 = arith.constant dense<0.000000e+00> : vector<16x128xf32>
    %375 = tpu.matmul %372, %374, %cst_289 {dimension_numbers = #tpu.dot_dimension_numbers<[1], [0], [0], [1], [0, 0, 1, 1], [], []>} : vector<16x128xbf16>, vector<128x128xbf16>, vector<16x128xf32> -> vector<16x128xf32>
    %376 = arith.addf %367, %375 : vector<16x128xf32>
    %c3_i32 = arith.constant 3 : i32
    %377 = arith.addi %arg1, %c3_i32 : i32
    %c0_290 = arith.constant 0 : index
    %378 = arith.index_cast %arg0 : i32 to index
    %379 = arith.index_cast %377 : i32 to index
    %c0_291 = arith.constant 0 : index
    %c0_292 = arith.constant 0 : index
    %380 = vector.load %arg2[%c0_290, %378, %379, %c0_291, %c0_292] : memref<4x2x19x19x128xbf16, #tpu.memory_space<vmem>>, vector<1x1x1x16x128xbf16>
    %381 = vector.shape_cast %380 : vector<1x1x1x16x128xbf16> to vector<16x128xbf16>
    %c42 = arith.constant 42 : index
    %c0_293 = arith.constant 0 : index
    %c0_294 = arith.constant 0 : index
    %382 = vector.load %arg3[%c42, %c0_293, %c0_294] : memref<49x128x128xbf16, #tpu.memory_space<vmem>>, vector<1x128x128xbf16>
    %383 = vector.shape_cast %382 : vector<1x128x128xbf16> to vector<128x128xbf16>
    %cst_295 = arith.constant dense<0.000000e+00> : vector<16x128xf32>
    %384 = tpu.matmul %381, %383, %cst_295 {dimension_numbers = #tpu.dot_dimension_numbers<[1], [0], [0], [1], [0, 0, 1, 1], [], []>} : vector<16x128xbf16>, vector<128x128xbf16>, vector<16x128xf32> -> vector<16x128xf32>
    %385 = arith.addf %376, %384 : vector<16x128xf32>
    %c3_i32_296 = arith.constant 3 : i32
    %386 = arith.addi %arg1, %c3_i32_296 : i32
    %c1_297 = arith.constant 1 : index
    %387 = arith.index_cast %arg0 : i32 to index
    %388 = arith.index_cast %386 : i32 to index
    %c0_298 = arith.constant 0 : index
    %c0_299 = arith.constant 0 : index
    %389 = vector.load %arg2[%c1_297, %387, %388, %c0_298, %c0_299] : memref<4x2x19x19x128xbf16, #tpu.memory_space<vmem>>, vector<1x1x1x16x128xbf16>
    %390 = vector.shape_cast %389 : vector<1x1x1x16x128xbf16> to vector<16x128xbf16>
    %c43 = arith.constant 43 : index
    %c0_300 = arith.constant 0 : index
    %c0_301 = arith.constant 0 : index
    %391 = vector.load %arg3[%c43, %c0_300, %c0_301] : memref<49x128x128xbf16, #tpu.memory_space<vmem>>, vector<1x128x128xbf16>
    %392 = vector.shape_cast %391 : vector<1x128x128xbf16> to vector<128x128xbf16>
    %cst_302 = arith.constant dense<0.000000e+00> : vector<16x128xf32>
    %393 = tpu.matmul %390, %392, %cst_302 {dimension_numbers = #tpu.dot_dimension_numbers<[1], [0], [0], [1], [0, 0, 1, 1], [], []>} : vector<16x128xbf16>, vector<128x128xbf16>, vector<16x128xf32> -> vector<16x128xf32>
    %394 = arith.addf %385, %393 : vector<16x128xf32>
    %c3_i32_303 = arith.constant 3 : i32
    %395 = arith.addi %arg1, %c3_i32_303 : i32
    %c0_304 = arith.constant 0 : index
    %396 = arith.index_cast %arg0 : i32 to index
    %397 = arith.index_cast %395 : i32 to index
    %c1_305 = arith.constant 1 : index
    %c0_306 = arith.constant 0 : index
    %398 = vector.load %arg2[%c0_304, %396, %397, %c1_305, %c0_306] : memref<4x2x19x19x128xbf16, #tpu.memory_space<vmem>>, vector<1x1x1x16x128xbf16>
    %399 = vector.shape_cast %398 : vector<1x1x1x16x128xbf16> to vector<16x128xbf16>
    %c44 = arith.constant 44 : index
    %c0_307 = arith.constant 0 : index
    %c0_308 = arith.constant 0 : index
    %400 = vector.load %arg3[%c44, %c0_307, %c0_308] : memref<49x128x128xbf16, #tpu.memory_space<vmem>>, vector<1x128x128xbf16>
    %401 = vector.shape_cast %400 : vector<1x128x128xbf16> to vector<128x128xbf16>
    %cst_309 = arith.constant dense<0.000000e+00> : vector<16x128xf32>
    %402 = tpu.matmul %399, %401, %cst_309 {dimension_numbers = #tpu.dot_dimension_numbers<[1], [0], [0], [1], [0, 0, 1, 1], [], []>} : vector<16x128xbf16>, vector<128x128xbf16>, vector<16x128xf32> -> vector<16x128xf32>
    %403 = arith.addf %394, %402 : vector<16x128xf32>
    %c3_i32_310 = arith.constant 3 : i32
    %404 = arith.addi %arg1, %c3_i32_310 : i32
    %c1_311 = arith.constant 1 : index
    %405 = arith.index_cast %arg0 : i32 to index
    %406 = arith.index_cast %404 : i32 to index
    %c1_312 = arith.constant 1 : index
    %c0_313 = arith.constant 0 : index
    %407 = vector.load %arg2[%c1_311, %405, %406, %c1_312, %c0_313] : memref<4x2x19x19x128xbf16, #tpu.memory_space<vmem>>, vector<1x1x1x16x128xbf16>
    %408 = vector.shape_cast %407 : vector<1x1x1x16x128xbf16> to vector<16x128xbf16>
    %c45 = arith.constant 45 : index
    %c0_314 = arith.constant 0 : index
    %c0_315 = arith.constant 0 : index
    %409 = vector.load %arg3[%c45, %c0_314, %c0_315] : memref<49x128x128xbf16, #tpu.memory_space<vmem>>, vector<1x128x128xbf16>
    %410 = vector.shape_cast %409 : vector<1x128x128xbf16> to vector<128x128xbf16>
    %cst_316 = arith.constant dense<0.000000e+00> : vector<16x128xf32>
    %411 = tpu.matmul %408, %410, %cst_316 {dimension_numbers = #tpu.dot_dimension_numbers<[1], [0], [0], [1], [0, 0, 1, 1], [], []>} : vector<16x128xbf16>, vector<128x128xbf16>, vector<16x128xf32> -> vector<16x128xf32>
    %412 = arith.addf %403, %411 : vector<16x128xf32>
    %c3_i32_317 = arith.constant 3 : i32
    %413 = arith.addi %arg1, %c3_i32_317 : i32
    %c0_318 = arith.constant 0 : index
    %414 = arith.index_cast %arg0 : i32 to index
    %415 = arith.index_cast %413 : i32 to index
    %c2_319 = arith.constant 2 : index
    %c0_320 = arith.constant 0 : index
    %416 = vector.load %arg2[%c0_318, %414, %415, %c2_319, %c0_320] : memref<4x2x19x19x128xbf16, #tpu.memory_space<vmem>>, vector<1x1x1x16x128xbf16>
    %417 = vector.shape_cast %416 : vector<1x1x1x16x128xbf16> to vector<16x128xbf16>
    %c46 = arith.constant 46 : index
    %c0_321 = arith.constant 0 : index
    %c0_322 = arith.constant 0 : index
    %418 = vector.load %arg3[%c46, %c0_321, %c0_322] : memref<49x128x128xbf16, #tpu.memory_space<vmem>>, vector<1x128x128xbf16>
    %419 = vector.shape_cast %418 : vector<1x128x128xbf16> to vector<128x128xbf16>
    %cst_323 = arith.constant dense<0.000000e+00> : vector<16x128xf32>
    %420 = tpu.matmul %417, %419, %cst_323 {dimension_numbers = #tpu.dot_dimension_numbers<[1], [0], [0], [1], [0, 0, 1, 1], [], []>} : vector<16x128xbf16>, vector<128x128xbf16>, vector<16x128xf32> -> vector<16x128xf32>
    %421 = arith.addf %412, %420 : vector<16x128xf32>
    %c3_i32_324 = arith.constant 3 : i32
    %422 = arith.addi %arg1, %c3_i32_324 : i32
    %c1_325 = arith.constant 1 : index
    %423 = arith.index_cast %arg0 : i32 to index
    %424 = arith.index_cast %422 : i32 to index
    %c2_326 = arith.constant 2 : index
    %c0_327 = arith.constant 0 : index
    %425 = vector.load %arg2[%c1_325, %423, %424, %c2_326, %c0_327] : memref<4x2x19x19x128xbf16, #tpu.memory_space<vmem>>, vector<1x1x1x16x128xbf16>
    %426 = vector.shape_cast %425 : vector<1x1x1x16x128xbf16> to vector<16x128xbf16>
    %c47 = arith.constant 47 : index
    %c0_328 = arith.constant 0 : index
    %c0_329 = arith.constant 0 : index
    %427 = vector.load %arg3[%c47, %c0_328, %c0_329] : memref<49x128x128xbf16, #tpu.memory_space<vmem>>, vector<1x128x128xbf16>
    %428 = vector.shape_cast %427 : vector<1x128x128xbf16> to vector<128x128xbf16>
    %cst_330 = arith.constant dense<0.000000e+00> : vector<16x128xf32>
    %429 = tpu.matmul %426, %428, %cst_330 {dimension_numbers = #tpu.dot_dimension_numbers<[1], [0], [0], [1], [0, 0, 1, 1], [], []>} : vector<16x128xbf16>, vector<128x128xbf16>, vector<16x128xf32> -> vector<16x128xf32>
    %430 = arith.addf %421, %429 : vector<16x128xf32>
    %c3_i32_331 = arith.constant 3 : i32
    %431 = arith.addi %arg1, %c3_i32_331 : i32
    %c0_332 = arith.constant 0 : index
    %432 = arith.index_cast %arg0 : i32 to index
    %433 = arith.index_cast %431 : i32 to index
    %c3_333 = arith.constant 3 : index
    %c0_334 = arith.constant 0 : index
    %434 = vector.load %arg2[%c0_332, %432, %433, %c3_333, %c0_334] : memref<4x2x19x19x128xbf16, #tpu.memory_space<vmem>>, vector<1x1x1x16x128xbf16>
    %435 = vector.shape_cast %434 : vector<1x1x1x16x128xbf16> to vector<16x128xbf16>
    %c48 = arith.constant 48 : index
    %c0_335 = arith.constant 0 : index
    %c0_336 = arith.constant 0 : index
    %436 = vector.load %arg3[%c48, %c0_335, %c0_336] : memref<49x128x128xbf16, #tpu.memory_space<vmem>>, vector<1x128x128xbf16>
    %437 = vector.shape_cast %436 : vector<1x128x128xbf16> to vector<128x128xbf16>
    %cst_337 = arith.constant dense<0.000000e+00> : vector<16x128xf32>
    %438 = tpu.matmul %435, %437, %cst_337 {dimension_numbers = #tpu.dot_dimension_numbers<[1], [0], [0], [1], [0, 0, 1, 1], [], []>} : vector<16x128xbf16>, vector<128x128xbf16>, vector<16x128xf32> -> vector<16x128xf32>
    %439 = arith.addf %430, %438 : vector<16x128xf32>
    %c0_338 = arith.constant 0 : index
    %c0_339 = arith.constant 0 : index
    %440 = vector.load %arg4[%c0_338, %c0_339] : memref<1x128xf32, #tpu.memory_space<vmem>>, vector<1x128xf32>
    %441 = vector.broadcast %440 : vector<1x128xf32> to vector<16x128xf32>
    %442 = arith.addf %439, %441 : vector<16x128xf32>
    %cst_340 = arith.constant 0.000000e+00 : f32
    %443 = vector.broadcast %cst_340 : f32 to vector<16x128xf32>
    %444 = arith.maximumf %442, %443 : vector<16x128xf32>
    %c0_341 = arith.constant 0 : index
    %c0_342 = arith.constant 0 : index
    %c0_343 = arith.constant 0 : index
    %c0_344 = arith.constant 0 : index
    %445 = vector.load %arg5[%c0_341, %c0_342, %c0_343, %c0_344] : memref<1x1x16x128xf32, #tpu.memory_space<vmem>>, vector<1x1x16x128xf32>
    %446 = vector.shape_cast %445 : vector<1x1x16x128xf32> to vector<16x128xf32>
    %447 = vector.shape_cast %444 : vector<16x128xf32> to vector<1x1x16x128xf32>
    tpu.vector_store %arg5[%c0_341, %c0_342, %c0_343, %c0_344], %447 {strides = array<i32>} : memref<1x1x16x128xf32, #tpu.memory_space<vmem>>, vector<1x1x16x128xf32>,
    return
  }
  func.func @transform_0(%arg0: i32, %arg1: i32) -> (i32, i32, i32, i32, i32) {
    %c0_i32 = arith.constant 0 : i32
    %c0_i32_0 = arith.constant 0 : i32
    %c0_i32_1 = arith.constant 0 : i32
    %c0_i32_2 = arith.constant 0 : i32
    %c0_i32_3 = arith.constant 0 : i32
    %c0_i32_4 = arith.constant 0 : i32
    return %c0_i32, %c0_i32_0, %c0_i32_1, %c0_i32_2, %c0_i32_3 : i32, i32, i32, i32, i32
  }
  func.func @transform_1(%arg0: i32, %arg1: i32) -> (i32, i32, i32) {
    %c0_i32 = arith.constant 0 : i32
    %c0_i32_0 = arith.constant 0 : i32
    %c0_i32_1 = arith.constant 0 : i32
    %c0_i32_2 = arith.constant 0 : i32
    return %c0_i32, %c0_i32_0, %c0_i32_1 : i32, i32, i32
  }
  func.func @transform_2(%arg0: i32, %arg1: i32) -> (i32, i32) {
    %c0_i32 = arith.constant 0 : i32
    %c0_i32_0 = arith.constant 0 : i32
    %c0_i32_1 = arith.constant 0 : i32
    return %c0_i32, %c0_i32_0 : i32, i32
  }
  func.func @transform_3(%arg0: i32, %arg1: i32) -> (i32, i32, i32, i32) {
    %c0_i32 = arith.constant 0 : i32
    %c0_i32_0 = arith.constant 0 : i32
    %c0_i32_1 = arith.constant 0 : i32
    return %arg0, %arg1, %c0_i32, %c0_i32_0 : i32, i32, i32, i32
  }
}

</mosaic_0001>

<bundles_post_ra>
// kernel: tpu_custom_call.1
= control target key start
LH: loop header
LB: loop body
LE: loop exit
PB: predicated region body
PF: predicated region fallthrough
CT: control target
= control target key end

     0   :  { %8 = vsyncpa [#allocation3], 0  ;;  %s11952_s0 = inlined_call_operand.vmem [shape: bf16[4,2,19,19,128], index: 0, kind: input, shape index: {}]   ;;  %s11953_s1 = inlined_call_operand.vmem [shape: bf16[49,128,128], index: 1, kind: input, shape index: {}]   ;;  %s11954_s2 = inlined_call_operand.vmem [shape: f32[1,128], index: 2, kind: input, shape index: {}]   ;;  %s11955_s3 = inlined_call_operand.hbm [shape: f32[2,16,16,128], index: 3, kind: output, shape index: {}]  }
   0x1   :  { %10 = vsyncpa [#allocation3 + $0x1], 0  ;;  %s9799_s12 = smov 0   ;;  %s9801_s13 = smov 0  }
   0x2   :  { %s9803_s14 = smov 0   ;;  %s9805_s15 = smov 0  }
   0x3   :  { %s9807_s16 = smov 0   ;;  %s9809_s17 = smov 0  }
   0x4   :  { %s9811_s18 = smov 0   ;;  %s9813_s19 = smov 0  }
   0x5 LB: > { %s6394_s20 = sadd.s32 4294967295, %s9772_s19   ;;  %s6395_s21 = sadd.s32 4294967294, %s9772_s19   ;;  %s9772_s19 = sphi %s9813_s19, %s16_s19   ;;  %s9768_s18 = sphi %s9811_s18, %s11964_s18   ;;  %s9764_s17 = sphi %s9809_s17, %s11963_s17   ;;  %s9760_s16 = sphi %s9807_s16, %s11962_s16   ;;  %s9756_s15 = sphi %s9805_s15, %s11961_s15   ;;  %s9752_s14 = sphi %s9803_s14, %s11960_s14   ;;  %s9748_s13 = sphi %s9801_s13, %s11959_s13   ;;  %s9744_s12 = sphi %s9799_s12, %s11958_s12  }
   0x6   : > { %s25_s22 = sadd.s32 1, %s9764_s17  ;;  %s28_s23 = sadd.s32 1, %s9768_s18 }
   0x7   : > { %p26_p0 = scmp.ge.s32.totalorder %s25_s22, 16  ;;  %p110_p1 = scmp.ne.s32.totalorder %s9752_s14, %s9748_s13 }
   0x8   : > { %p111_p2 = scmp.eq.s32.totalorder %s6394_s20, 31  ;;  %p116_p5 = scmp.ne.s32.totalorder %s9748_s13, %s9744_s12 }
   0x9   : > { %s11966_s22 = smov (%p26_p0, %s25_s22), 0  ;;  %s11968_s23 = smov (!%p26_p0, %s28_s23), %s9768_s18 }
   0xa   : > { %s96_s24 = ssub.s32 %s9764_s17, %s11966_s22  ;;  %p9850_p3 = por %p111_p2, %p110_p1 }
   0xb   : > { %p30_p4 = scmp.ge.s32.totalorder %s11968_s23, 2  ;;  %p117_p6 = scmp.eq.s32.totalorder %s6395_s21, 31 }
   0xc   : > { %p6397_p7 = scmp.ge.s32.totalorder %s9772_s19, 1  ;;  %p144_p9 = scmp.lt.s32.totalorder %s9772_s19, 33 }
   0xd   : > { %s11970_s23 = smov (%p30_p4, %s11968_s23), 0  ;;  %p9859_p8 = por %p117_p6, %p116_p5 }
   0xe   : > { %s95_s27 = ssub.s32 %s9768_s18, %s11970_s23  ;;  %s100_s28 = sadd.s32 1, %s9752_s14 }
   0xf   : > { %s97_s29 = sor.u32 %s96_s24, %s95_s27  ;;  %p145_p10 = pnand %p6397_p7, %p144_p9 }
  0x10   : > { %p98_p11 = scmp.eq.s32.totalorder %s97_s29, 0  ;;  %v9223_v0 = vld [vmem:[%s11953_s1 + $0x40] sm:$0xff] (!%p145_p10)   ;;  %v9774_v1 = vmov (!%p145_p10), 0.0   ;;  %v9225_v3 = vld [vmem:[%s11953_s1 + $0x48] sm:$0xff] (!%p145_p10)   ;;  %vm9775_vm0 = vmmov (!%p145_p10), 0   ;;  %s164_s20 = smul.u32 (!%p145_p10), 3, %s9756_s15 }
  0x11   : > { %148 = sbr.rel (%p145_p10) target bundleno = 1053 (0x41d), region = 32  ;;  %8168 = vmatprep.subr.bf16.mxu0 (!%p145_p10), %v9774_v1  ;;  %8188 = vmatprep.subr.bf16.mxu1 (!%p145_p10), %v9774_v1  ;;  %v9224_v2 = vld [vmem:[%s11953_s1] sm:$0xff] (!%p145_p10)   ;;  %v9226_v4 = vld [vmem:[%s11953_s1 + $0x8] sm:$0xff] (!%p145_p10)   ;;  %v9227_v5 = vld [vmem:[%s11953_s1 + $0x50] sm:$0xff] (!%p145_p10)   ;;  %vm427_vm1 = vsmask.f32 (!%p145_p10), 7424 }
  0x12   : > { %s9868_s30 = scalar_select %p98_p11, %s9752_s14, %s100_s28  }
  0x13   : > { %8169 = vmatpush3.bf16.msra.mxu0 (!%p145_p10), %v9223_v0  ;;  %8184 = vmatprep.mubr.msk.bf16.mxu0 (!%p145_p10), %vm9775_vm0, %v9774_v1  ;;  %s165_s21 = smul.u32 (!%p145_p10), 57, %s9760_s16  ;;  %v9228_v6 = vld [vmem:[%s11953_s1 + $0x10] sm:$0xff] (!%p145_p10)   ;;  %v9229_v7 = vld [vmem:[%s11953_s1 + $0x58] sm:$0xff] (!%p145_p10)   ;;  %v9231_v9 = vld [vmem:[%s11953_s1 + $0x60] sm:$0xff] (!%p145_p10)   ;;  %vm685_vm2 = vcmask (!%p145_p10), 1046528   ;;  %s7722_s24 = sshll.u32 (!%p145_p10), %s9756_s15, 1 }
  0x14   : > { %8189 = vmatpush3.bf16.msra.mxu1 (!%p145_p10), %v9224_v2  ;;  %8170 = vmatprep.subr.bf16.mxu0 (!%p145_p10), %v9774_v1  ;;  %v9230_v8 = vld [vmem:[%s11953_s1 + $0x18] sm:$0xff] (!%p145_p10)   ;;  %v9232_v10 = vld [vmem:[%s11953_s1 + $0x20] sm:$0xff] (!%p145_p10)   ;;  %v9233_v11 = vld [vmem:[%s11953_s1 + $0x68] sm:$0xff] (!%p145_p10)   ;;  %vm918_vm3 = vsmask.f32 (!%p145_p10), 6400  ;;  %s7723_s27 = sshll.u32 (!%p145_p10), %s9760_s16, 5 }
  0x15   : > { %8190 = vmatprep.subr.bf16.mxu1 (!%p145_p10), %v9774_v1  ;;  %8204 = vmatprep.mubr.msk.bf16.mxu1 (!%p145_p10), %vm9775_vm0, %v9774_v1  ;;  %s166_s4 = sadd.s32 (!%p145_p10), %s165_s21, %s164_s20  ;;  %v9234_v12 = vld [vmem:[%s11953_s1 + $0x28] sm:$0xff] (!%p145_p10)   ;;  %v9235_v13 = vld [vmem:[%s11953_s1 + $0x70] sm:$0xff] (!%p145_p10)   ;;  %v9237_v15 = vld [vmem:[%s11953_s1 + $0x78] sm:$0xff] (!%p145_p10)   ;;  %s160_s20 = sand.u32 (!%p145_p10), 1, %s9748_s13  }
  0x16   : > { %s6399_s9 = sshll.u32 (!%p145_p10), %s166_s4, 2  ;;  %v9236_v14 = vld [vmem:[%s11953_s1 + $0x30] sm:$0xff] (!%p145_p10)   ;;  %v9238_v16 = vld [vmem:[%s11953_s1 + $0x38] sm:$0xff] (!%p145_p10)   ;;  %v9241_v19 = vld [vmem:[%s11953_s1 + $0x80] sm:$0xff] (!%p145_p10)   ;;  %s6398_s21 = sshll.u32 (!%p145_p10), %s160_s20, 4 }
  0x17   : > { %8171 = vmatpush3.bf16.msra.mxu0 (!%p145_p10), %v9225_v3  ;;  %s9918_s28 = scalar_lea.vmem (!%p145_p10), %s11952_s0, %s6399_s9  ;;  %v9242_v20 = vld [vmem:[%s11953_s1 + $0xc0] sm:$0xff] (!%p145_p10)   ;;  %v9243_v21 = vld [vmem:[%s11953_s1 + $0x88] sm:$0xff] (!%p145_p10)   ;;  %v9245_v23 = vld [vmem:[%s11953_s1 + $0x90] sm:$0xff] (!%p145_p10)   ;;  %s6244_s5 = sadd.s32 (!%p145_p10), %s7723_s27, %s7722_s24 }
  0x18   : > { %8191 = vmatpush3.bf16.msra.mxu1 %v9226_v4  ;;  %8172 = vmatprep.subr.bf16.mxu0 %v9774_v1  ;;  %v9239_v17 = vld [vmem:[%s9918_s28 + $0x1c8] sm:$0xff]   ;;  %v9240_v18 = vld [vmem:[%s9918_s28] sm:$0xff]   ;;  %v9246_v24 = vld [vmem:[%s11953_s1 + $0xd0] sm:$0xff]   ;;  %s162_s6 = scalar_lea.vmem [#allocation2], %s6398_s21  ;;  %s7724_s8 = sshll.u32 %s6244_s5, 7 }
  0x19   : > { %8192 = vmatprep.subr.bf16.mxu1 %v9774_v1  ;;  %v9244_v22 = vld [vmem:[%s11953_s1 + $0xc8] sm:$0xff]   ;;  %v9247_v25 = vld [vmem:[%s11953_s1 + $0x98] sm:$0xff]   ;;  %v399_v27 = vld [vmem:[%s9918_s28] sm:$0xf]  ;;  %s6247_s7 = sshll.u32 %s162_s6, 4  ;;  %s11898_s9 = scalar_lea.hbm %s11955_s3, %s7724_s8  ;;  %s11893_s7 = int_to_ptr.vmem [resolvable:$true] %s6247_s7 }
  0x1a   : > { %v9248_v26 = vld [vmem:[%s11953_s1 + $0xd8] sm:$0xff]   ;;  %v9983_v28 = vld [vmem:[%s9918_s28 + $0x4] sm:$0xf]  ;;  %v6463_v29 = vld [vmem:[%s9918_s28 + $0x1c8] sm:$0xf]  ;;  %s11900_s10 = scalar_lea.sflag [#allocation3], %s160_s20 }
  0x1b   : > { %8173 = vmatpush3.bf16.msra.mxu0 %v9227_v5  ;;  %v9989_v30 = vld [vmem:[%s9918_s28 + $0x1cc] sm:$0xf]  ;;  %v9249_v31 = vld [vmem:[%s11953_s1 + $0xa0] sm:$0xff]   ;;  %v6453_v32 = vcombine.low %v399_v27, %v9983_v28  ;;  %v10002_v35 = vld [vmem:[%s9918_s28 + $0x8] ss:$0 sps:$4 sm:$0x11]  }
  0x1c   : > { %8193 = vmatpush3.bf16.msra.mxu1 %v9228_v6  ;;  %8174 = vmatprep.subr.bf16.mxu0 %v9774_v1  ;;  %v9250_v33 = vld [vmem:[%s11953_s1 + $0xe0] sm:$0xff]   ;;  %v6482_v34 = vcombine.low %v6463_v29, %v9989_v30  ;;  %v10005_v36 = vld [vmem:[%s9918_s28 + $0x1d0] ss:$0 sps:$4 sm:$0x11]   ;;  %v9251_v37 = vld [vmem:[%s11953_s1 + $0xa8] sm:$0xff]   ;;  %v436_v44 = vshll.u32 %v10002_v35, 16 }
  0x1d   : > { %8194 = vmatprep.subr.bf16.mxu1 %v9774_v1  ;;  %v431_v38 = vshll.u32 %v6453_v32, 16  ;;  %v9252_v39 = vld [vmem:[%s11953_s1 + $0xe8] sm:$0xff]   ;;  %v9253_v41 = vld [vmem:[%s11953_s1 + $0xb0] sm:$0xff]   ;;  %v429_v42 = vshrl.u32 %v6453_v32, 16  ;;  %v568_v48 = vshll.u32 %v10005_v36, 16  ;;  %v9255_v49 = vld [vmem:[%s11953_s1 + $0xb8] sm:$0xff]  }
  0x1e   : > { %v563_v40 = vshll.u32 %v6482_v34, 16  ;;  %v9254_v45 = vld [vmem:[%s11953_s1 + $0xf0] sm:$0xff]   ;;  %v561_v46 = vshrl.u32 %v6482_v34, 16  ;;  %v438_v51 = vrot.slane %v436_v44, 1  ;;  %v9256_v52 = vld [vmem:[%s11953_s1 + $0xf8] sm:$0xff]   ;;  %v9259_v56 = vld [vmem:[%s11953_s1 + $0x100] sm:$0xff]  }
  0x1f   : > { %8175 = vmatpush3.bf16.msra.mxu0 %v9229_v7  ;;  %v433_v43 = vrot.slane %v431_v38, 1  ;;  %v570_v54 = vrot.slane %v568_v48, 1  ;;  %v9262_v58 = vld [vmem:[%s11953_s1 + $0x140] sm:$0xff]   ;;  %v9263_v59 = vld [vmem:[%s11953_s1 + $0x108] sm:$0xff]   ;;  %v9265_v61 = vld [vmem:[%s11953_s1 + $0x110] sm:$0xff]   ;;  %s9776_s11 = smov [#allocation2]  }
  0x20   : > { %8195 = vmatpush3.bf16.msra.mxu1 %v9230_v8  ;;  %8176 = vmatprep.subr.bf16.mxu0 %v9774_v1  ;;  %v565_v47 = vrot.slane %v563_v40, 1  ;;  %v9264_v60 = vld [vmem:[%s11953_s1 + $0x148] sm:$0xff]   ;;  %v9266_v62 = vld [vmem:[%s11953_s1 + $0x150] sm:$0xff]   ;;  %v9267_v63 = vld [vmem:[%s11953_s1 + $0x118] sm:$0xff]   ;;  %s9682_s21 = sshll.u32 %s9776_s11, 4  ;;  %s9683_s21 = int_to_ptr.vmem [resolvable:$false] %s9682_s21 }
  0x21   : > { %8196 = vmatprep.subr.bf16.mxu1 %v9774_v1  ;;  %v434_v50 = vor.u32 %v433_v43, %v429_v42  ;;  %v9268_v0 = vld [vmem:[%s11953_s1 + $0x158] sm:$0xff]   ;;  %v9269_v2 = vld [vmem:[%s11953_s1 + $0x120] sm:$0xff]   ;;  %v9271_v4 = vld [vmem:[%s11953_s1 + $0x128] sm:$0xff]   ;;  %s9684_s24 = scalar_lea.vmem %s9683_s21, 512  ;;  %p9685_p1 = scmp.lt.s32.totalorder %s11893_s7, %s9683_s21 }
  0x22   : > { %v566_v53 = vor.u32 %v565_v47, %v561_v46  ;;  %v9270_v3 = vld [vmem:[%s11953_s1 + $0x160] sm:$0xff]   ;;  %v9272_v5 = vld [vmem:[%s11953_s1 + $0x168] sm:$0xff]   ;;  %v9273_v8 = vld [vmem:[%s11953_s1 + $0x130] sm:$0xff]  }
  0x23   : > { %8177 = vmatpush3.bf16.msra.mxu0 %v9231_v9  ;;  %v439_v55 = vsel %vm427_vm1, %v434_v50, %v438_v51  ;;  %v664_v6 = vld [vmem:[%s9918_s28] sm:$0xe]  ;;  %v6517_v7 = vld [vmem:[%s9918_s28 + $0x1c8] sm:$0xe]  ;;  %v9286_v27 = vld [vmem:[%s11953_s1 + $0x1d8] sm:$0xff]  }
  0x24   : > { %8197 = vmatpush3.bf16.msra.mxu1 %v9232_v10  ;;  %8178 = vmatprep.subr.bf16.mxu0 %v9774_v1  ;;  %v571_v57 = vsel %vm427_vm1, %v566_v53, %v570_v54  ;;  %v10093_v9 = vcombine.low %v664_v6, %v9983_v28  ;;  %v9274_v10 = vld [vmem:[%s11953_s1 + $0x170] sm:$0xff]   ;;  %v9295_v28 = vld [vmem:[%s9918_s28 + $0x8] ss:$0 sps:$4 sm:$0x33]   ;;  %v9287_v29 = vld [vmem:[%s11953_s1 + $0x1a0] sm:$0xff]  }
  0x25   : > { %8198 = vmatprep.subr.bf16.mxu1 %v9774_v1  ;;  %v9289_v32 = vld [vmem:[%s11953_s1 + $0x1a8] sm:$0xff]   ;;  %v928_v34 = vshrl.u32 %v9295_v28, 16  ;;  %v9291_v38 = vld [vmem:[%s11953_s1 + $0x1b0] sm:$0xff]   ;;  %v9293_v43 = vld [vmem:[%s11953_s1 + $0x1b8] sm:$0xff]  }
  0x26   : > { %v9292_v42 = vld [vmem:[%s11953_s1 + $0x1f0] sm:$0xff]   ;;  %v9294_v44 = vld [vmem:[%s11953_s1 + $0x1f8] sm:$0xff]   ;;  %v9296_v48 = vld [vmem:[%s11953_s1 + $0x200] sm:$0xff]  }
  0x27   : > { %8179 = vmatpush3.bf16.msra.mxu0 %v9233_v11  ;;  %v6534_v11 = vcombine.low %v6517_v7, %v9989_v30  ;;  %v9288_v30 = vld [vmem:[%s11953_s1 + $0x1e0] sm:$0xff]   ;;  %v930_v40 = vrot.slane %v928_v34, 1  ;;  %v9299_v51 = vld [vmem:[%s11953_s1 + $0x208] sm:$0xff]   ;;  %v9301_v53 = vld [vmem:[%s11953_s1 + $0x210] sm:$0xff]  }
  0x28   : > { %8199 = vmatpush3.bf16.msra.mxu1 %v9234_v12  ;;  %8180 = vmatprep.subr.bf16.mxu0 %v9774_v1  ;;  %v687_v12 = vrot.slane %v10002_v35, 1  ;;  %v931_v35 = vshll.u32 %v9295_v28, 16  ;;  %v9298_v50 = vld [vmem:[%s11953_s1 + $0x240] sm:$0xff]   ;;  %v9302_v54 = vld [vmem:[%s11953_s1 + $0x250] sm:$0xff]  }
  0x29   : > { %8200 = vmatprep.subr.bf16.mxu1 %v9774_v1 }
  0x2b   : > { %8181 = vmatpush3.bf16.msra.mxu0 %v9235_v13  ;;  %v9275_v13 = vld [vmem:[%s11953_s1 + $0x138] sm:$0xff]  }
  0x2c   : > { %8201 = vmatpush3.bf16.msra.mxu1 %v9236_v14  ;;  %8182 = vmatprep.subr.bf16.mxu0 %v9774_v1  ;;  %v686_v14 = vrot.slane %v10093_v9, 1 }
  0x2d   : > { %8202 = vmatprep.subr.bf16.mxu1 %v9774_v1 }
  0x2f   : > { %8183 = vmatpush3.bf16.msra.mxu0 %v9237_v15  ;;  %v9276_v15 = vld [vmem:[%s11953_s1 + $0x178] sm:$0xff]  }
  0x30   : > { %8203 = vmatpush3.bf16.msra.mxu1 %v9238_v16  ;;  %8208 = vmatprep.subr.bf16.mxu0 %v9774_v1  ;;  %v802_v16 = vrot.slane %v6534_v11, 1 }
  0x31   : > { %8228 = vmatprep.subr.bf16.mxu1 %v9774_v1 }
  0x32   : > { %8185 = vmatmul.mubr.bf16.vlgmr.msra.gmra.mrb[0].mxu0 %v9239_v17  ;;  %v803_v17 = vrot.slane %v10005_v36, 1  ;;  %v9290_v36 = vld [vmem:[%s11953_s1 + $0x1e8] sm:$0xff]  }
  0x33   : > { %8205 = vmatmul.mubr.bf16.vlgmr.msra.gmra.mrb[0].mxu1 %v9240_v18  ;;  %8209 = vmatpush3.bf16.msra.mxu0 %v9241_v19  ;;  %v688_v18 = vsel %vm685_vm2, %v686_v14, %v687_v12  ;;  %v9278_v19 = vld [vmem:[%s11953_s1 + $0x180] sm:$0xff]   ;;  %v9313_v12 = vld [vmem:[%s9918_s28 + $0x558] sm:$0xff]  }
  0x34   : > { %8229 = vmatpush3.bf16.msra.mxu1 %v9242_v20  ;;  %8210 = vmatprep.subr.bf16.mxu0 %v9774_v1  ;;  %v804_v20 = vsel %vm685_vm2, %v802_v16, %v803_v17  ;;  %v9318_v16 = vld [vmem:[%s11953_s1 + $0x288] sm:$0xff]  }
  0x35   : > { %8230 = vmatprep.subr.bf16.mxu1 %v9774_v1  ;;  %8224 = vmatprep.mubr.msk.bf16.mxu0 %vm9775_vm0, %v9774_v1  ;;  %v9319_v17 = vld [vmem:[%s11953_s1 + $0x2c8] sm:$0xff]  }
  0x36   : > { %8244 = vmatprep.mubr.msk.bf16.mxu1 %vm9775_vm0, %v9774_v1 }
  0x37   : > { %8211 = vmatpush3.bf16.msra.mxu0 %v9243_v21  ;;  %v9280_v21 = vld [vmem:[%s11953_s1 + $0x1c0] sm:$0xff]  }
  0x38   : > { %8231 = vmatpush3.bf16.msra.mxu1 %v9244_v22  ;;  %8212 = vmatprep.subr.bf16.mxu0 %v9774_v1  ;;  %v9281_v22 = vld [vmem:[%s11953_s1 + $0x188] sm:$0xff]  }
  0x39   : > { %8232 = vmatprep.subr.bf16.mxu1 %v9774_v1 }
  0x3b   : > { %8213 = vmatpush3.bf16.msra.mxu0 %v9245_v23  ;;  %v9282_v23 = vld [vmem:[%s11953_s1 + $0x1c8] sm:$0xff]  }
  0x3c   : > { %8233 = vmatpush3.bf16.msra.mxu1 %v9246_v24  ;;  %8214 = vmatprep.subr.bf16.mxu0 %v9774_v1  ;;  %v9283_v24 = vld [vmem:[%s11953_s1 + $0x190] sm:$0xff]  }
  0x3d   : > { %8234 = vmatprep.subr.bf16.mxu1 %v9774_v1 }
  0x3f   : > { %8215 = vmatpush3.bf16.msra.mxu0 %v9247_v25  ;;  %v9284_v25 = vld [vmem:[%s11953_s1 + $0x1d0] sm:$0xff]  }
  0x40   : > { %8235 = vmatpush3.bf16.msra.mxu1 %v9248_v26  ;;  %8216 = vmatprep.subr.bf16.mxu0 %v9774_v1  ;;  %v9285_v26 = vld [vmem:[%s11953_s1 + $0x198] sm:$0xff]  }
  0x41   : > { %8236 = vmatprep.subr.bf16.mxu1 %v9774_v1 }
  0x43   : > { %8217 = vmatpush3.bf16.msra.mxu0 %v9249_v31  ;;  %v920_v31 = vshrl.u32 %v10093_v9, 16 }
  0x44   : > { %8237 = vmatpush3.bf16.msra.mxu1 %v9250_v33  ;;  %8218 = vmatprep.subr.bf16.mxu0 %v9774_v1  ;;  %v923_v33 = vshll.u32 %v10093_v9, 16  ;;  %v9312_v9 = vld [vmem:[%s11953_s1 + $0x278] sm:$0xff]  }
  0x45   : > { %8238 = vmatprep.subr.bf16.mxu1 %v9774_v1 }
  0x47   : > { %8219 = vmatpush3.bf16.msra.mxu0 %v9251_v37  ;;  %v922_v37 = vrot.slane %v920_v31, 1  ;;  %v9327_v31 = vld [vmem:[%s11953_s1 + $0x2e8] sm:$0xff]  }
  0x48   : > { %8239 = vmatpush3.bf16.msra.mxu1 %v9252_v39  ;;  %8220 = vmatprep.subr.bf16.mxu0 %v9774_v1  ;;  %v925_v39 = vrot.slane %v923_v33, 2  ;;  %v9328_v33 = vld [vmem:[%s11953_s1 + $0x2b0] sm:$0xff]  }
  0x49   : > { %8240 = vmatprep.subr.bf16.mxu1 %v9774_v1 }
  0x4b   : > { %8221 = vmatpush3.bf16.msra.mxu0 %v9253_v41  ;;  %v933_v41 = vrot.slane %v931_v35, 2 }
  0x4c   : > { %8241 = vmatpush3.bf16.msra.mxu1 %v9254_v45  ;;  %8222 = vmatprep.subr.bf16.mxu0 %v9774_v1  ;;  %v926_v45 = vor.u32 %v925_v39, %v922_v37  ;;  %v9330_v39 = vld [vmem:[%s11953_s1 + $0x2b8] sm:$0xff]  }
  0x4d   : > { %8242 = vmatprep.subr.bf16.mxu1 %v9774_v1  ;;  %v934_v46 = vor.u32 %v933_v41, %v930_v40 }
  0x4f   : > { %8223 = vmatpush3.bf16.msra.mxu0 %v9255_v49  ;;  %v935_v47 = vsel %vm918_vm3, %v926_v45, %v934_v46  ;;  %v9297_v49 = vld [vmem:[%s9918_s28 + $0x390] sm:$0xff]   ;;  %v9334_v45 = vld [vmem:[%s11953_s1 + $0x300] sm:$0xff]  }
  0x50   : > { %8243 = vmatpush3.bf16.msra.mxu1 %v9256_v52  ;;  %8248 = vmatprep.subr.bf16.mxu0 %v9774_v1  ;;  %v9300_v52 = vld [vmem:[%s11953_s1 + $0x248] sm:$0xff]  }
  0x51   : > { %8268 = vmatprep.subr.bf16.mxu1 %v9774_v1 }
  0x52   : > { %8225 = vmatmul.mubr.bf16.vlgmr.msra.gmra.mrb[4].mxu0 %v439_v55  ;;  %v9303_v55 = vld [vmem:[%s11953_s1 + $0x218] sm:$0xff]  }
  0x53   : > { %8249 = vmatpush3.bf16.msra.mxu0 %v9259_v56  ;;  %8245 = vmatmul.mubr.bf16.vlgmr.msra.gmra.mrb[4].mxu1 %v571_v57  ;;  %v9304_v56 = vld [vmem:[%s11953_s1 + $0x258] sm:$0xff]   ;;  %v6624_v57 = vld [vmem:[%s9918_s28 + $0x390] sm:$0xf] }
  0x54   : > { %8269 = vmatpush3.bf16.msra.mxu1 %v9262_v58  ;;  %8250 = vmatprep.subr.bf16.mxu0 %v9774_v1  ;;  %v10225_v58 = vld [vmem:[%s9918_s28 + $0x394] sm:$0xf] }
  0x55   : > { %8270 = vmatprep.subr.bf16.mxu1 %v9774_v1  ;;  %8264 = vmatprep.mubr.msk.bf16.mxu0 %vm9775_vm0, %v9774_v1 }
  0x56   : > { %8284 = vmatprep.mubr.msk.bf16.mxu1 %vm9775_vm0, %v9774_v1 }
  0x57   : > { %8251 = vmatpush3.bf16.msra.mxu0 %v9263_v59  ;;  %v9305_v59 = vld [vmem:[%s11953_s1 + $0x220] sm:$0xff]  }
  0x58   : > { %8271 = vmatpush3.bf16.msra.mxu1 %v9264_v60  ;;  %8252 = vmatprep.subr.bf16.mxu0 %v9774_v1  ;;  %v9306_v60 = vld [vmem:[%s11953_s1 + $0x260] sm:$0xff]  }
  0x59   : > { %8272 = vmatprep.subr.bf16.mxu1 %v9774_v1 }
  0x5b   : > { %8253 = vmatpush3.bf16.msra.mxu0 %v9265_v61  ;;  %v6643_v61 = vcombine.low %v6624_v57, %v10225_v58 }
  0x5c   : > { %8273 = vmatpush3.bf16.msra.mxu1 %v9266_v62  ;;  %8254 = vmatprep.subr.bf16.mxu0 %v9774_v1  ;;  %v10237_v62 = vld [vmem:[%s9918_s28 + $0x398] ss:$0 sps:$4 sm:$0x11]  }
  0x5d   : > { %8274 = vmatprep.subr.bf16.mxu1 %v9774_v1  ;;  %v1302_v7 = vshll.u32 %v10237_v62, 16 }
  0x5f   : > { %8255 = vmatpush3.bf16.msra.mxu0 %v9267_v63  ;;  %v9307_v63 = vld [vmem:[%s11953_s1 + $0x228] sm:$0xff]   ;;  %v1304_v11 = vrot.slane %v1302_v7, 1 }
  0x60   : > { %8275 = vmatpush3.bf16.msra.mxu1 %v9268_v0  ;;  %8256 = vmatprep.subr.bf16.mxu0 %v9774_v1  ;;  %v9308_v0 = vld [vmem:[%s11953_s1 + $0x268] sm:$0xff]  }
  0x61   : > { %8276 = vmatprep.subr.bf16.mxu1 %v9774_v1 }
  0x63   : > { %8257 = vmatpush3.bf16.msra.mxu0 %v9269_v2  ;;  %v1297_v2 = vshll.u32 %v6643_v61, 16 }
  0x64   : > { %8277 = vmatpush3.bf16.msra.mxu1 %v9270_v3  ;;  %8258 = vmatprep.subr.bf16.mxu0 %v9774_v1  ;;  %v9309_v3 = vld [vmem:[%s11953_s1 + $0x230] sm:$0xff]  }
  0x65   : > { %8278 = vmatprep.subr.bf16.mxu1 %v9774_v1  ;;  %v1299_v6 = vrot.slane %v1297_v2, 1  ;;  %v9347_v2 = vld [vmem:[%s11953_s1 + $0x330] sm:$0xff]  }
  0x67   : > { %8259 = vmatpush3.bf16.msra.mxu0 %v9271_v4  ;;  %v9310_v4 = vld [vmem:[%s11953_s1 + $0x270] sm:$0xff]  }
  0x68   : > { %8279 = vmatpush3.bf16.msra.mxu1 %v9272_v5  ;;  %8260 = vmatprep.subr.bf16.mxu0 %v9774_v1  ;;  %v1295_v5 = vshrl.u32 %v6643_v61, 16  ;;  %v9346_v61 = vld [vmem:[%s11953_s1 + $0x368] sm:$0xff]  }
  0x69   : > { %8280 = vmatprep.subr.bf16.mxu1 %v9774_v1 }
  0x6b   : > { %8261 = vmatpush3.bf16.msra.mxu0 %v9273_v8  ;;  %v9311_v8 = vld [vmem:[%s11953_s1 + $0x238] sm:$0xff]  }
  0x6c   : > { %8281 = vmatpush3.bf16.msra.mxu1 %v9274_v10  ;;  %8262 = vmatprep.subr.bf16.mxu0 %v9774_v1  ;;  %v1300_v10 = vor.u32 %v1299_v6, %v1295_v5 }
  0x6d   : > { %8282 = vmatprep.subr.bf16.mxu1 %v9774_v1 }
  0x6e   : > { %v1305_v14 = vsel %vm427_vm1, %v1300_v10, %v1304_v11  ;;  %v9350_v11 = vld [vmem:[%s11953_s1 + $0x378] sm:$0xff]  }
  0x6f   : > { %8263 = vmatpush3.bf16.msra.mxu0 %v9275_v13  ;;  %v9314_v13 = vld [vmem:[%s11953_s1 + $0x280] sm:$0xff]  }
  0x70   : > { %8283 = vmatpush3.bf16.msra.mxu1 %v9276_v15  ;;  %8288 = vmatprep.subr.bf16.mxu0 %v9774_v1  ;;  %v9317_v15 = vld [vmem:[%s11953_s1 + $0x2c0] sm:$0xff]  }
  0x71   : > { %8308 = vmatprep.subr.bf16.mxu1 %v9774_v1 }
  0x72   : > { %8265 = vmatmul.mubr.bf16.vlgmr.msra.gmra.mrb[8].mxu0 %v688_v18  ;;  %v9320_v18 = vld [vmem:[%s11953_s1 + $0x290] sm:$0xff]  }
  0x73   : > { %8289 = vmatpush3.bf16.msra.mxu0 %v9278_v19  ;;  %8285 = vmatmul.mubr.bf16.vlgmr.msra.gmra.mrb[8].mxu1 %v804_v20  ;;  %v9321_v19 = vld [vmem:[%s11953_s1 + $0x2d0] sm:$0xff]   ;;  %v6653_v20 = vld [vmem:[%s9918_s28 + $0x558] sm:$0xf] }
  0x74   : > { %8309 = vmatpush3.bf16.msra.mxu1 %v9280_v21  ;;  %8290 = vmatprep.subr.bf16.mxu0 %v9774_v1  ;;  %v10296_v21 = vld [vmem:[%s9918_s28 + $0x55c] sm:$0xf] }
  0x75   : > { %8310 = vmatprep.subr.bf16.mxu1 %v9774_v1  ;;  %8304 = vmatprep.mubr.msk.bf16.mxu0 %vm9775_vm0, %v9774_v1 }
  0x76   : > { %8324 = vmatprep.mubr.msk.bf16.mxu1 %vm9775_vm0, %v9774_v1 }
  0x77   : > { %8291 = vmatpush3.bf16.msra.mxu0 %v9281_v22  ;;  %v9322_v22 = vld [vmem:[%s11953_s1 + $0x298] sm:$0xff]  }
  0x78   : > { %8311 = vmatpush3.bf16.msra.mxu1 %v9282_v23  ;;  %8292 = vmatprep.subr.bf16.mxu0 %v9774_v1  ;;  %v9323_v23 = vld [vmem:[%s11953_s1 + $0x2d8] sm:$0xff]  }
  0x79   : > { %8312 = vmatprep.subr.bf16.mxu1 %v9774_v1 }
  0x7b   : > { %8293 = vmatpush3.bf16.msra.mxu0 %v9283_v24  ;;  %v6672_v24 = vcombine.low %v6653_v20, %v10296_v21  ;;  %v9357_v20 = vld [vmem:[%s11953_s1 + $0x390] sm:$0xff]  }
  0x7c   : > { %8313 = vmatpush3.bf16.msra.mxu1 %v9284_v25  ;;  %8294 = vmatprep.subr.bf16.mxu0 %v9774_v1  ;;  %v9324_v25 = vld [vmem:[%s11953_s1 + $0x2a0] sm:$0xff]  }
  0x7d   : > { %8314 = vmatprep.subr.bf16.mxu1 %v9774_v1  ;;  %v1429_v28 = vshll.u32 %v6672_v24, 16 }
  0x7f   : > { %8295 = vmatpush3.bf16.msra.mxu0 %v9285_v26  ;;  %v9325_v26 = vld [vmem:[%s11953_s1 + $0x2e0] sm:$0xff]   ;;  %v1431_v34 = vrot.slane %v1429_v28, 1 }
  0x80   : > { %8315 = vmatpush3.bf16.msra.mxu1 %v9286_v27  ;;  %8296 = vmatprep.subr.bf16.mxu0 %v9774_v1  ;;  %v10315_v27 = vld [vmem:[%s9918_s28 + $0x560] ss:$0 sps:$4 sm:$0x11]  }
  0x81   : > { %8316 = vmatprep.subr.bf16.mxu1 %v9774_v1  ;;  %v1434_v35 = vshll.u32 %v10315_v27, 16 }
  0x83   : > { %8297 = vmatpush3.bf16.msra.mxu0 %v9287_v29  ;;  %v9326_v29 = vld [vmem:[%s11953_s1 + $0x2a8] sm:$0xff]   ;;  %v1436_v41 = vrot.slane %v1434_v35, 1 }
  0x84   : > { %8317 = vmatpush3.bf16.msra.mxu1 %v9288_v30  ;;  %8298 = vmatprep.subr.bf16.mxu0 %v9774_v1  ;;  %v6682_v30 = vld [vmem:[%s9918_s28 + $0x390] sm:$0xe] }
  0x85   : > { %8318 = vmatprep.subr.bf16.mxu1 %v9774_v1  ;;  %v10336_v37 = vcombine.low %v6682_v30, %v10225_v58  ;;  %v9344_v58 = vld [vmem:[%s11953_s1 + $0x360] sm:$0xff]  }
  0x87   : > { %8299 = vmatpush3.bf16.msra.mxu0 %v9289_v32  ;;  %v1427_v32 = vshrl.u32 %v6672_v24, 16  ;;  %v1787_v57 = vshll.u32 %v10336_v37, 16  ;;  %v9361_v24 = vld [vmem:[%s11953_s1 + $0x3a0] sm:$0xff]  }
  0x88   : > { %8319 = vmatpush3.bf16.msra.mxu1 %v9290_v36  ;;  %8300 = vmatprep.subr.bf16.mxu0 %v9774_v1  ;;  %v9329_v36 = vld [vmem:[%s11953_s1 + $0x2f0] sm:$0xff]  }
  0x89   : > { %8320 = vmatprep.subr.bf16.mxu1 %v9774_v1  ;;  %v1432_v40 = vor.u32 %v1431_v34, %v1427_v32 }
  0x8b   : > { %8301 = vmatpush3.bf16.msra.mxu0 %v9291_v38  ;;  %v1552_v38 = vrot.slane %v10237_v62, 1  ;;  %v6708_v62 = vld [vmem:[%s9918_s28 + $0x558] sm:$0xe] }
  0x8c   : > { %8321 = vmatpush3.bf16.msra.mxu1 %v9292_v42  ;;  %8302 = vmatprep.subr.bf16.mxu0 %v9774_v1  ;;  %v9331_v42 = vld [vmem:[%s11953_s1 + $0x2f8] sm:$0xff]   ;;  %v6725_v5 = vcombine.low %v6708_v62, %v10296_v21  ;;  %v9358_v21 = vld [vmem:[%s11953_s1 + $0x3d0] sm:$0xff]   ;;  %v9381_v62 = vld [vmem:[%s11953_s1 + $0x428] sm:$0xff]  }
  0x8d   : > { %8322 = vmatprep.subr.bf16.mxu1 %v9774_v1 }
  0x8e   : > { %v1667_v10 = vrot.slane %v6725_v5, 1  ;;  %v9383_v5 = vld [vmem:[%s11953_s1 + $0x430] sm:$0xff]  }
  0x8f   : > { %8303 = vmatpush3.bf16.msra.mxu0 %v9293_v43  ;;  %v1551_v43 = vrot.slane %v10336_v37, 1 }
  0x90   : > { %8323 = vmatpush3.bf16.msra.mxu1 %v9294_v44  ;;  %8328 = vmatprep.subr.bf16.mxu0 %v9774_v1  ;;  %v1437_v44 = vsel %vm427_vm1, %v1432_v40, %v1436_v41  ;;  %v9367_v40 = vld [vmem:[%s11953_s1 + $0x3b8] sm:$0xff]  }
  0x91   : > { %8348 = vmatprep.subr.bf16.mxu1 %v9774_v1  ;;  %v1553_v46 = vsel %vm685_vm2, %v1551_v43, %v1552_v38  ;;  %v9368_v41 = vld [vmem:[%s11953_s1 + $0x3f8] sm:$0xff]   ;;  %v9370_v43 = vld [vmem:[%s11953_s1 + $0x400] sm:$0xff]  }
  0x92   : > { %8305 = vmatmul.mubr.bf16.vlgmr.msra.gmra.mrb[12].mxu0 %v935_v47  ;;  %v9336_v47 = vld [vmem:[%s11953_s1 + $0x340] sm:$0xff]  }
  0x93   : > { %8329 = vmatpush3.bf16.msra.mxu0 %v9296_v48  ;;  %8325 = vmatmul.mubr.bf16.vlgmr.msra.gmra.mrb[12].mxu1 %v9297_v49  ;;  %v9337_v48 = vld [vmem:[%s11953_s1 + $0x308] sm:$0xff]  }
  0x94   : > { %8349 = vmatpush3.bf16.msra.mxu1 %v9298_v50  ;;  %8330 = vmatprep.subr.bf16.mxu0 %v9774_v1  ;;  %v9338_v49 = vld [vmem:[%s11953_s1 + $0x348] sm:$0xff]   ;;  %v9339_v50 = vld [vmem:[%s11953_s1 + $0x310] sm:$0xff]  }
  0x95   : > { %8350 = vmatprep.subr.bf16.mxu1 %v9774_v1  ;;  %8344 = vmatprep.mubr.msk.bf16.mxu0 %vm9775_vm0, %v9774_v1 }
  0x96   : > { %8364 = vmatprep.mubr.msk.bf16.mxu1 %vm9775_vm0, %v9774_v1 }
  0x97   : > { %8331 = vmatpush3.bf16.msra.mxu0 %v9299_v51  ;;  %v9340_v51 = vld [vmem:[%s11953_s1 + $0x350] sm:$0xff]  }
  0x98   : > { %8351 = vmatpush3.bf16.msra.mxu1 %v9300_v52  ;;  %8332 = vmatprep.subr.bf16.mxu0 %v9774_v1  ;;  %v9341_v52 = vld [vmem:[%s11953_s1 + $0x318] sm:$0xff]  }
  0x99   : > { %8352 = vmatprep.subr.bf16.mxu1 %v9774_v1 }
  0x9b   : > { %8333 = vmatpush3.bf16.msra.mxu0 %v9301_v53  ;;  %v9342_v53 = vld [vmem:[%s11953_s1 + $0x358] sm:$0xff]  }
  0x9c   : > { %8353 = vmatpush3.bf16.msra.mxu1 %v9302_v54  ;;  %8334 = vmatprep.subr.bf16.mxu0 %v9774_v1  ;;  %v1784_v54 = vshrl.u32 %v10336_v37, 16  ;;  %v9366_v37 = vld [vmem:[%s11953_s1 + $0x3f0] sm:$0xff]  }
  0x9d   : > { %8354 = vmatprep.subr.bf16.mxu1 %v9774_v1 }
  0x9f   : > { %8335 = vmatpush3.bf16.msra.mxu0 %v9303_v55  ;;  %v9353_v55 = vld [vmem:[%s9918_s28 + $0x398] ss:$0 sps:$4 sm:$0x33]  }
  0xa0   : > { %8355 = vmatpush3.bf16.msra.mxu1 %v9304_v56  ;;  %8336 = vmatprep.subr.bf16.mxu0 %v9774_v1  ;;  %v9343_v56 = vld [vmem:[%s11953_s1 + $0x320] sm:$0xff]  }
  0xa1   : > { %8356 = vmatprep.subr.bf16.mxu1 %v9774_v1 }
  0xa3   : > { %8337 = vmatpush3.bf16.msra.mxu0 %v9305_v59  ;;  %v1786_v59 = vrot.slane %v1784_v54, 1  ;;  %v6845_v54 = vld [vmem:[%s9918_s28 + $0x1d4] sm:$0xf] }
  0xa4   : > { %8357 = vmatpush3.bf16.msra.mxu1 %v9306_v60  ;;  %8338 = vmatprep.subr.bf16.mxu0 %v9774_v1  ;;  %v9345_v60 = vld [vmem:[%s11953_s1 + $0x328] sm:$0xff]  }
  0xa5   : > { %8358 = vmatprep.subr.bf16.mxu1 %v9774_v1 }
  0xa7   : > { %8339 = vmatpush3.bf16.msra.mxu0 %v9307_v63  ;;  %v1792_v63 = vshrl.u32 %v9353_v55, 16 }
  0xa8   : > { %8359 = vmatpush3.bf16.msra.mxu1 %v9308_v0  ;;  %8340 = vmatprep.subr.bf16.mxu0 %v9774_v1  ;;  %v1795_v0 = vshll.u32 %v9353_v55, 16 }
  0xa9   : > { %8360 = vmatprep.subr.bf16.mxu1 %v9774_v1  ;;  %v1794_v6 = vrot.slane %v1792_v63, 1  ;;  %v9382_v63 = vld [vmem:[%s11953_s1 + $0x468] sm:$0xff]  }
  0xaa   : > { %v1797_v7 = vrot.slane %v1795_v0, 2  ;;  %v10565_v0 = vld [vmem:[%s9918_s28 + $0x1dc] ss:$0 sps:$4 sm:$0x11]  }
  0xab   : > { %8341 = vmatpush3.bf16.msra.mxu0 %v9309_v3  ;;  %v9348_v3 = vld [vmem:[%s11953_s1 + $0x370] sm:$0xff]  }
  0xac   : > { %8361 = vmatpush3.bf16.msra.mxu1 %v9310_v4  ;;  %8342 = vmatprep.subr.bf16.mxu0 %v9774_v1  ;;  %v1789_v4 = vrot.slane %v1787_v57, 2  ;;  %v9379_v57 = vld [vmem:[%s11953_s1 + $0x420] sm:$0xff]  }
  0xad   : > { %8362 = vmatprep.subr.bf16.mxu1 %v9774_v1 }
  0xaf   : > { %8343 = vmatpush3.bf16.msra.mxu0 %v9311_v8  ;;  %v1668_v8 = vrot.slane %v10315_v27, 1  ;;  %v9364_v27 = vld [vmem:[%s11953_s1 + $0x3e8] sm:$0xff]  }
  0xb0   : > { %8363 = vmatpush3.bf16.msra.mxu1 %v9312_v9  ;;  %8368 = vmatprep.subr.bf16.mxu0 %v9774_v1  ;;  %v9349_v9 = vld [vmem:[%s11953_s1 + $0x338] sm:$0xff]  }
  0xb1   : > { %8388 = vmatprep.subr.bf16.mxu1 %v9774_v1 }
  0xb2   : > { %8345 = vmatmul.mubr.bf16.vlgmr.msra.gmra.mrb[16].mxu0 %v9313_v12  ;;  %v1790_v12 = vor.u32 %v1789_v4, %v1786_v59  ;;  %v9380_v59 = vld [vmem:[%s11953_s1 + $0x460] sm:$0xff]  }
  0xb3   : > { %8369 = vmatpush3.bf16.msra.mxu0 %v9314_v13  ;;  %8365 = vmatmul.mubr.bf16.vlgmr.msra.gmra.mrb[16].mxu1 %v1305_v14  ;;  %v1798_v13 = vor.u32 %v1797_v7, %v1794_v6  ;;  %v9352_v14 = vld [vmem:[%s11953_s1 + $0x380] sm:$0xff]  }
  0xb4   : > { %8389 = vmatpush3.bf16.msra.mxu1 %v9317_v15  ;;  %8370 = vmatprep.subr.bf16.mxu0 %v9774_v1  ;;  %v1669_v15 = vsel %vm685_vm2, %v1667_v10, %v1668_v8  ;;  %v9384_v10 = vld [vmem:[%s11953_s1 + $0x470] sm:$0xff]  }
  0xb5   : > { %8390 = vmatprep.subr.bf16.mxu1 %v9774_v1  ;;  %8384 = vmatprep.mubr.msk.bf16.mxu0 %vm9775_vm0, %v9774_v1 }
  0xb6   : > { %8404 = vmatprep.mubr.msk.bf16.mxu1 %vm9775_vm0, %v9774_v1 }
  0xb7   : > { %8371 = vmatpush3.bf16.msra.mxu0 %v9318_v16  ;;  %v9354_v16 = vld [vmem:[%s11953_s1 + $0x3c0] sm:$0xff]  }
  0xb8   : > { %8391 = vmatpush3.bf16.msra.mxu1 %v9319_v17  ;;  %8372 = vmatprep.subr.bf16.mxu0 %v9774_v1  ;;  %v1799_v17 = vsel %vm918_vm3, %v1790_v12, %v1798_v13 }
  0xb9   : > { %8392 = vmatprep.subr.bf16.mxu1 %v9774_v1 }
  0xbb   : > { %8373 = vmatpush3.bf16.msra.mxu0 %v9320_v18  ;;  %v9355_v18 = vld [vmem:[%s11953_s1 + $0x388] sm:$0xff]  }
  0xbc   : > { %8393 = vmatpush3.bf16.msra.mxu1 %v9321_v19  ;;  %8374 = vmatprep.subr.bf16.mxu0 %v9774_v1  ;;  %v9356_v19 = vld [vmem:[%s11953_s1 + $0x3c8] sm:$0xff]  }
  0xbd   : > { %8394 = vmatprep.subr.bf16.mxu1 %v9774_v1 }
  0xbf   : > { %8375 = vmatpush3.bf16.msra.mxu0 %v9322_v22  ;;  %v9359_v22 = vld [vmem:[%s11953_s1 + $0x398] sm:$0xff]  }
  0xc0   : > { %8395 = vmatpush3.bf16.msra.mxu1 %v9323_v23  ;;  %8376 = vmatprep.subr.bf16.mxu0 %v9774_v1  ;;  %v9360_v23 = vld [vmem:[%s11953_s1 + $0x3d8] sm:$0xff]  }
  0xc1   : > { %8396 = vmatprep.subr.bf16.mxu1 %v9774_v1 }
  0xc3   : > { %8377 = vmatpush3.bf16.msra.mxu0 %v9324_v25  ;;  %v9362_v25 = vld [vmem:[%s11953_s1 + $0x3e0] sm:$0xff]  }
  0xc4   : > { %8397 = vmatpush3.bf16.msra.mxu1 %v9325_v26  ;;  %8378 = vmatprep.subr.bf16.mxu0 %v9774_v1  ;;  %v9363_v26 = vld [vmem:[%s11953_s1 + $0x3a8] sm:$0xff]  }
  0xc5   : > { %8398 = vmatprep.subr.bf16.mxu1 %v9774_v1 }
  0xc7   : > { %8379 = vmatpush3.bf16.msra.mxu0 %v9326_v29 }
  0xc8   : > { %8399 = vmatpush3.bf16.msra.mxu1 %v9327_v31  ;;  %8380 = vmatprep.subr.bf16.mxu0 %v9774_v1  ;;  %v9365_v31 = vld [vmem:[%s11953_s1 + $0x3b0] sm:$0xff]  }
  0xc9   : > { %8400 = vmatprep.subr.bf16.mxu1 %v9774_v1 }
  0xcb   : > { %8381 = vmatpush3.bf16.msra.mxu0 %v9328_v33 }
  0xcc   : > { %8401 = vmatpush3.bf16.msra.mxu1 %v9329_v36  ;;  %8382 = vmatprep.subr.bf16.mxu0 %v9774_v1 }
  0xcd   : > { %8402 = vmatprep.subr.bf16.mxu1 %v9774_v1 }
  0xcf   : > { %8383 = vmatpush3.bf16.msra.mxu0 %v9330_v39 }
  0xd0   : > { %8403 = vmatpush3.bf16.msra.mxu1 %v9331_v42  ;;  %8408 = vmatprep.subr.bf16.mxu0 %v9774_v1  ;;  %v9369_v42 = vld [vmem:[%s9918_s28 + $0xc] sm:$0xff]  }
  0xd1   : > { %8428 = vmatprep.subr.bf16.mxu1 %v9774_v1 }
  0xd2   : > { %8385 = vmatmul.mubr.bf16.vlgmr.msra.gmra.mrb[20].mxu0 %v1437_v44  ;;  %v9371_v44 = vld [vmem:[%s9918_s28 + $0x1d4] sm:$0xff]  }
  0xd3   : > { %8409 = vmatpush3.bf16.msra.mxu0 %v9334_v45  ;;  %8405 = vmatmul.mubr.bf16.vlgmr.msra.gmra.mrb[20].mxu1 %v1553_v46  ;;  %v9372_v45 = vld [vmem:[%s11953_s1 + $0x440] sm:$0xff]   ;;  %v9373_v46 = vld [vmem:[%s11953_s1 + $0x408] sm:$0xff]  }
  0xd4   : > { %8429 = vmatpush3.bf16.msra.mxu1 %v9336_v47  ;;  %8410 = vmatprep.subr.bf16.mxu0 %v9774_v1  ;;  %v9374_v47 = vld [vmem:[%s11953_s1 + $0x448] sm:$0xff]  }
  0xd5   : > { %8430 = vmatprep.subr.bf16.mxu1 %v9774_v1  ;;  %8424 = vmatprep.mubr.msk.bf16.mxu0 %vm9775_vm0, %v9774_v1 }
  0xd6   : > { %8444 = vmatprep.mubr.msk.bf16.mxu1 %vm9775_vm0, %v9774_v1 }
  0xd7   : > { %8411 = vmatpush3.bf16.msra.mxu0 %v9337_v48  ;;  %v9375_v48 = vld [vmem:[%s11953_s1 + $0x410] sm:$0xff]  }
  0xd8   : > { %8431 = vmatpush3.bf16.msra.mxu1 %v9338_v49  ;;  %8412 = vmatprep.subr.bf16.mxu0 %v9774_v1  ;;  %v9376_v49 = vld [vmem:[%s11953_s1 + $0x450] sm:$0xff]  }
  0xd9   : > { %8432 = vmatprep.subr.bf16.mxu1 %v9774_v1 }
  0xdb   : > { %8413 = vmatpush3.bf16.msra.mxu0 %v9339_v50  ;;  %v6816_v50 = vld [vmem:[%s9918_s28 + $0xc] sm:$0xf] }
  0xdc   : > { %8433 = vmatpush3.bf16.msra.mxu1 %v9340_v51  ;;  %8414 = vmatprep.subr.bf16.mxu0 %v9774_v1  ;;  %v10530_v51 = vld [vmem:[%s9918_s28 + $0x10] sm:$0xf] }
  0xdd   : > { %8434 = vmatprep.subr.bf16.mxu1 %v9774_v1  ;;  %v6835_v55 = vcombine.low %v6816_v50, %v10530_v51 }
  0xdf   : > { %8415 = vmatpush3.bf16.msra.mxu0 %v9341_v52  ;;  %v9377_v52 = vld [vmem:[%s11953_s1 + $0x418] sm:$0xff]  }
  0xe0   : > { %8435 = vmatpush3.bf16.msra.mxu1 %v9342_v53  ;;  %8416 = vmatprep.subr.bf16.mxu0 %v9774_v1  ;;  %v9378_v53 = vld [vmem:[%s11953_s1 + $0x458] sm:$0xff]  }
  0xe1   : > { %8436 = vmatprep.subr.bf16.mxu1 %v9774_v1 }
  0xe3   : > { %8417 = vmatpush3.bf16.msra.mxu0 %v9343_v56  ;;  %v10543_v56 = vld [vmem:[%s9918_s28 + $0x1d8] sm:$0xf] }
  0xe4   : > { %8437 = vmatpush3.bf16.msra.mxu1 %v9344_v58  ;;  %8418 = vmatprep.subr.bf16.mxu0 %v9774_v1  ;;  %v10550_v58 = vld [vmem:[%s9918_s28 + $0x14] ss:$0 sps:$4 sm:$0x11]  }
  0xe5   : > { %8438 = vmatprep.subr.bf16.mxu1 %v9774_v1  ;;  %v2168_v6 = vshll.u32 %v10550_v58, 16 }
  0xe7   : > { %8419 = vmatpush3.bf16.msra.mxu0 %v9345_v60  ;;  %v2163_v60 = vshll.u32 %v6835_v55, 16 }
  0xe8   : > { %8439 = vmatpush3.bf16.msra.mxu1 %v9346_v61  ;;  %8420 = vmatprep.subr.bf16.mxu0 %v9774_v1  ;;  %v6864_v61 = vcombine.low %v6845_v54, %v10543_v56 }
  0xe9   : > { %8440 = vmatprep.subr.bf16.mxu1 %v9774_v1 }
  0xea   : > { %v2293_v12 = vshrl.u32 %v6864_v61, 16 }
  0xeb   : > { %8421 = vmatpush3.bf16.msra.mxu0 %v9347_v2  ;;  %v2161_v2 = vshrl.u32 %v6835_v55, 16 }
  0xec   : > { %8441 = vmatpush3.bf16.msra.mxu1 %v9348_v3  ;;  %8422 = vmatprep.subr.bf16.mxu0 %v9774_v1  ;;  %v2295_v3 = vshll.u32 %v6864_v61, 16 }
  0xed   : > { %8442 = vmatprep.subr.bf16.mxu1 %v9774_v1 }
  0xef   : > { %8423 = vmatpush3.bf16.msra.mxu0 %v9349_v9 }
  0xf0   : > { %8443 = vmatpush3.bf16.msra.mxu1 %v9350_v11  ;;  %8448 = vmatprep.subr.bf16.mxu0 %v9774_v1  ;;  %v2165_v11 = vrot.slane %v2163_v60, 1  ;;  %v9404_v60 = vld [vmem:[%s11953_s1 + $0x4f0] sm:$0xff]  }
  0xf1   : > { %8468 = vmatprep.subr.bf16.mxu1 %v9774_v1 }
  0xf2   : > { %8425 = vmatmul.mubr.bf16.vlgmr.msra.gmra.mrb[24].mxu0 %v1669_v15 }
  0xf3   : > { %8449 = vmatpush3.bf16.msra.mxu0 %v9352_v14  ;;  %8445 = vmatmul.mubr.bf16.vlgmr.msra.gmra.mrb[24].mxu1 %v1799_v17 }
  0xf4   : > { %8469 = vmatpush3.bf16.msra.mxu1 %v9354_v16  ;;  %8450 = vmatprep.subr.bf16.mxu0 %v9774_v1 }
  0xf5   : > { %8470 = vmatprep.subr.bf16.mxu1 %v9774_v1  ;;  %8464 = vmatprep.mubr.msk.bf16.mxu0 %vm9775_vm0, %v9774_v1 }
  0xf6   : > { %8484 = vmatprep.mubr.msk.bf16.mxu1 %vm9775_vm0, %v9774_v1 }
  0xf7   : > { %8451 = vmatpush3.bf16.msra.mxu0 %v9355_v18 }
  0xf8   : > { %8471 = vmatpush3.bf16.msra.mxu1 %v9356_v19  ;;  %8452 = vmatprep.subr.bf16.mxu0 %v9774_v1  ;;  %v2297_v19 = vrot.slane %v2295_v3, 1  ;;  %v2418_v3 = vrot.slane %v10550_v58, 1 }
  0xf9   : > { %8472 = vmatprep.subr.bf16.mxu1 %v9774_v1 }
  0xfb   : > { %8453 = vmatpush3.bf16.msra.mxu0 %v9357_v20  ;;  %v2300_v20 = vshll.u32 %v10565_v0, 16 }
  0xfc   : > { %8473 = vmatpush3.bf16.msra.mxu1 %v9358_v21  ;;  %8454 = vmatprep.subr.bf16.mxu0 %v9774_v1 }
  0xfd   : > { %8474 = vmatprep.subr.bf16.mxu1 %v9774_v1 }
  0xff   : > { %8455 = vmatpush3.bf16.msra.mxu0 %v9359_v22 }
 0x100   : > { %8475 = vmatpush3.bf16.msra.mxu1 %v9360_v23  ;;  %8456 = vmatprep.subr.bf16.mxu0 %v9774_v1  ;;  %v9385_v23 = vld [vmem:[%s11953_s1 + $0x438] sm:$0xff]  }
 0x101   : > { %8476 = vmatprep.subr.bf16.mxu1 %v9774_v1 }
 0x103   : > { %8457 = vmatpush3.bf16.msra.mxu0 %v9361_v24  ;;  %v2166_v24 = vor.u32 %v2165_v11, %v2161_v2  ;;  %v9414_v11 = vld [vmem:[%s11953_s1 + $0x550] sm:$0xff]  }
 0x104   : > { %8477 = vmatpush3.bf16.msra.mxu1 %v9362_v25  ;;  %8458 = vmatprep.subr.bf16.mxu0 %v9774_v1  ;;  %v2170_v25 = vrot.slane %v2168_v6, 1 }
 0x105   : > { %v297_v28 = vpop.f32.mrb[0].mxu0  ;;  %8478 = vmatprep.subr.bf16.mxu1 %v9774_v1 }
 0x106   : > { %v392_v29 = vpop.f32.mrb[0].mxu1  ;;  %v8186_v30 = vpop.f32.mrb[1].mxu0 }
 0x107   : > { %v10482_v32 = vadd.f32 %v392_v29, %v297_v28  ;;  %v8206_v33 = vpop.f32.mrb[1].mxu1  ;;  %v300_v34 = vpop.f32.mrb[2].mxu0  ;;  %8459 = vmatpush3.bf16.msra.mxu0 %v9363_v26  ;;  %v9386_v26 = vld [vmem:[%s11953_s1 + $0x478] sm:$0xff]   ;;  %v2302_v28 = vrot.slane %v2300_v20, 1  ;;  %v2171_v29 = vsel %vm427_vm1, %v2166_v24, %v2170_v25  ;;  %v9389_v30 = vld [vmem:[%s11953_s1 + $0x480] sm:$0xff]   ;;  %v9421_v25 = vld [vmem:[%s11953_s1 + $0x530] sm:$0xff]  }
 0x108   : > { %v395_v35 = vpop.f32.mrb[2].mxu1  ;;  %v8187_v36 = vpop.f32.mrb[3].mxu0  ;;  %8479 = vmatpush3.bf16.msra.mxu1 %v9364_v27  ;;  %8460 = vmatprep.subr.bf16.mxu0 %v9774_v1  ;;  %v2298_v27 = vor.u32 %v2297_v19, %v2293_v12  ;;  %v9393_v33 = vld [vmem:[%s11953_s1 + $0x488] sm:$0xff]   ;;  %v9425_v12 = vld [vmem:[%s9918_s28 + $0x14] ss:$0 sps:$4 sm:$0x33]  }
 0x109   : > { %v10488_v38 = vadd.f32 %v395_v35, %v300_v34  ;;  %8480 = vmatprep.subr.bf16.mxu1 %v9774_v1  ;;  %v8207_v39 = vpop.f32.mrb[3].mxu1  ;;  %v9394_v34 = vld [vmem:[%s11953_s1 + $0x4c8] sm:$0xff]   ;;  %v9395_v35 = vld [vmem:[%s11953_s1 + $0x490] sm:$0xff]   ;;  %v2658_v19 = vshrl.u32 %v9425_v12, 16  ;;  %v2661_v20 = vshll.u32 %v9425_v12, 16 }
 0x10a   : > { %v9396_v36 = vld [vmem:[%s11953_s1 + $0x4d0] sm:$0xff]   ;;  %v9399_v39 = vld [vmem:[%s11953_s1 + $0x4a0] sm:$0xff]  }
 0x10b   : > { %8461 = vmatpush3.bf16.msra.mxu0 %v9365_v31  ;;  %v2303_v31 = vsel %vm427_vm1, %v2298_v27, %v2302_v28 }
 0x10c   : > { %8481 = vmatpush3.bf16.msra.mxu1 %v9366_v37  ;;  %8462 = vmatprep.subr.bf16.mxu0 %v9774_v1  ;;  %v9397_v37 = vld [vmem:[%s11953_s1 + $0x498] sm:$0xff]  }
 0x10d   : > { %8482 = vmatprep.subr.bf16.mxu1 %v9774_v1 }
 0x10f   : > { %8463 = vmatpush3.bf16.msra.mxu0 %v9367_v40  ;;  %v9400_v40 = vld [vmem:[%s11953_s1 + $0x4e0] sm:$0xff]  }
 0x110   : > { %8483 = vmatpush3.bf16.msra.mxu1 %v9368_v41  ;;  %8488 = vmatprep.subr.bf16.mxu0 %v9774_v1  ;;  %v9401_v41 = vld [vmem:[%s11953_s1 + $0x4a8] sm:$0xff]  }
 0x111   : > { %8508 = vmatprep.subr.bf16.mxu1 %v9774_v1 }
 0x112   : > { %8465 = vmatmul.mubr.bf16.vlgmr.msra.gmra.mrb[28].mxu0 %v9369_v42  ;;  %v9402_v42 = vld [vmem:[%s11953_s1 + $0x4e8] sm:$0xff]  }
 0x113   : > { %8489 = vmatpush3.bf16.msra.mxu0 %v9370_v43  ;;  %8485 = vmatmul.mubr.bf16.vlgmr.msra.gmra.mrb[28].mxu1 %v9371_v44  ;;  %v6874_v43 = vld [vmem:[%s9918_s28 + $0xc] sm:$0xe]  ;;  %v6900_v44 = vld [vmem:[%s9918_s28 + $0x1d4] sm:$0xe] }
 0x114   : > { %8509 = vmatpush3.bf16.msra.mxu1 %v9372_v45  ;;  %8490 = vmatprep.subr.bf16.mxu0 %v9774_v1  ;;  %v6917_v61 = vcombine.low %v6900_v44, %v10543_v56  ;;  %v9406_v56 = vld [vmem:[%s11953_s1 + $0x4f8] sm:$0xff]  }
 0x115   : > { %8510 = vmatprep.subr.bf16.mxu1 %v9774_v1  ;;  %8504 = vmatprep.mubr.msk.bf16.mxu0 %vm9775_vm0, %v9774_v1  ;;  %v9424_v44 = vld [vmem:[%s11953_s1 + $0x578] sm:$0xff]  }
 0x116   : > { %8524 = vmatprep.mubr.msk.bf16.mxu1 %vm9775_vm0, %v9774_v1 }
 0x117   : > { %8491 = vmatpush3.bf16.msra.mxu0 %v9373_v46 }
 0x118   : > { %8511 = vmatpush3.bf16.msra.mxu1 %v9374_v47  ;;  %8492 = vmatprep.subr.bf16.mxu0 %v9774_v1 }
 0x119   : > { %8512 = vmatprep.subr.bf16.mxu1 %v9774_v1 }
 0x11b   : > { %8493 = vmatpush3.bf16.msra.mxu0 %v9375_v48 }
 0x11c   : > { %8513 = vmatpush3.bf16.msra.mxu1 %v9376_v49  ;;  %8494 = vmatprep.subr.bf16.mxu0 %v9774_v1  ;;  %v9403_v49 = vld [vmem:[%s11953_s1 + $0x4b0] sm:$0xff]  }
 0x11d   : > { %8514 = vmatprep.subr.bf16.mxu1 %v9774_v1 }
 0x11f   : > { %8495 = vmatpush3.bf16.msra.mxu0 %v9377_v52 }
 0x120   : > { %8515 = vmatpush3.bf16.msra.mxu1 %v9378_v53  ;;  %8496 = vmatprep.subr.bf16.mxu0 %v9774_v1  ;;  %v10654_v53 = vcombine.low %v6874_v43, %v10530_v51 }
 0x121   : > { %8516 = vmatprep.subr.bf16.mxu1 %v9774_v1 }
 0x122   : > { %v2417_v2 = vrot.slane %v10654_v53, 1 }
 0x123   : > { %8497 = vmatpush3.bf16.msra.mxu0 %v9379_v57 }
 0x124   : > { %8517 = vmatpush3.bf16.msra.mxu1 %v9380_v59  ;;  %8498 = vmatprep.subr.bf16.mxu0 %v9774_v1  ;;  %v2419_v6 = vsel %vm685_vm2, %v2417_v2, %v2418_v3  ;;  %v9438_v2 = vld [vmem:[%s11953_s1 + $0x5e8] sm:$0xff]  }
 0x125   : > { %v523_v4 = vpop.f32.mrb[4].mxu0  ;;  %8518 = vmatprep.subr.bf16.mxu1 %v9774_v1 }
 0x126   : > { %v530_v7 = vadd.f32 %v523_v4, %v10482_v32  ;;  %v8226_v8 = vpop.f32.mrb[5].mxu0  ;;  %v655_v9 = vpop.f32.mrb[4].mxu1  ;;  %v9392_v32 = vld [vmem:[%s11953_s1 + $0x4c0] sm:$0xff]   ;;  %v2533_v4 = vrot.slane %v6917_v61, 1 }
 0x127   : > { %v526_v13 = vpop.f32.mrb[6].mxu0  ;;  %8499 = vmatpush3.bf16.msra.mxu0 %v9381_v62  ;;  %v8246_v14 = vpop.f32.mrb[5].mxu1  ;;  %v9410_v8 = vld [vmem:[%s11953_s1 + $0x540] sm:$0xff]  }
 0x128   : > { %v531_v15 = vadd.f32 %v526_v13, %v10488_v38  ;;  %v10578_v16 = vadd.f32 %v655_v9, %v530_v7  ;;  %v8227_v17 = vpop.f32.mrb[7].mxu0  ;;  %v658_v18 = vpop.f32.mrb[6].mxu1  ;;  %8519 = vmatpush3.bf16.msra.mxu1 %v9382_v63  ;;  %8500 = vmatprep.subr.bf16.mxu0 %v9774_v1  ;;  %v9398_v38 = vld [vmem:[%s11953_s1 + $0x4d8] sm:$0xff]   ;;  %v9408_v7 = vld [vmem:[%s11953_s1 + $0x500] sm:$0xff]   ;;  %v9412_v9 = vld [vmem:[%s11953_s1 + $0x548] sm:$0xff]  }
 0x129   : > { %8520 = vmatprep.subr.bf16.mxu1 %v9774_v1  ;;  %v8247_v21 = vpop.f32.mrb[7].mxu1  ;;  %v9405_v63 = vld [vmem:[%s11953_s1 + $0x4b8] sm:$0xff]   ;;  %v2650_v17 = vshrl.u32 %v10654_v53, 16  ;;  %v9436_v61 = vld [vmem:[%s11953_s1 + $0x5e0] sm:$0xff]  }
 0x12a   : > { %v10583_v22 = vadd.f32 %v658_v18, %v531_v15  ;;  %v9415_v13 = vld [vmem:[%s11953_s1 + $0x518] sm:$0xff]   ;;  %v9417_v15 = vld [vmem:[%s11953_s1 + $0x520] sm:$0xff]   ;;  %v2653_v18 = vshll.u32 %v10654_v53, 16  ;;  %v9419_v21 = vld [vmem:[%s11953_s1 + $0x528] sm:$0xff]  }
 0x12b   : > { %8501 = vmatpush3.bf16.msra.mxu0 %v9383_v5  ;;  %v2534_v5 = vrot.slane %v10565_v0, 1  ;;  %v9411_v0 = vld [vmem:[%s11953_s1 + $0x508] sm:$0xff]   ;;  %v9416_v14 = vld [vmem:[%s11953_s1 + $0x558] sm:$0xff]   ;;  %v9432_v53 = vld [vmem:[%s11953_s1 + $0x5d0] sm:$0xff]  }
 0x12c   : > { %8521 = vmatpush3.bf16.msra.mxu1 %v9384_v10  ;;  %8502 = vmatprep.subr.bf16.mxu0 %v9774_v1  ;;  %v9413_v10 = vld [vmem:[%s11953_s1 + $0x510] sm:$0xff]  }
 0x12d   : > { %8522 = vmatprep.subr.bf16.mxu1 %v9774_v1  ;;  %v2535_v58 = vsel %vm685_vm2, %v2533_v4, %v2534_v5  ;;  %v9439_v4 = vld [vmem:[%s11953_s1 + $0x5b0] sm:$0xff]  }
 0x12f   : > { %8503 = vmatpush3.bf16.msra.mxu0 %v9385_v23  ;;  %v2652_v23 = vrot.slane %v2650_v17, 1 }
 0x130   : > { %8523 = vmatpush3.bf16.msra.mxu1 %v9386_v26  ;;  %8528 = vmatprep.subr.bf16.mxu0 %v9774_v1  ;;  %v2655_v26 = vrot.slane %v2653_v18, 2  ;;  %v9441_v18 = vld [vmem:[%s11953_s1 + $0x5b8] sm:$0xff]  }
 0x131   : > { %8548 = vmatprep.subr.bf16.mxu1 %v9774_v1 }
 0x132   : > { %8505 = vmatmul.mubr.bf16.vlgmr.msra.gmra.mrb[32].mxu0 %v2171_v29 }
 0x133   : > { %8529 = vmatpush3.bf16.msra.mxu0 %v9389_v30  ;;  %8525 = vmatmul.mubr.bf16.vlgmr.msra.gmra.mrb[32].mxu1 %v2303_v31  ;;  %v2660_v30 = vrot.slane %v2658_v19, 1  ;;  %v2663_v31 = vrot.slane %v2661_v20, 2  ;;  %v9442_v19 = vld [vmem:[%s11953_s1 + $0x5f8] sm:$0xff]  }
 0x134   : > { %8549 = vmatpush3.bf16.msra.mxu1 %v9392_v32  ;;  %8530 = vmatprep.subr.bf16.mxu0 %v9774_v1 }
 0x135   : > { %8550 = vmatprep.subr.bf16.mxu1 %v9774_v1  ;;  %8544 = vmatprep.mubr.msk.bf16.mxu0 %vm9775_vm0, %v9774_v1  ;;  %v2664_v43 = vor.u32 %v2663_v31, %v2660_v30  ;;  %v7037_v30 = vld [vmem:[%s9918_s28 + $0x564] sm:$0xf]  ;;  %v10873_v31 = vld [vmem:[%s9918_s28 + $0x568] sm:$0xf] }
 0x136   : > { %8564 = vmatprep.mubr.msk.bf16.mxu1 %vm9775_vm0, %v9774_v1 }
 0x137   : > { %8531 = vmatpush3.bf16.msra.mxu0 %v9393_v33 }
 0x138   : > { %8551 = vmatpush3.bf16.msra.mxu1 %v9394_v34  ;;  %8532 = vmatprep.subr.bf16.mxu0 %v9774_v1 }
 0x139   : > { %8552 = vmatprep.subr.bf16.mxu1 %v9774_v1 }
 0x13b   : > { %8533 = vmatpush3.bf16.msra.mxu0 %v9395_v35 }
 0x13c   : > { %8553 = vmatpush3.bf16.msra.mxu1 %v9396_v36  ;;  %8534 = vmatprep.subr.bf16.mxu0 %v9774_v1 }
 0x13d   : > { %8554 = vmatprep.subr.bf16.mxu1 %v9774_v1 }
 0x13f   : > { %8535 = vmatpush3.bf16.msra.mxu0 %v9397_v37 }
 0x140   : > { %8555 = vmatpush3.bf16.msra.mxu1 %v9398_v38  ;;  %8536 = vmatprep.subr.bf16.mxu0 %v9774_v1  ;;  %v9422_v38 = vld [vmem:[%s11953_s1 + $0x570] sm:$0xff]  }
 0x141   : > { %8556 = vmatprep.subr.bf16.mxu1 %v9774_v1 }
 0x143   : > { %8537 = vmatpush3.bf16.msra.mxu0 %v9399_v39 }
 0x144   : > { %8557 = vmatpush3.bf16.msra.mxu1 %v9400_v40  ;;  %8538 = vmatprep.subr.bf16.mxu0 %v9774_v1 }
 0x145   : > { %v772_v45 = vpop.f32.mrb[8].mxu0  ;;  %8558 = vmatprep.subr.bf16.mxu1 %v9774_v1 }
 0x146   : > { %v779_v46 = vadd.f32 %v772_v45, %v10578_v16  ;;  %v8266_v47 = vpop.f32.mrb[9].mxu0  ;;  %v888_v48 = vpop.f32.mrb[8].mxu1  ;;  %v9418_v16 = vld [vmem:[%s11953_s1 + $0x560] sm:$0xff]  }
 0x147   : > { %v775_v50 = vpop.f32.mrb[10].mxu0  ;;  %8539 = vmatpush3.bf16.msra.mxu0 %v9401_v41  ;;  %v8286_v52 = vpop.f32.mrb[9].mxu1  ;;  %v9423_v41 = vld [vmem:[%s11953_s1 + $0x538] sm:$0xff]   ;;  %v9426_v45 = vld [vmem:[%s11953_s1 + $0x580] sm:$0xff]  }
 0x148   : > { %v780_v54 = vadd.f32 %v775_v50, %v10583_v22  ;;  %v10657_v55 = vadd.f32 %v888_v48, %v779_v46  ;;  %v8267_v57 = vpop.f32.mrb[11].mxu0  ;;  %v891_v59 = vpop.f32.mrb[10].mxu1  ;;  %8559 = vmatpush3.bf16.msra.mxu1 %v9402_v42  ;;  %8540 = vmatprep.subr.bf16.mxu0 %v9774_v1  ;;  %v9420_v22 = vld [vmem:[%s11953_s1 + $0x568] sm:$0xff]   ;;  %v2656_v42 = vor.u32 %v2655_v26, %v2652_v23  ;;  %v9427_v47 = vld [vmem:[%s9918_s28 + $0x39c] sm:$0xff]   ;;  %v9431_v52 = vld [vmem:[%s11953_s1 + $0x590] sm:$0xff]  }
 0x149   : > { %8560 = vmatprep.subr.bf16.mxu1 %v9774_v1  ;;  %v8287_v62 = vpop.f32.mrb[11].mxu1  ;;  %v9428_v48 = vld [vmem:[%s11953_s1 + $0x5c0] sm:$0xff]   ;;  %v9430_v50 = vld [vmem:[%s11953_s1 + $0x5c8] sm:$0xff]   ;;  %v7008_v57 = vld [vmem:[%s9918_s28 + $0x39c] sm:$0xf] }
 0x14a   : > { %v10665_v51 = vadd.f32 %v891_v59, %v780_v54  ;;  %v2665_v46 = vsel %vm918_vm3, %v2656_v42, %v2664_v43  ;;  %v9433_v54 = vld [vmem:[%s11953_s1 + $0x598] sm:$0xff]   ;;  %v10796_v59 = vld [vmem:[%s9918_s28 + $0x3a0] sm:$0xf]  ;;  %v9448_v26 = vld [vmem:[%s11953_s1 + $0x608] sm:$0xff]  }
 0x14b   : > { %8541 = vmatpush3.bf16.msra.mxu0 %v9403_v49  ;;  %v9429_v49 = vld [vmem:[%s11953_s1 + $0x588] sm:$0xff]   ;;  %v7027_v62 = vcombine.low %v7008_v57, %v10796_v59  ;;  %v9444_v23 = vld [vmem:[%s11953_s1 + $0x600] sm:$0xff]   ;;  %v9458_v43 = vld [vmem:[%s11953_s1 + $0x630] sm:$0xff]  }
 0x14c   : > { %8561 = vmatpush3.bf16.msra.mxu1 %v9404_v60  ;;  %8542 = vmatprep.subr.bf16.mxu0 %v9774_v1  ;;  %v9435_v60 = vld [vmem:[%s11953_s1 + $0x5a0] sm:$0xff]  }
 0x14d   : > { %8562 = vmatprep.subr.bf16.mxu1 %v9774_v1  ;;  %v3027_v3 = vshll.u32 %v7027_v62, 16 }
 0x14f   : > { %8543 = vmatpush3.bf16.msra.mxu0 %v9405_v63  ;;  %v10812_v63 = vld [vmem:[%s9918_s28 + $0x3a4] ss:$0 sps:$4 sm:$0x11]  }
 0x150   : > { %8563 = vmatpush3.bf16.msra.mxu1 %v9406_v56  ;;  %8568 = vmatprep.subr.bf16.mxu0 %v9774_v1 }
 0x151   : > { %8588 = vmatprep.subr.bf16.mxu1 %v9774_v1 }
 0x152   : > { %8545 = vmatmul.mubr.bf16.vlgmr.msra.gmra.mrb[36].mxu0 %v2419_v6 }
 0x153   : > { %8569 = vmatpush3.bf16.msra.mxu0 %v9408_v7  ;;  %8565 = vmatmul.mubr.bf16.vlgmr.msra.gmra.mrb[36].mxu1 %v2535_v58  ;;  %v9440_v58 = vld [vmem:[%s11953_s1 + $0x5f0] sm:$0xff]  }
 0x154   : > { %8589 = vmatpush3.bf16.msra.mxu1 %v9410_v8  ;;  %8570 = vmatprep.subr.bf16.mxu0 %v9774_v1  ;;  %v3025_v8 = vshrl.u32 %v7027_v62, 16 }
 0x155   : > { %8590 = vmatprep.subr.bf16.mxu1 %v9774_v1  ;;  %8584 = vmatprep.mubr.msk.bf16.mxu0 %vm9775_vm0, %v9774_v1 }
 0x156   : > { %8604 = vmatprep.mubr.msk.bf16.mxu1 %vm9775_vm0, %v9774_v1 }
 0x157   : > { %8571 = vmatpush3.bf16.msra.mxu0 %v9411_v0 }
 0x158   : > { %8591 = vmatpush3.bf16.msra.mxu1 %v9412_v9  ;;  %8572 = vmatprep.subr.bf16.mxu0 %v9774_v1 }
 0x159   : > { %8592 = vmatprep.subr.bf16.mxu1 %v9774_v1 }
 0x15b   : > { %8573 = vmatpush3.bf16.msra.mxu0 %v9413_v10 }
 0x15c   : > { %8593 = vmatpush3.bf16.msra.mxu1 %v9414_v11  ;;  %8574 = vmatprep.subr.bf16.mxu0 %v9774_v1 }
 0x15d   : > { %8594 = vmatprep.subr.bf16.mxu1 %v9774_v1 }
 0x15f   : > { %8575 = vmatpush3.bf16.msra.mxu0 %v9415_v13 }
 0x160   : > { %8595 = vmatpush3.bf16.msra.mxu1 %v9416_v14  ;;  %8576 = vmatprep.subr.bf16.mxu0 %v9774_v1  ;;  %v3029_v14 = vrot.slane %v3027_v3, 1 }
 0x161   : > { %8596 = vmatprep.subr.bf16.mxu1 %v9774_v1 }
 0x162   : > { %v3030_v20 = vor.u32 %v3029_v14, %v3025_v8  ;;  %v9466_v8 = vld [vmem:[%s11953_s1 + $0x6c0] sm:$0xff]  }
 0x163   : > { %8577 = vmatpush3.bf16.msra.mxu0 %v9417_v15  ;;  %v3032_v15 = vshll.u32 %v10812_v63, 16  ;;  %v9474_v14 = vld [vmem:[%s11953_s1 + $0x6e0] sm:$0xff]  }
 0x164   : > { %8597 = vmatpush3.bf16.msra.mxu1 %v9418_v16  ;;  %8578 = vmatprep.subr.bf16.mxu0 %v9774_v1 }
 0x165   : > { %v1019_v24 = vpop.f32.mrb[12].mxu0  ;;  %8598 = vmatprep.subr.bf16.mxu1 %v9774_v1 }
 0x166   : > { %v1026_v27 = vadd.f32 %v1019_v24, %v10657_v55  ;;  %v8306_v28 = vpop.f32.mrb[13].mxu0  ;;  %v1138_v29 = vpop.f32.mrb[12].mxu1  ;;  %v9434_v55 = vld [vmem:[%s11953_s1 + $0x5d8] sm:$0xff]  }
 0x167   : > { %v1022_v32 = vpop.f32.mrb[14].mxu0  ;;  %8579 = vmatpush3.bf16.msra.mxu0 %v9419_v21  ;;  %v8326_v33 = vpop.f32.mrb[13].mxu1  ;;  %v3034_v21 = vrot.slane %v3032_v15, 1  ;;  %v9450_v28 = vld [vmem:[%s11953_s1 + $0x610] sm:$0xff]  }
 0x168   : > { %v1027_v34 = vadd.f32 %v1022_v32, %v10665_v51  ;;  %v10740_v35 = vadd.f32 %v1138_v29, %v1026_v27  ;;  %v8307_v36 = vpop.f32.mrb[15].mxu0  ;;  %v1141_v37 = vpop.f32.mrb[14].mxu1  ;;  %8599 = vmatpush3.bf16.msra.mxu1 %v9420_v22  ;;  %8580 = vmatprep.subr.bf16.mxu0 %v9774_v1  ;;  %v9437_v51 = vld [vmem:[%s11953_s1 + $0x5a8] sm:$0xff]   ;;  %v9451_v29 = vld [vmem:[%s11953_s1 + $0x650] sm:$0xff]   ;;  %v9452_v32 = vld [vmem:[%s11953_s1 + $0x618] sm:$0xff]  }
 0x169   : > { %8600 = vmatprep.subr.bf16.mxu1 %v9774_v1  ;;  %v8327_v39 = vpop.f32.mrb[15].mxu1  ;;  %v9443_v22 = vld [vmem:[%s9918_s28 + $0x564] sm:$0xff]   ;;  %v3035_v24 = vsel %vm427_vm1, %v3030_v20, %v3034_v21  ;;  %v9453_v33 = vld [vmem:[%s11953_s1 + $0x658] sm:$0xff]  }
 0x16a   : > { %v10747_v40 = vadd.f32 %v1141_v37, %v1027_v34  ;;  %v9449_v27 = vld [vmem:[%s11953_s1 + $0x648] sm:$0xff]   ;;  %v7056_v34 = vcombine.low %v7037_v30, %v10873_v31  ;;  %v9455_v36 = vld [vmem:[%s11953_s1 + $0x660] sm:$0xff]  }
 0x16b   : > { %8581 = vmatpush3.bf16.msra.mxu0 %v9421_v25  ;;  %v9447_v25 = vld [vmem:[%s11953_s1 + $0x640] sm:$0xff]   ;;  %v10893_v37 = vld [vmem:[%s9918_s28 + $0x56c] ss:$0 sps:$4 sm:$0x11]  }
 0x16c   : > { %8601 = vmatpush3.bf16.msra.mxu1 %v9422_v38  ;;  %8582 = vmatprep.subr.bf16.mxu0 %v9774_v1  ;;  %v3159_v38 = vshll.u32 %v7056_v34, 16  ;;  %v9456_v39 = vld [vmem:[%s11953_s1 + $0x628] sm:$0xff]   ;;  %v9483_v15 = vld [vmem:[%s9918_s28 + $0x3a4] ss:$0 sps:$4 sm:$0x33]  }
 0x16d   : > { %8602 = vmatprep.subr.bf16.mxu1 %v9774_v1  ;;  %v7092_v20 = vld [vmem:[%s9918_s28 + $0x564] sm:$0xe]  ;;  %v3522_v21 = vshrl.u32 %v9483_v15, 16 }
 0x16e   : > { %v7109_v30 = vcombine.low %v7092_v20, %v10873_v31  ;;  %v9504_v20 = vld [vmem:[%s11953_s1 + $0x7c8] sm:$0xff]  }
 0x16f   : > { %8583 = vmatpush3.bf16.msra.mxu0 %v9423_v41  ;;  %v7066_v41 = vld [vmem:[%s9918_s28 + $0x39c] sm:$0xe] }
 0x170   : > { %8603 = vmatpush3.bf16.msra.mxu1 %v9424_v44  ;;  %8608 = vmatprep.subr.bf16.mxu0 %v9774_v1  ;;  %v3157_v44 = vshrl.u32 %v7056_v34, 16 }
 0x171   : > { %8628 = vmatprep.subr.bf16.mxu1 %v9774_v1 }
 0x172   : > { %8585 = vmatmul.mubr.bf16.vlgmr.msra.gmra.mrb[40].mxu0 %v2665_v46 }
 0x173   : > { %8609 = vmatpush3.bf16.msra.mxu0 %v9426_v45  ;;  %8605 = vmatmul.mubr.bf16.vlgmr.msra.gmra.mrb[40].mxu1 %v9427_v47 }
 0x174   : > { %8629 = vmatpush3.bf16.msra.mxu1 %v9428_v48  ;;  %8610 = vmatprep.subr.bf16.mxu0 %v9774_v1  ;;  %v3161_v48 = vrot.slane %v3159_v38, 1 }
 0x175   : > { %8630 = vmatprep.subr.bf16.mxu1 %v9774_v1  ;;  %8624 = vmatprep.mubr.msk.bf16.mxu0 %vm9775_vm0, %v9774_v1 }
 0x176   : > { %8644 = vmatprep.mubr.msk.bf16.mxu1 %vm9775_vm0, %v9774_v1  ;;  %v3162_v3 = vor.u32 %v3161_v48, %v3157_v44  ;;  %v3397_v44 = vrot.slane %v7109_v30, 1 }
 0x177   : > { %8611 = vmatpush3.bf16.msra.mxu0 %v9429_v49  ;;  %v3164_v49 = vshll.u32 %v10893_v37, 16 }
 0x178   : > { %8631 = vmatpush3.bf16.msra.mxu1 %v9430_v50  ;;  %8612 = vmatprep.subr.bf16.mxu0 %v9774_v1 }
 0x179   : > { %8632 = vmatprep.subr.bf16.mxu1 %v9774_v1 }
 0x17b   : > { %8613 = vmatpush3.bf16.msra.mxu0 %v9431_v52 }
 0x17c   : > { %8633 = vmatpush3.bf16.msra.mxu1 %v9432_v53  ;;  %8614 = vmatprep.subr.bf16.mxu0 %v9774_v1 }
 0x17d   : > { %8634 = vmatprep.subr.bf16.mxu1 %v9774_v1 }
 0x17f   : > { %8615 = vmatpush3.bf16.msra.mxu0 %v9433_v54 }
 0x180   : > { %8635 = vmatpush3.bf16.msra.mxu1 %v9434_v55  ;;  %8616 = vmatprep.subr.bf16.mxu0 %v9774_v1 }
 0x181   : > { %8636 = vmatprep.subr.bf16.mxu1 %v9774_v1 }
 0x183   : > { %8617 = vmatpush3.bf16.msra.mxu0 %v9435_v60  ;;  %v9459_v60 = vld [vmem:[%s11953_s1 + $0x670] sm:$0xff]  }
 0x184   : > { %8637 = vmatpush3.bf16.msra.mxu1 %v9436_v61  ;;  %8618 = vmatprep.subr.bf16.mxu0 %v9774_v1  ;;  %v10918_v61 = vcombine.low %v7066_v41, %v10796_v59  ;;  %v9461_v59 = vld [vmem:[%s11953_s1 + $0x678] sm:$0xff]  }
 0x185   : > { %v1257_v56 = vpop.f32.mrb[16].mxu0  ;;  %8638 = vmatprep.subr.bf16.mxu1 %v9774_v1 }
 0x186   : > { %v1264_v5 = vadd.f32 %v1257_v56, %v10740_v35  ;;  %v8346_v6 = vpop.f32.mrb[17].mxu0  ;;  %v1389_v7 = vpop.f32.mrb[16].mxu1  ;;  %v9454_v35 = vld [vmem:[%s11953_s1 + $0x620] sm:$0xff]   ;;  %v3166_v56 = vrot.slane %v3164_v49, 1 }
 0x187   : > { %v1260_v0 = vpop.f32.mrb[18].mxu0  ;;  %8619 = vmatpush3.bf16.msra.mxu0 %v9437_v51  ;;  %v8366_v9 = vpop.f32.mrb[17].mxu1 }
 0x188   : > { %v1265_v10 = vadd.f32 %v1260_v0, %v10747_v40  ;;  %v10827_v11 = vadd.f32 %v1389_v7, %v1264_v5  ;;  %v8347_v12 = vpop.f32.mrb[19].mxu0  ;;  %v1392_v13 = vpop.f32.mrb[18].mxu1  ;;  %8639 = vmatpush3.bf16.msra.mxu1 %v9438_v2  ;;  %8620 = vmatprep.subr.bf16.mxu0 %v9774_v1  ;;  %v9457_v40 = vld [vmem:[%s11953_s1 + $0x668] sm:$0xff]   ;;  %v9460_v2 = vld [vmem:[%s11953_s1 + $0x638] sm:$0xff]   ;;  %v3282_v5 = vrot.slane %v10812_v63, 1  ;;  %v3167_v6 = vsel %vm427_vm1, %v3162_v3, %v3166_v56  ;;  %v9464_v7 = vld [vmem:[%s11953_s1 + $0x680] sm:$0xff]  }
 0x189   : > { %8640 = vmatprep.subr.bf16.mxu1 %v9774_v1  ;;  %v8367_v16 = vpop.f32.mrb[19].mxu1  ;;  %v9467_v63 = vld [vmem:[%s11953_s1 + $0x688] sm:$0xff]   ;;  %v9469_v9 = vld [vmem:[%s11953_s1 + $0x690] sm:$0xff]   ;;  %v9472_v12 = vld [vmem:[%s11953_s1 + $0x6d8] sm:$0xff]  }
 0x18a   : > { %v10832_v17 = vadd.f32 %v1392_v13, %v1265_v10  ;;  %v9468_v0 = vld [vmem:[%s11953_s1 + $0x6c8] sm:$0xff]   ;;  %v9470_v10 = vld [vmem:[%s11953_s1 + $0x6d0] sm:$0xff]   ;;  %v9473_v13 = vld [vmem:[%s11953_s1 + $0x6a0] sm:$0xff]  }
 0x18b   : > { %8621 = vmatpush3.bf16.msra.mxu0 %v9439_v4  ;;  %v3281_v4 = vrot.slane %v10918_v61, 1  ;;  %v9475_v16 = vld [vmem:[%s11953_s1 + $0x6a8] sm:$0xff]  }
 0x18c   : > { %8641 = vmatpush3.bf16.msra.mxu1 %v9440_v58  ;;  %8622 = vmatprep.subr.bf16.mxu0 %v9774_v1  ;;  %v9494_v3 = vld [vmem:[%s11953_s1 + $0x768] sm:$0xff]  }
 0x18d   : > { %8642 = vmatprep.subr.bf16.mxu1 %v9774_v1  ;;  %v3283_v58 = vsel %vm685_vm2, %v3281_v4, %v3282_v5 }
 0x18f   : > { %8623 = vmatpush3.bf16.msra.mxu0 %v9441_v18  ;;  %v3517_v18 = vshll.u32 %v10918_v61, 16 }
 0x190   : > { %8643 = vmatpush3.bf16.msra.mxu1 %v9442_v19  ;;  %8648 = vmatprep.subr.bf16.mxu0 %v9774_v1  ;;  %v9476_v19 = vld [vmem:[%s11953_s1 + $0x6e8] sm:$0xff]  }
 0x191   : > { %8668 = vmatprep.subr.bf16.mxu1 %v9774_v1 }
 0x192   : > { %8625 = vmatmul.mubr.bf16.vlgmr.msra.gmra.mrb[44].mxu0 %v9443_v22  ;;  %v3525_v22 = vshll.u32 %v9483_v15, 16  ;;  %v9499_v15 = vld [vmem:[%s9918_s28 + $0x18] sm:$0xff]  }
 0x193   : > { %8649 = vmatpush3.bf16.msra.mxu0 %v9444_v23  ;;  %8645 = vmatmul.mubr.bf16.vlgmr.msra.gmra.mrb[44].mxu1 %v3035_v24 }
 0x194   : > { %8669 = vmatpush3.bf16.msra.mxu1 %v9447_v25  ;;  %8650 = vmatprep.subr.bf16.mxu0 %v9774_v1  ;;  %v3527_v41 = vrot.slane %v3525_v22, 2  ;;  %v9506_v22 = vld [vmem:[%s11953_s1 + $0x7d0] sm:$0xff]  }
 0x195   : > { %8670 = vmatprep.subr.bf16.mxu1 %v9774_v1  ;;  %8664 = vmatprep.mubr.msk.bf16.mxu0 %vm9775_vm0, %v9774_v1 }
 0x196   : > { %8684 = vmatprep.mubr.msk.bf16.mxu1 %vm9775_vm0, %v9774_v1 }
 0x197   : > { %8651 = vmatpush3.bf16.msra.mxu0 %v9448_v26 }
 0x198   : > { %8671 = vmatpush3.bf16.msra.mxu1 %v9449_v27  ;;  %8652 = vmatprep.subr.bf16.mxu0 %v9774_v1 }
 0x199   : > { %8672 = vmatprep.subr.bf16.mxu1 %v9774_v1 }
 0x19b   : > { %8653 = vmatpush3.bf16.msra.mxu0 %v9450_v28 }
 0x19c   : > { %8673 = vmatpush3.bf16.msra.mxu1 %v9451_v29  ;;  %8654 = vmatprep.subr.bf16.mxu0 %v9774_v1  ;;  %v9477_v29 = vld [vmem:[%s11953_s1 + $0x6b0] sm:$0xff]  }
 0x19d   : > { %8674 = vmatprep.subr.bf16.mxu1 %v9774_v1 }
 0x19f   : > { %8655 = vmatpush3.bf16.msra.mxu0 %v9452_v32 }
 0x1a0   : > { %8675 = vmatpush3.bf16.msra.mxu1 %v9453_v33  ;;  %8656 = vmatprep.subr.bf16.mxu0 %v9774_v1  ;;  %v3519_v33 = vrot.slane %v3517_v18, 2  ;;  %v9502_v18 = vld [vmem:[%s11953_s1 + $0x7c0] sm:$0xff]  }
 0x1a1   : > { %8676 = vmatprep.subr.bf16.mxu1 %v9774_v1 }
 0x1a3   : > { %8657 = vmatpush3.bf16.msra.mxu0 %v9454_v35 }
 0x1a4   : > { %8677 = vmatpush3.bf16.msra.mxu1 %v9455_v36  ;;  %8658 = vmatprep.subr.bf16.mxu0 %v9774_v1 }
 0x1a5   : > { %v1521_v42 = vpop.f32.mrb[20].mxu0  ;;  %8678 = vmatprep.subr.bf16.mxu1 %v9774_v1 }
 0x1a6   : > { %v1528_v45 = vadd.f32 %v1521_v42, %v10827_v11  ;;  %v8386_v46 = vpop.f32.mrb[21].mxu0  ;;  %v1637_v47 = vpop.f32.mrb[20].mxu1  ;;  %v9471_v11 = vld [vmem:[%s11953_s1 + $0x698] sm:$0xff]  }
 0x1a7   : > { %v1524_v50 = vpop.f32.mrb[22].mxu0  ;;  %8659 = vmatpush3.bf16.msra.mxu0 %v9456_v39  ;;  %v8406_v52 = vpop.f32.mrb[21].mxu1  ;;  %v9478_v39 = vld [vmem:[%s11953_s1 + $0x6f0] sm:$0xff]   ;;  %v9480_v46 = vld [vmem:[%s11953_s1 + $0x6f8] sm:$0xff]  }
 0x1a8   : > { %v1529_v53 = vadd.f32 %v1524_v50, %v10832_v17  ;;  %v10911_v54 = vadd.f32 %v1637_v47, %v1528_v45  ;;  %v8387_v55 = vpop.f32.mrb[23].mxu0  ;;  %v1640_v57 = vpop.f32.mrb[22].mxu1  ;;  %8679 = vmatpush3.bf16.msra.mxu1 %v9457_v40  ;;  %8660 = vmatprep.subr.bf16.mxu0 %v9774_v1  ;;  %v3514_v17 = vshrl.u32 %v10918_v61, 16  ;;  %v3524_v40 = vrot.slane %v3522_v21, 1  ;;  %v9482_v50 = vld [vmem:[%s11953_s1 + $0x700] sm:$0xff]   ;;  %v9490_v61 = vld [vmem:[%s11953_s1 + $0x758] sm:$0xff]  }
 0x1a9   : > { %8680 = vmatprep.subr.bf16.mxu1 %v9774_v1  ;;  %v8407_v62 = vpop.f32.mrb[23].mxu1  ;;  %v3398_v45 = vrot.slane %v10893_v37, 1  ;;  %v9484_v52 = vld [vmem:[%s11953_s1 + $0x740] sm:$0xff]   ;;  %v9487_v55 = vld [vmem:[%s11953_s1 + $0x710] sm:$0xff]  }
 0x1aa   : > { %v10921_v51 = vadd.f32 %v1640_v57, %v1529_v53  ;;  %v3516_v32 = vrot.slane %v3514_v17, 1  ;;  %v3528_v48 = vor.u32 %v3527_v41, %v3524_v40  ;;  %v9485_v53 = vld [vmem:[%s11953_s1 + $0x708] sm:$0xff]   ;;  %v9488_v57 = vld [vmem:[%s11953_s1 + $0x750] sm:$0xff]   ;;  %v9491_v62 = vld [vmem:[%s11953_s1 + $0x720] sm:$0xff]  }
 0x1ab   : > { %8661 = vmatpush3.bf16.msra.mxu0 %v9458_v43  ;;  %v9479_v43 = vld [vmem:[%s11953_s1 + $0x6b8] sm:$0xff]   ;;  %v3399_v49 = vsel %vm685_vm2, %v3397_v44, %v3398_v45  ;;  %v9501_v17 = vld [vmem:[%s9918_s28 + $0x1e0] sm:$0xff]   ;;  %v9505_v21 = vld [vmem:[%s11953_s1 + $0x790] sm:$0xff]  }
 0x1ac   : > { %8681 = vmatpush3.bf16.msra.mxu1 %v9459_v60  ;;  %8662 = vmatprep.subr.bf16.mxu0 %v9774_v1  ;;  %v3520_v47 = vor.u32 %v3519_v33, %v3516_v32  ;;  %v9489_v60 = vld [vmem:[%s11953_s1 + $0x718] sm:$0xff]   ;;  %v9510_v32 = vld [vmem:[%s11953_s1 + $0x7e0] sm:$0xff]   ;;  %v9513_v44 = vld [vmem:[%s11953_s1 + $0x7b0] sm:$0xff]  }
 0x1ad   : > { %8682 = vmatprep.subr.bf16.mxu1 %v9774_v1 }
 0x1ae   : > { %v3529_v37 = vsel %vm918_vm3, %v3520_v47, %v3528_v48 }
 0x1af   : > { %8663 = vmatpush3.bf16.msra.mxu0 %v9460_v2  ;;  %v9493_v2 = vld [vmem:[%s11953_s1 + $0x728] sm:$0xff]  }
 0x1b0   : > { %8683 = vmatpush3.bf16.msra.mxu1 %v9461_v59  ;;  %8688 = vmatprep.subr.bf16.mxu0 %v9774_v1 }
 0x1b1   : > { %8708 = vmatprep.subr.bf16.mxu1 %v9774_v1 }
 0x1b2   : > { %8665 = vmatmul.mubr.bf16.vlgmr.msra.gmra.mrb[48].mxu0 %v3167_v6 }
 0x1b3   : > { %8689 = vmatpush3.bf16.msra.mxu0 %v9464_v7  ;;  %8685 = vmatmul.mubr.bf16.vlgmr.msra.gmra.mrb[48].mxu1 %v3283_v58  ;;  %v9495_v58 = vld [vmem:[%s11953_s1 + $0x730] sm:$0xff]  }
 0x1b4   : > { %8709 = vmatpush3.bf16.msra.mxu1 %v9466_v8  ;;  %8690 = vmatprep.subr.bf16.mxu0 %v9774_v1 }
 0x1b5   : > { %8710 = vmatprep.subr.bf16.mxu1 %v9774_v1  ;;  %8704 = vmatprep.mubr.msk.bf16.mxu0 %vm9775_vm0, %v9774_v1 }
 0x1b6   : > { %8724 = vmatprep.mubr.msk.bf16.mxu1 %vm9775_vm0, %v9774_v1 }
 0x1b7   : > { %8691 = vmatpush3.bf16.msra.mxu0 %v9467_v63 }
 0x1b8   : > { %8711 = vmatpush3.bf16.msra.mxu1 %v9468_v0  ;;  %8692 = vmatprep.subr.bf16.mxu0 %v9774_v1 }
 0x1b9   : > { %8712 = vmatprep.subr.bf16.mxu1 %v9774_v1 }
 0x1bb   : > { %8693 = vmatpush3.bf16.msra.mxu0 %v9469_v9 }
 0x1bc   : > { %8713 = vmatpush3.bf16.msra.mxu1 %v9470_v10  ;;  %8694 = vmatprep.subr.bf16.mxu0 %v9774_v1  ;;  %v9496_v10 = vld [vmem:[%s11953_s1 + $0x770] sm:$0xff]  }
 0x1bd   : > { %8714 = vmatprep.subr.bf16.mxu1 %v9774_v1 }
 0x1bf   : > { %8695 = vmatpush3.bf16.msra.mxu0 %v9471_v11 }
 0x1c0   : > { %8715 = vmatpush3.bf16.msra.mxu1 %v9472_v12  ;;  %8696 = vmatprep.subr.bf16.mxu0 %v9774_v1 }
 0x1c1   : > { %8716 = vmatprep.subr.bf16.mxu1 %v9774_v1 }
 0x1c3   : > { %8697 = vmatpush3.bf16.msra.mxu0 %v9473_v13  ;;  %v9497_v13 = vld [vmem:[%s11953_s1 + $0x738] sm:$0xff]  }
 0x1c4   : > { %8717 = vmatpush3.bf16.msra.mxu1 %v9474_v14  ;;  %8698 = vmatprep.subr.bf16.mxu0 %v9774_v1  ;;  %v9498_v14 = vld [vmem:[%s11953_s1 + $0x778] sm:$0xff]  }
 0x1c5   : > { %v1753_v23 = vpop.f32.mrb[24].mxu0  ;;  %8718 = vmatprep.subr.bf16.mxu1 %v9774_v1 }
 0x1c6   : > { %v1760_v24 = vadd.f32 %v1753_v23, %v10911_v54  ;;  %v8426_v25 = vpop.f32.mrb[25].mxu0  ;;  %v1883_v26 = vpop.f32.mrb[24].mxu1  ;;  %v9486_v54 = vld [vmem:[%s11953_s1 + $0x748] sm:$0xff]   ;;  %v9507_v23 = vld [vmem:[%s11953_s1 + $0x798] sm:$0xff]  }
 0x1c7   : > { %v1756_v27 = vpop.f32.mrb[26].mxu0  ;;  %8699 = vmatpush3.bf16.msra.mxu0 %v9475_v16  ;;  %v8446_v28 = vpop.f32.mrb[25].mxu1  ;;  %v9500_v16 = vld [vmem:[%s11953_s1 + $0x780] sm:$0xff]   ;;  %v7200_v25 = vld [vmem:[%s9918_s28 + $0x18] sm:$0xf] }
 0x1c8   : > { %v1761_v34 = vadd.f32 %v1756_v27, %v10921_v51  ;;  %v10997_v35 = vadd.f32 %v1883_v26, %v1760_v24  ;;  %v8427_v36 = vpop.f32.mrb[27].mxu0  ;;  %v1886_v38 = vpop.f32.mrb[26].mxu1  ;;  %8719 = vmatpush3.bf16.msra.mxu1 %v9476_v19  ;;  %8700 = vmatprep.subr.bf16.mxu0 %v9774_v1  ;;  %v9492_v51 = vld [vmem:[%s11953_s1 + $0x760] sm:$0xff]   ;;  %v9503_v19 = vld [vmem:[%s11953_s1 + $0x788] sm:$0xff]   ;;  %v9508_v24 = vld [vmem:[%s11953_s1 + $0x7d8] sm:$0xff]  }
 0x1c9   : > { %8720 = vmatprep.subr.bf16.mxu1 %v9774_v1  ;;  %v8447_v31 = vpop.f32.mrb[27].mxu1  ;;  %v11127_v26 = vld [vmem:[%s9918_s28 + $0x1c] sm:$0xf]  ;;  %v7229_v27 = vld [vmem:[%s9918_s28 + $0x1e0] sm:$0xf] }
 0x1ca   : > { %v1891_v42 = vadd.f32 %v1886_v38, %v1761_v34  ;;  %v11132_v28 = vld [vmem:[%s9918_s28 + $0x1e4] sm:$0xf]  ;;  %v7219_v30 = vcombine.low %v7200_v25, %v11127_v26  ;;  %v9511_v34 = vld [vmem:[%s11953_s1 + $0x7a8] sm:$0xff]  }
 0x1cb   : > { %8701 = vmatpush3.bf16.msra.mxu0 %v9477_v29  ;;  %v9509_v29 = vld [vmem:[%s11953_s1 + $0x7a0] sm:$0xff]   ;;  %v7248_v33 = vcombine.low %v7229_v27, %v11132_v28  ;;  %v9512_v38 = vld [vmem:[%s11953_s1 + $0x7e8] sm:$0xff]  }
 0x1cc   : > { %8721 = vmatpush3.bf16.msra.mxu1 %v9478_v39  ;;  %8702 = vmatprep.subr.bf16.mxu0 %v9774_v1  ;;  %v3893_v36 = vshll.u32 %v7219_v30, 16  ;;  %v11155_v39 = vld [vmem:[%s9918_s28 + $0x1e8] ss:$0 sps:$4 sm:$0x11]   ;;  %v3891_v47 = vshrl.u32 %v7219_v30, 16 }
 0x1cd   : > { %8722 = vmatprep.subr.bf16.mxu1 %v9774_v1  ;;  %v4025_v40 = vshll.u32 %v7248_v33, 16 }
 0x1ce   : > { %v3895_v48 = vrot.slane %v3893_v36, 1 }
 0x1cf   : > { %8703 = vmatpush3.bf16.msra.mxu0 %v9479_v43 }
 0x1d0   : > { %8723 = vmatpush3.bf16.msra.mxu1 %v9480_v46  ;;  %8728 = vmatprep.subr.bf16.mxu0 %v9774_v1 }
 0x1d1   : > { %8748 = vmatprep.subr.bf16.mxu1 %v9774_v1 }
 0x1d2   : > { %8705 = vmatmul.mubr.bf16.vlgmr.msra.gmra.mrb[52].mxu0 %v3399_v49 }
 0x1d3   : > { %8729 = vmatpush3.bf16.msra.mxu0 %v9482_v50  ;;  %8725 = vmatmul.mubr.bf16.vlgmr.msra.gmra.mrb[52].mxu1 %v3529_v37  ;;  %v4023_v50 = vshrl.u32 %v7248_v33, 16  ;;  %v9534_v33 = vld [vmem:[%s11953_s1 + $0x870] sm:$0xff]  }
 0x1d4   : > { %8749 = vmatpush3.bf16.msra.mxu1 %v9484_v52  ;;  %8730 = vmatprep.subr.bf16.mxu0 %v9774_v1 }
 0x1d5   : > { %8750 = vmatprep.subr.bf16.mxu1 %v9774_v1  ;;  %8744 = vmatprep.mubr.msk.bf16.mxu0 %vm9775_vm0, %v9774_v1 }
 0x1d6   : > { %8764 = vmatprep.mubr.msk.bf16.mxu1 %vm9775_vm0, %v9774_v1 }
 0x1d7   : > { %8731 = vmatpush3.bf16.msra.mxu0 %v9485_v53 }
 0x1d8   : > { %8751 = vmatpush3.bf16.msra.mxu1 %v9486_v54  ;;  %8732 = vmatprep.subr.bf16.mxu0 %v9774_v1 }
 0x1d9   : > { %8752 = vmatprep.subr.bf16.mxu1 %v9774_v1 }
 0x1db   : > { %8733 = vmatpush3.bf16.msra.mxu0 %v9487_v55  ;;  %v9514_v55 = vld [vmem:[%s11953_s1 + $0x7f0] sm:$0xff]  }
 0x1dc   : > { %8753 = vmatpush3.bf16.msra.mxu1 %v9488_v57  ;;  %8734 = vmatprep.subr.bf16.mxu0 %v9774_v1  ;;  %v4027_v57 = vrot.slane %v4025_v40, 1 }
 0x1dd   : > { %8754 = vmatprep.subr.bf16.mxu1 %v9774_v1 }
 0x1df   : > { %8735 = vmatpush3.bf16.msra.mxu0 %v9489_v60  ;;  %v4030_v60 = vshll.u32 %v11155_v39, 16 }
 0x1e0   : > { %8755 = vmatpush3.bf16.msra.mxu1 %v9490_v61  ;;  %8736 = vmatprep.subr.bf16.mxu0 %v9774_v1 }
 0x1e1   : > { %8756 = vmatprep.subr.bf16.mxu1 %v9774_v1 }
 0x1e3   : > { %8737 = vmatpush3.bf16.msra.mxu0 %v9491_v62 }
 0x1e4   : > { %8757 = vmatpush3.bf16.msra.mxu1 %v9492_v51  ;;  %8738 = vmatprep.subr.bf16.mxu0 %v9774_v1  ;;  %v9515_v51 = vld [vmem:[%s11953_s1 + $0x7b8] sm:$0xff]  }
 0x1e5   : > { %v2004_v56 = vpop.f32.mrb[28].mxu0  ;;  %8758 = vmatprep.subr.bf16.mxu1 %v9774_v1 }
 0x1e6   : > { %v2011_v59 = vadd.f32 %v2004_v56, %v10997_v35  ;;  %v8466_v4 = vpop.f32.mrb[29].mxu0  ;;  %v2123_v5 = vpop.f32.mrb[28].mxu1  ;;  %v11148_v35 = vld [vmem:[%s9918_s28 + $0x20] ss:$0 sps:$4 sm:$0x11]   ;;  %v9516_v56 = vld [vmem:[%s11953_s1 + $0x7f8] sm:$0xff]  }
 0x1e7   : > { %v2007_v6 = vpop.f32.mrb[30].mxu0  ;;  %8739 = vmatpush3.bf16.msra.mxu0 %v9493_v2  ;;  %v8486_v7 = vpop.f32.mrb[29].mxu1  ;;  %v3898_v49 = vshll.u32 %v11148_v35, 16  ;;  %v3896_v2 = vor.u32 %v3895_v48, %v3891_v47  ;;  %v4032_v4 = vrot.slane %v4030_v60, 1  ;;  %v9543_v47 = vld [vmem:[%s11953_s1 + $0x890] sm:$0xff]  }
 0x1e8   : > { %v2012_v8 = vadd.f32 %v2007_v6, %v1891_v42  ;;  %v11071_v63 = vadd.f32 %v2123_v5, %v2011_v59  ;;  %v8467_v0 = vpop.f32.mrb[31].mxu0  ;;  %v2126_v9 = vpop.f32.mrb[30].mxu1  ;;  %8759 = vmatpush3.bf16.msra.mxu1 %v9494_v3  ;;  %8740 = vmatprep.subr.bf16.mxu0 %v9774_v1  ;;  %v4028_v59 = vor.u32 %v4027_v57, %v4023_v50  ;;  %v9519_v6 = vld [vmem:[%s11953_s1 + $0x800] sm:$0xff]   ;;  %v9544_v48 = vld [vmem:[%s11953_s1 + $0x8d0] sm:$0xff]   ;;  %v9546_v50 = vld [vmem:[%s11953_s1 + $0x8d8] sm:$0xff]  }
 0x1e9   : > { %8760 = vmatprep.subr.bf16.mxu1 %v9774_v1  ;;  %v8487_v11 = vpop.f32.mrb[31].mxu1  ;;  %v3900_v3 = vrot.slane %v3898_v49, 1  ;;  %v9525_v0 = vld [vmem:[%s11953_s1 + $0x810] sm:$0xff]   ;;  %v9545_v49 = vld [vmem:[%s11953_s1 + $0x898] sm:$0xff]  }
 0x1ea   : > { %v11078_v12 = vadd.f32 %v2126_v9, %v2012_v8  ;;  %v4033_v7 = vsel %vm427_vm1, %v4028_v59, %v4032_v4  ;;  %v9523_v8 = vld [vmem:[%s11953_s1 + $0x808] sm:$0xff]   ;;  %v9526_v9 = vld [vmem:[%s11953_s1 + $0x850] sm:$0xff]   ;;  %v9528_v11 = vld [vmem:[%s11953_s1 + $0x858] sm:$0xff]  }
 0x1eb   : > { %8741 = vmatpush3.bf16.msra.mxu0 %v9495_v58  ;;  %v3901_v5 = vsel %vm427_vm1, %v3896_v2, %v3900_v3  ;;  %v9522_v58 = vld [vmem:[%s11953_s1 + $0x840] sm:$0xff]   ;;  %v9551_v59 = vld [vmem:[%s11953_s1 + $0x8b0] sm:$0xff]  }
 0x1ec   : > { %8761 = vmatpush3.bf16.msra.mxu1 %v9496_v10  ;;  %8742 = vmatprep.subr.bf16.mxu0 %v9774_v1  ;;  %v9527_v10 = vld [vmem:[%s11953_s1 + $0x818] sm:$0xff]  }
 0x1ed   : > { %8762 = vmatprep.subr.bf16.mxu1 %v9774_v1 }
 0x1ef   : > { %8743 = vmatpush3.bf16.msra.mxu0 %v9497_v13  ;;  %v9530_v13 = vld [vmem:[%s11953_s1 + $0x860] sm:$0xff]  }
 0x1f0   : > { %8763 = vmatpush3.bf16.msra.mxu1 %v9498_v14  ;;  %8768 = vmatprep.subr.bf16.mxu0 %v9774_v1  ;;  %v9531_v14 = vld [vmem:[%s11953_s1 + $0x828] sm:$0xff]  }
 0x1f1   : > { %8788 = vmatprep.subr.bf16.mxu1 %v9774_v1 }
 0x1f2   : > { %8745 = vmatmul.mubr.bf16.vlgmr.msra.gmra.mrb[56].mxu0 %v9499_v15  ;;  %v9532_v15 = vld [vmem:[%s11953_s1 + $0x868] sm:$0xff]  }
 0x1f3   : > { %8769 = vmatpush3.bf16.msra.mxu0 %v9500_v16  ;;  %8765 = vmatmul.mubr.bf16.vlgmr.msra.gmra.mrb[56].mxu1 %v9501_v17  ;;  %v7258_v16 = vld [vmem:[%s9918_s28 + $0x18] sm:$0xe] }
 0x1f4   : > { %8789 = vmatpush3.bf16.msra.mxu1 %v9502_v18  ;;  %8770 = vmatprep.subr.bf16.mxu0 %v9774_v1  ;;  %v7284_v18 = vld [vmem:[%s9918_s28 + $0x1e0] sm:$0xe]  ;;  %v11243_v25 = vcombine.low %v7258_v16, %v11127_v26 }
 0x1f5   : > { %8790 = vmatprep.subr.bf16.mxu1 %v9774_v1  ;;  %8784 = vmatprep.mubr.msk.bf16.mxu0 %vm9775_vm0, %v9774_v1 }
 0x1f6   : > { %8804 = vmatprep.mubr.msk.bf16.mxu1 %vm9775_vm0, %v9774_v1  ;;  %v4147_v40 = vrot.slane %v11243_v25, 1  ;;  %v4383_v57 = vshll.u32 %v11243_v25, 16 }
 0x1f7   : > { %8771 = vmatpush3.bf16.msra.mxu0 %v9503_v19 }
 0x1f8   : > { %8791 = vmatpush3.bf16.msra.mxu1 %v9504_v20  ;;  %8772 = vmatprep.subr.bf16.mxu0 %v9774_v1 }
 0x1f9   : > { %8792 = vmatprep.subr.bf16.mxu1 %v9774_v1 }
 0x1fb   : > { %8773 = vmatpush3.bf16.msra.mxu0 %v9505_v21 }
 0x1fc   : > { %8793 = vmatpush3.bf16.msra.mxu1 %v9506_v22  ;;  %8774 = vmatprep.subr.bf16.mxu0 %v9774_v1 }
 0x1fd   : > { %8794 = vmatprep.subr.bf16.mxu1 %v9774_v1 }
 0x1ff   : > { %8775 = vmatpush3.bf16.msra.mxu0 %v9507_v23 }
 0x200   : > { %8795 = vmatpush3.bf16.msra.mxu1 %v9508_v24  ;;  %8776 = vmatprep.subr.bf16.mxu0 %v9774_v1  ;;  %v9533_v24 = vld [vmem:[%s11953_s1 + $0x830] sm:$0xff]  }
 0x201   : > { %8796 = vmatprep.subr.bf16.mxu1 %v9774_v1 }
 0x203   : > { %8777 = vmatpush3.bf16.msra.mxu0 %v9509_v29 }
 0x204   : > { %8797 = vmatpush3.bf16.msra.mxu1 %v9510_v32  ;;  %8778 = vmatprep.subr.bf16.mxu0 %v9774_v1 }
 0x205   : > { %v2255_v41 = vpop.f32.mrb[32].mxu0  ;;  %8798 = vmatprep.subr.bf16.mxu1 %v9774_v1 }
 0x206   : > { %v2262_v31 = vadd.f32 %v2255_v41, %v11071_v63  ;;  %v8506_v42 = vpop.f32.mrb[33].mxu0  ;;  %v2387_v43 = vpop.f32.mrb[32].mxu1  ;;  %v9524_v63 = vld [vmem:[%s11953_s1 + $0x848] sm:$0xff]   ;;  %v4148_v41 = vrot.slane %v11148_v35, 1 }
 0x207   : > { %v2258_v45 = vpop.f32.mrb[34].mxu0  ;;  %8779 = vmatpush3.bf16.msra.mxu0 %v9511_v34  ;;  %v8526_v46 = vpop.f32.mrb[33].mxu1  ;;  %v7301_v34 = vcombine.low %v7284_v18, %v11132_v28  ;;  %v9536_v28 = vld [vmem:[%s11953_s1 + $0x878] sm:$0xff]   ;;  %v4264_v42 = vrot.slane %v11155_v39, 1  ;;  %v9541_v39 = vld [vmem:[%s11953_s1 + $0x888] sm:$0xff]  }
 0x208   : > { %v2263_v37 = vadd.f32 %v2258_v45, %v11078_v12  ;;  %v11164_v52 = vadd.f32 %v2387_v43, %v2262_v31  ;;  %v8507_v53 = vpop.f32.mrb[35].mxu0  ;;  %v2390_v54 = vpop.f32.mrb[34].mxu1  ;;  %8799 = vmatpush3.bf16.msra.mxu1 %v9512_v38  ;;  %8780 = vmatprep.subr.bf16.mxu0 %v9774_v1  ;;  %v9529_v12 = vld [vmem:[%s11953_s1 + $0x820] sm:$0xff]   ;;  %v9535_v38 = vld [vmem:[%s11953_s1 + $0x838] sm:$0xff]   ;;  %v4149_v43 = vsel %vm685_vm2, %v4147_v40, %v4148_v41  ;;  %v9542_v46 = vld [vmem:[%s11953_s1 + $0x8c8] sm:$0xff]  }
 0x209   : > { %8800 = vmatprep.subr.bf16.mxu1 %v9774_v1  ;;  %v8527_v61 = vpop.f32.mrb[35].mxu1  ;;  %v4263_v31 = vrot.slane %v7301_v34, 1  ;;  %v9540_v45 = vld [vmem:[%s11953_s1 + $0x8c0] sm:$0xff]   ;;  %v11405_v40 = vld [vmem:[%s9918_s28 + $0x3b0] ss:$0 sps:$4 sm:$0x11]  }
 0x20a   : > { %v11172_v62 = vadd.f32 %v2390_v54, %v2263_v37  ;;  %v9547_v37 = vld [vmem:[%s11953_s1 + $0x8a0] sm:$0xff]   ;;  %v9549_v54 = vld [vmem:[%s11953_s1 + $0x8a8] sm:$0xff]  }
 0x20b   : > { %8781 = vmatpush3.bf16.msra.mxu0 %v9513_v44  ;;  %v9538_v44 = vld [vmem:[%s11953_s1 + $0x880] sm:$0xff]   ;;  %v4265_v35 = vsel %vm685_vm2, %v4263_v31, %v4264_v42 }
 0x20c   : > { %8801 = vmatpush3.bf16.msra.mxu1 %v9514_v55  ;;  %8782 = vmatprep.subr.bf16.mxu0 %v9774_v1  ;;  %v9548_v53 = vld [vmem:[%s11953_s1 + $0x8e0] sm:$0xff]   ;;  %v4380_v55 = vshrl.u32 %v11243_v25, 16  ;;  %v9562_v25 = vld [vmem:[%s11953_s1 + $0x950] sm:$0xff]  }
 0x20d   : > { %8802 = vmatprep.subr.bf16.mxu1 %v9774_v1  ;;  %v9566_v34 = vld [vmem:[%s11953_s1 + $0x960] sm:$0xff]  }
 0x20f   : > { %8783 = vmatpush3.bf16.msra.mxu0 %v9515_v51 }
 0x210   : > { %8803 = vmatpush3.bf16.msra.mxu1 %v9516_v56  ;;  %8808 = vmatprep.subr.bf16.mxu0 %v9774_v1 }
 0x211   : > { %8828 = vmatprep.subr.bf16.mxu1 %v9774_v1 }
 0x212   : > { %8785 = vmatmul.mubr.bf16.vlgmr.msra.gmra.mrb[60].mxu0 %v3901_v5 }
 0x213   : > { %8809 = vmatpush3.bf16.msra.mxu0 %v9519_v6  ;;  %8805 = vmatmul.mubr.bf16.vlgmr.msra.gmra.mrb[60].mxu1 %v4033_v7  ;;  %v4382_v6 = vrot.slane %v4380_v55, 1  ;;  %v4385_v7 = vrot.slane %v4383_v57, 2  ;;  %v9571_v55 = vld [vmem:[%s11953_s1 + $0x938] sm:$0xff]  }
 0x214   : > { %8829 = vmatpush3.bf16.msra.mxu1 %v9522_v58  ;;  %8810 = vmatprep.subr.bf16.mxu0 %v9774_v1  ;;  %v9572_v57 = vld [vmem:[%s11953_s1 + $0x978] sm:$0xff]  }
 0x215   : > { %8830 = vmatprep.subr.bf16.mxu1 %v9774_v1  ;;  %8824 = vmatprep.mubr.msk.bf16.mxu0 %vm9775_vm0, %v9774_v1 }
 0x216   : > { %8844 = vmatprep.mubr.msk.bf16.mxu1 %vm9775_vm0, %v9774_v1 }
 0x217   : > { %8811 = vmatpush3.bf16.msra.mxu0 %v9523_v8 }
 0x218   : > { %8831 = vmatpush3.bf16.msra.mxu1 %v9524_v63  ;;  %8812 = vmatprep.subr.bf16.mxu0 %v9774_v1 }
 0x219   : > { %8832 = vmatprep.subr.bf16.mxu1 %v9774_v1 }
 0x21b   : > { %8813 = vmatpush3.bf16.msra.mxu0 %v9525_v0 }
 0x21c   : > { %8833 = vmatpush3.bf16.msra.mxu1 %v9526_v9  ;;  %8814 = vmatprep.subr.bf16.mxu0 %v9774_v1 }
 0x21d   : > { %8834 = vmatprep.subr.bf16.mxu1 %v9774_v1 }
 0x21f   : > { %8815 = vmatpush3.bf16.msra.mxu0 %v9527_v10 }
 0x220   : > { %8835 = vmatpush3.bf16.msra.mxu1 %v9528_v11  ;;  %8816 = vmatprep.subr.bf16.mxu0 %v9774_v1  ;;  %v9552_v11 = vld [vmem:[%s11953_s1 + $0x8f0] sm:$0xff]  }
 0x221   : > { %8836 = vmatprep.subr.bf16.mxu1 %v9774_v1 }
 0x223   : > { %8817 = vmatpush3.bf16.msra.mxu0 %v9529_v12 }
 0x224   : > { %8837 = vmatpush3.bf16.msra.mxu1 %v9530_v13  ;;  %8818 = vmatprep.subr.bf16.mxu0 %v9774_v1 }
 0x225   : > { %v2503_v17 = vpop.f32.mrb[36].mxu0  ;;  %8838 = vmatprep.subr.bf16.mxu1 %v9774_v1 }
 0x226   : > { %v2510_v19 = vadd.f32 %v2503_v17, %v11164_v52  ;;  %v8546_v20 = vpop.f32.mrb[37].mxu0  ;;  %v2619_v21 = vpop.f32.mrb[36].mxu1  ;;  %v9555_v52 = vld [vmem:[%s9918_s28 + $0x20] ss:$0 sps:$4 sm:$0x33]   ;;  %v9554_v17 = vld [vmem:[%s11953_s1 + $0x8f8] sm:$0xff]  }
 0x227   : > { %v2506_v22 = vpop.f32.mrb[38].mxu0  ;;  %8819 = vmatpush3.bf16.msra.mxu0 %v9531_v14  ;;  %v8566_v23 = vpop.f32.mrb[37].mxu1  ;;  %v4388_v60 = vshrl.u32 %v9555_v52, 16  ;;  %v4391_v61 = vshll.u32 %v9555_v52, 16  ;;  %v9553_v14 = vld [vmem:[%s11953_s1 + $0x8b8] sm:$0xff]   ;;  %v9557_v20 = vld [vmem:[%s9918_s28 + $0x3a8] sm:$0xff]  }
 0x228   : > { %v2511_v27 = vadd.f32 %v2506_v22, %v11172_v62  ;;  %v11246_v29 = vadd.f32 %v2619_v21, %v2510_v19  ;;  %v8547_v30 = vpop.f32.mrb[39].mxu0  ;;  %v2622_v32 = vpop.f32.mrb[38].mxu1  ;;  %8839 = vmatpush3.bf16.msra.mxu1 %v9532_v15  ;;  %8820 = vmatprep.subr.bf16.mxu0 %v9774_v1  ;;  %v9550_v62 = vld [vmem:[%s11953_s1 + $0x8e8] sm:$0xff]   ;;  %v4386_v15 = vor.u32 %v4385_v7, %v4382_v6  ;;  %v9556_v19 = vld [vmem:[%s11953_s1 + $0x900] sm:$0xff]   ;;  %v4762_v52 = vshll.u32 %v11405_v40, 16  ;;  %v9582_v6 = vld [vmem:[%s11953_s1 + $0x998] sm:$0xff]  }
 0x229   : > { %8840 = vmatprep.subr.bf16.mxu1 %v9774_v1  ;;  %v8567_v36 = vpop.f32.mrb[39].mxu1  ;;  %v4390_v58 = vrot.slane %v4388_v60, 1  ;;  %v4393_v8 = vrot.slane %v4391_v61, 2  ;;  %v9558_v21 = vld [vmem:[%s11953_s1 + $0x940] sm:$0xff]   ;;  %v9559_v22 = vld [vmem:[%s11953_s1 + $0x908] sm:$0xff]   ;;  %v9583_v7 = vld [vmem:[%s11953_s1 + $0x9d8] sm:$0xff]  }
 0x22a   : > { %v11254_v26 = vadd.f32 %v2622_v32, %v2511_v27  ;;  %v9560_v23 = vld [vmem:[%s11953_s1 + $0x948] sm:$0xff]   ;;  %v9563_v27 = vld [vmem:[%s11953_s1 + $0x918] sm:$0xff]   ;;  %v4764_v61 = vrot.slane %v4762_v52, 1  ;;  %v9613_v52 = vld [vmem:[%s9918_s28 + $0x3b0] ss:$0 sps:$4 sm:$0x33]  }
 0x22b   : > { %8821 = vmatpush3.bf16.msra.mxu0 %v9533_v24  ;;  %v4394_v16 = vor.u32 %v4393_v8, %v4390_v58  ;;  %v9561_v24 = vld [vmem:[%s11953_s1 + $0x910] sm:$0xff]   ;;  %v7392_v30 = vld [vmem:[%s9918_s28 + $0x3a8] sm:$0xf]  ;;  %v11386_v32 = vld [vmem:[%s9918_s28 + $0x3ac] sm:$0xf] }
 0x22c   : > { %8841 = vmatpush3.bf16.msra.mxu1 %v9534_v33  ;;  %8822 = vmatprep.subr.bf16.mxu0 %v9774_v1  ;;  %v9565_v33 = vld [vmem:[%s11953_s1 + $0x920] sm:$0xff]   ;;  %v7411_v36 = vcombine.low %v7392_v30, %v11386_v32  ;;  %v7421_v58 = vld [vmem:[%s9918_s28 + $0x570] sm:$0xf]  ;;  %v11470_v8 = vld [vmem:[%s9918_s28 + $0x574] sm:$0xf] }
 0x22d   : > { %8842 = vmatprep.subr.bf16.mxu1 %v9774_v1  ;;  %v4395_v18 = vsel %vm918_vm3, %v4386_v15, %v4394_v16  ;;  %v7450_v15 = vld [vmem:[%s9918_s28 + $0x3a8] sm:$0xe] }
 0x22e   : > { %v4757_v41 = vshll.u32 %v7411_v36, 16 }
 0x22f   : > { %8823 = vmatpush3.bf16.msra.mxu0 %v9535_v38  ;;  %v9568_v38 = vld [vmem:[%s11953_s1 + $0x968] sm:$0xff]  }
 0x230   : > { %8843 = vmatpush3.bf16.msra.mxu1 %v9536_v28  ;;  %8848 = vmatprep.subr.bf16.mxu0 %v9774_v1 }
 0x231   : > { %8868 = vmatprep.subr.bf16.mxu1 %v9774_v1 }
 0x232   : > { %8825 = vmatmul.mubr.bf16.vlgmr.msra.gmra.mrb[64].mxu0 %v4149_v43 }
 0x233   : > { %8849 = vmatpush3.bf16.msra.mxu0 %v9538_v44  ;;  %8845 = vmatmul.mubr.bf16.vlgmr.msra.gmra.mrb[64].mxu1 %v4265_v35 }
 0x234   : > { %8869 = vmatpush3.bf16.msra.mxu1 %v9540_v45  ;;  %8850 = vmatprep.subr.bf16.mxu0 %v9774_v1  ;;  %v9569_v45 = vld [vmem:[%s11953_s1 + $0x930] sm:$0xff]  }
 0x235   : > { %8870 = vmatprep.subr.bf16.mxu1 %v9774_v1  ;;  %8864 = vmatprep.mubr.msk.bf16.mxu0 %vm9775_vm0, %v9774_v1 }
 0x236   : > { %8884 = vmatprep.mubr.msk.bf16.mxu1 %vm9775_vm0, %v9774_v1 }
 0x237   : > { %8851 = vmatpush3.bf16.msra.mxu0 %v9541_v39  ;;  %v4755_v39 = vshrl.u32 %v7411_v36, 16 }
 0x238   : > { %8871 = vmatpush3.bf16.msra.mxu1 %v9542_v46  ;;  %8852 = vmatprep.subr.bf16.mxu0 %v9774_v1 }
 0x239   : > { %8872 = vmatprep.subr.bf16.mxu1 %v9774_v1 }
 0x23b   : > { %8853 = vmatpush3.bf16.msra.mxu0 %v9543_v47 }
 0x23c   : > { %8873 = vmatpush3.bf16.msra.mxu1 %v9544_v48  ;;  %8854 = vmatprep.subr.bf16.mxu0 %v9774_v1 }
 0x23d   : > { %8874 = vmatprep.subr.bf16.mxu1 %v9774_v1 }
 0x23f   : > { %8855 = vmatpush3.bf16.msra.mxu0 %v9545_v49 }
 0x240   : > { %8875 = vmatpush3.bf16.msra.mxu1 %v9546_v50  ;;  %8856 = vmatprep.subr.bf16.mxu0 %v9774_v1  ;;  %v9570_v50 = vld [vmem:[%s11953_s1 + $0x970] sm:$0xff]  }
 0x241   : > { %8876 = vmatprep.subr.bf16.mxu1 %v9774_v1 }
 0x243   : > { %8857 = vmatpush3.bf16.msra.mxu0 %v9547_v37  ;;  %v4759_v37 = vrot.slane %v4757_v41, 1 }
 0x244   : > { %8877 = vmatpush3.bf16.msra.mxu1 %v9548_v53  ;;  %8858 = vmatprep.subr.bf16.mxu0 %v9774_v1 }
 0x245   : > { %v2749_v51 = vpop.f32.mrb[40].mxu0  ;;  %8878 = vmatprep.subr.bf16.mxu1 %v9774_v1  ;;  %v4760_v60 = vor.u32 %v4759_v37, %v4755_v39  ;;  %v9598_v39 = vld [vmem:[%s11953_s1 + $0xa48] sm:$0xff]   ;;  %v9604_v37 = vld [vmem:[%s11953_s1 + $0xa60] sm:$0xff]  }
 0x246   : > { %v2756_v2 = vadd.f32 %v2749_v51, %v11246_v29  ;;  %v8586_v3 = vpop.f32.mrb[41].mxu0  ;;  %v2868_v56 = vpop.f32.mrb[40].mxu1  ;;  %v9564_v29 = vld [vmem:[%s11953_s1 + $0x958] sm:$0xff]   ;;  %v9574_v51 = vld [vmem:[%s11953_s1 + $0x980] sm:$0xff]  }
 0x247   : > { %v2752_v4 = vpop.f32.mrb[42].mxu0  ;;  %8859 = vmatpush3.bf16.msra.mxu0 %v9549_v54  ;;  %v8606_v5 = vpop.f32.mrb[41].mxu1  ;;  %v9577_v3 = vld [vmem:[%s11953_s1 + $0x9c0] sm:$0xff]  }
 0x248   : > { %v2757_v63 = vadd.f32 %v2752_v4, %v11254_v26  ;;  %v11329_v0 = vadd.f32 %v2868_v56, %v2756_v2  ;;  %v8587_v9 = vpop.f32.mrb[43].mxu0  ;;  %v2871_v10 = vpop.f32.mrb[42].mxu1  ;;  %8879 = vmatpush3.bf16.msra.mxu1 %v9550_v62  ;;  %8860 = vmatprep.subr.bf16.mxu0 %v9774_v1  ;;  %v9567_v26 = vld [vmem:[%s11953_s1 + $0x928] sm:$0xff]   ;;  %v9573_v62 = vld [vmem:[%s9918_s28 + $0x570] sm:$0xff]   ;;  %v4765_v2 = vsel %vm427_vm1, %v4760_v60, %v4764_v61  ;;  %v5252_v61 = vshrl.u32 %v9613_v52, 16 }
 0x249   : > { %8880 = vmatprep.subr.bf16.mxu1 %v9774_v1  ;;  %v8607_v12 = vpop.f32.mrb[43].mxu1  ;;  %v9578_v56 = vld [vmem:[%s11953_s1 + $0x988] sm:$0xff]   ;;  %v9580_v4 = vld [vmem:[%s11953_s1 + $0x990] sm:$0xff]   ;;  %v9585_v9 = vld [vmem:[%s11953_s1 + $0x9e0] sm:$0xff]  }
 0x24a   : > { %v11336_v13 = vadd.f32 %v2871_v10, %v2757_v63  ;;  %v9581_v5 = vld [vmem:[%s11953_s1 + $0x9d0] sm:$0xff]   ;;  %v9584_v63 = vld [vmem:[%s11953_s1 + $0x9a0] sm:$0xff]   ;;  %v9586_v10 = vld [vmem:[%s11953_s1 + $0x9a8] sm:$0xff]  }
 0x24b   : > { %8861 = vmatpush3.bf16.msra.mxu0 %v9551_v59  ;;  %v9579_v59 = vld [vmem:[%s11953_s1 + $0x9c8] sm:$0xff]   ;;  %v7476_v60 = vld [vmem:[%s9918_s28 + $0x570] sm:$0xe] }
 0x24c   : > { %8881 = vmatpush3.bf16.msra.mxu1 %v9552_v11  ;;  %8862 = vmatprep.subr.bf16.mxu0 %v9774_v1  ;;  %v11486_v11 = vld [vmem:[%s9918_s28 + $0x578] ss:$0 sps:$4 sm:$0x11]  }
 0x24d   : > { %8882 = vmatprep.subr.bf16.mxu1 %v9774_v1 }
 0x24f   : > { %8863 = vmatpush3.bf16.msra.mxu0 %v9553_v14 }
 0x250   : > { %8883 = vmatpush3.bf16.msra.mxu1 %v9554_v17  ;;  %8888 = vmatprep.subr.bf16.mxu0 %v9774_v1 }
 0x251   : > { %8908 = vmatprep.subr.bf16.mxu1 %v9774_v1 }
 0x252   : > { %8865 = vmatmul.mubr.bf16.vlgmr.msra.gmra.mrb[68].mxu0 %v4395_v18 }
 0x253   : > { %8889 = vmatpush3.bf16.msra.mxu0 %v9556_v19  ;;  %8885 = vmatmul.mubr.bf16.vlgmr.msra.gmra.mrb[68].mxu1 %v9557_v20 }
 0x254   : > { %8909 = vmatpush3.bf16.msra.mxu1 %v9558_v21  ;;  %8890 = vmatprep.subr.bf16.mxu0 %v9774_v1  ;;  %v9588_v21 = vld [vmem:[%s11953_s1 + $0x9b0] sm:$0xff]  }
 0x255   : > { %8910 = vmatprep.subr.bf16.mxu1 %v9774_v1  ;;  %8904 = vmatprep.mubr.msk.bf16.mxu0 %vm9775_vm0, %v9774_v1 }
 0x256   : > { %8924 = vmatprep.mubr.msk.bf16.mxu1 %vm9775_vm0, %v9774_v1 }
 0x257   : > { %8891 = vmatpush3.bf16.msra.mxu0 %v9559_v22 }
 0x258   : > { %8911 = vmatpush3.bf16.msra.mxu1 %v9560_v23  ;;  %8892 = vmatprep.subr.bf16.mxu0 %v9774_v1 }
 0x259   : > { %8912 = vmatprep.subr.bf16.mxu1 %v9774_v1 }
 0x25b   : > { %8893 = vmatpush3.bf16.msra.mxu0 %v9561_v24  ;;  %v4894_v24 = vshll.u32 %v11486_v11, 16 }
 0x25c   : > { %8913 = vmatpush3.bf16.msra.mxu1 %v9562_v25  ;;  %8894 = vmatprep.subr.bf16.mxu0 %v9774_v1 }
 0x25d   : > { %8914 = vmatprep.subr.bf16.mxu1 %v9774_v1 }
 0x25f   : > { %8895 = vmatpush3.bf16.msra.mxu0 %v9563_v27 }
 0x260   : > { %8915 = vmatpush3.bf16.msra.mxu1 %v9564_v29  ;;  %8896 = vmatprep.subr.bf16.mxu0 %v9774_v1 }
 0x261   : > { %8916 = vmatprep.subr.bf16.mxu1 %v9774_v1 }
 0x263   : > { %8897 = vmatpush3.bf16.msra.mxu0 %v9565_v33  ;;  %v9589_v33 = vld [vmem:[%s11953_s1 + $0x9f0] sm:$0xff]  }
 0x264   : > { %8917 = vmatpush3.bf16.msra.mxu1 %v9566_v34  ;;  %8898 = vmatprep.subr.bf16.mxu0 %v9774_v1  ;;  %v11507_v34 = vcombine.low %v7450_v15, %v11386_v32  ;;  %v9591_v32 = vld [vmem:[%s11953_s1 + $0x9f8] sm:$0xff]  }
 0x265   : > { %v2987_v28 = vpop.f32.mrb[44].mxu0  ;;  %8918 = vmatprep.subr.bf16.mxu1 %v9774_v1 }
 0x266   : > { %v2994_v31 = vadd.f32 %v2987_v28, %v11329_v0  ;;  %v8626_v42 = vpop.f32.mrb[45].mxu0  ;;  %v3119_v43 = vpop.f32.mrb[44].mxu1  ;;  %v7440_v0 = vcombine.low %v7421_v58, %v11470_v8  ;;  %v4896_v28 = vrot.slane %v4894_v24, 1  ;;  %v9614_v24 = vld [vmem:[%s11953_s1 + $0xac0] sm:$0xff]  }
 0x267   : > { %v2990_v44 = vpop.f32.mrb[46].mxu0  ;;  %8899 = vmatpush3.bf16.msra.mxu0 %v9567_v26  ;;  %v8646_v35 = vpop.f32.mrb[45].mxu1  ;;  %v5012_v42 = vrot.slane %v11405_v40, 1  ;;  %v9597_v40 = vld [vmem:[%s11953_s1 + $0xa08] sm:$0xff]  }
 0x268   : > { %v2995_v46 = vadd.f32 %v2990_v44, %v11336_v13  ;;  %v11413_v47 = vadd.f32 %v3119_v43, %v2994_v31  ;;  %v8627_v48 = vpop.f32.mrb[47].mxu0  ;;  %v3122_v49 = vpop.f32.mrb[46].mxu1  ;;  %8919 = vmatpush3.bf16.msra.mxu1 %v9568_v38  ;;  %8900 = vmatprep.subr.bf16.mxu0 %v9774_v1  ;;  %v4889_v12 = vshll.u32 %v7440_v0, 16  ;;  %v9587_v13 = vld [vmem:[%s11953_s1 + $0x9e8] sm:$0xff]   ;;  %v4887_v22 = vshrl.u32 %v7440_v0, 16  ;;  %v9590_v38 = vld [vmem:[%s11953_s1 + $0x9b8] sm:$0xff]  }
 0x269   : > { %8920 = vmatprep.subr.bf16.mxu1 %v9774_v1  ;;  %v8647_v53 = vpop.f32.mrb[47].mxu1  ;;  %v5011_v31 = vrot.slane %v11507_v34, 1  ;;  %v9594_v44 = vld [vmem:[%s11953_s1 + $0xa00] sm:$0xff]   ;;  %v9601_v48 = vld [vmem:[%s11953_s1 + $0xa18] sm:$0xff]  }
 0x26a   : > { %v11421_v54 = vadd.f32 %v3122_v49, %v2995_v46  ;;  %v4891_v23 = vrot.slane %v4889_v12, 1  ;;  %v9599_v46 = vld [vmem:[%s11953_s1 + $0xa10] sm:$0xff]   ;;  %v9602_v49 = vld [vmem:[%s11953_s1 + $0xa58] sm:$0xff]   ;;  %v9605_v53 = vld [vmem:[%s11953_s1 + $0xa28] sm:$0xff]  }
 0x26b   : > { %8901 = vmatpush3.bf16.msra.mxu0 %v9569_v45  ;;  %v5013_v35 = vsel %vm685_vm2, %v5011_v31, %v5012_v42  ;;  %v9596_v45 = vld [vmem:[%s11953_s1 + $0xa40] sm:$0xff]   ;;  %v9608_v12 = vld [vmem:[%s11953_s1 + $0xa70] sm:$0xff]  }
 0x26c   : > { %8921 = vmatpush3.bf16.msra.mxu1 %v9570_v50  ;;  %8902 = vmatprep.subr.bf16.mxu0 %v9774_v1  ;;  %v4892_v41 = vor.u32 %v4891_v23, %v4887_v22  ;;  %v9603_v50 = vld [vmem:[%s11953_s1 + $0xa20] sm:$0xff]  }
 0x26d   : > { %8922 = vmatprep.subr.bf16.mxu1 %v9774_v1  ;;  %v9612_v23 = vld [vmem:[%s11953_s1 + $0xa80] sm:$0xff]  }
 0x26e   : > { %v4897_v43 = vsel %vm427_vm1, %v4892_v41, %v4896_v28  ;;  %v9624_v41 = vld [vmem:[%s11953_s1 + $0xae8] sm:$0xff]  }
 0x26f   : > { %8903 = vmatpush3.bf16.msra.mxu0 %v9571_v55  ;;  %v5247_v55 = vshll.u32 %v11507_v34, 16 }
 0x270   : > { %8923 = vmatpush3.bf16.msra.mxu1 %v9572_v57  ;;  %8928 = vmatprep.subr.bf16.mxu0 %v9774_v1  ;;  %v9606_v57 = vld [vmem:[%s11953_s1 + $0xa68] sm:$0xff]  }
 0x271   : > { %8948 = vmatprep.subr.bf16.mxu1 %v9774_v1  ;;  %v5249_v58 = vrot.slane %v5247_v55, 2  ;;  %v9632_v55 = vld [vmem:[%s11953_s1 + $0xb40] sm:$0xff]  }
 0x272   : > { %8905 = vmatmul.mubr.bf16.vlgmr.msra.gmra.mrb[72].mxu0 %v9573_v62  ;;  %v5255_v62 = vshll.u32 %v9613_v52, 16  ;;  %v9629_v52 = vld [vmem:[%s9918_s28 + $0x24] sm:$0xff]  }
 0x273   : > { %8929 = vmatpush3.bf16.msra.mxu0 %v9574_v51  ;;  %8925 = vmatmul.mubr.bf16.vlgmr.msra.gmra.mrb[72].mxu1 %v4765_v2 }
 0x274   : > { %8949 = vmatpush3.bf16.msra.mxu1 %v9577_v3  ;;  %8930 = vmatprep.subr.bf16.mxu0 %v9774_v1 }
 0x275   : > { %8950 = vmatprep.subr.bf16.mxu1 %v9774_v1  ;;  %8944 = vmatprep.mubr.msk.bf16.mxu0 %vm9775_vm0, %v9774_v1 }
 0x276   : > { %8964 = vmatprep.mubr.msk.bf16.mxu1 %vm9775_vm0, %v9774_v1 }
 0x277   : > { %8931 = vmatpush3.bf16.msra.mxu0 %v9578_v56 }
 0x278   : > { %8951 = vmatpush3.bf16.msra.mxu1 %v9579_v59  ;;  %8932 = vmatprep.subr.bf16.mxu0 %v9774_v1 }
 0x279   : > { %8952 = vmatprep.subr.bf16.mxu1 %v9774_v1 }
 0x27b   : > { %8933 = vmatpush3.bf16.msra.mxu0 %v9580_v4 }
 0x27c   : > { %8953 = vmatpush3.bf16.msra.mxu1 %v9581_v5  ;;  %8934 = vmatprep.subr.bf16.mxu0 %v9774_v1  ;;  %v9607_v5 = vld [vmem:[%s11953_s1 + $0xa30] sm:$0xff]  }
 0x27d   : > { %8954 = vmatprep.subr.bf16.mxu1 %v9774_v1 }
 0x27f   : > { %8935 = vmatpush3.bf16.msra.mxu0 %v9582_v6  ;;  %v7493_v6 = vcombine.low %v7476_v60, %v11470_v8  ;;  %v9634_v60 = vld [vmem:[%s11953_s1 + $0xb48] sm:$0xff]  }
 0x280   : > { %8955 = vmatpush3.bf16.msra.mxu1 %v9583_v7  ;;  %8936 = vmatprep.subr.bf16.mxu0 %v9774_v1 }
 0x281   : > { %8956 = vmatprep.subr.bf16.mxu1 %v9774_v1 }
 0x283   : > { %8937 = vmatpush3.bf16.msra.mxu0 %v9584_v63 }
 0x284   : > { %8957 = vmatpush3.bf16.msra.mxu1 %v9585_v9  ;;  %8938 = vmatprep.subr.bf16.mxu0 %v9774_v1 }
 0x285   : > { %v3251_v14 = vpop.f32.mrb[48].mxu0  ;;  %8958 = vmatprep.subr.bf16.mxu1 %v9774_v1 }
 0x286   : > { %v3258_v16 = vadd.f32 %v3251_v14, %v11413_v47  ;;  %v8666_v17 = vpop.f32.mrb[49].mxu0  ;;  %v3367_v18 = vpop.f32.mrb[48].mxu1  ;;  %v9600_v47 = vld [vmem:[%s11953_s1 + $0xa50] sm:$0xff]   ;;  %v5257_v14 = vrot.slane %v5255_v62, 2 }
 0x287   : > { %v3254_v19 = vpop.f32.mrb[50].mxu0  ;;  %8939 = vmatpush3.bf16.msra.mxu0 %v9586_v10  ;;  %v8686_v20 = vpop.f32.mrb[49].mxu1  ;;  %v5127_v17 = vrot.slane %v7493_v6, 1  ;;  %v9636_v62 = vld [vmem:[%s11953_s1 + $0xb50] sm:$0xff]  }
 0x288   : > { %v3259_v25 = vadd.f32 %v3254_v19, %v11421_v54  ;;  %v11500_v27 = vadd.f32 %v3367_v18, %v3258_v16  ;;  %v8667_v29 = vpop.f32.mrb[51].mxu0  ;;  %v3370_v30 = vpop.f32.mrb[50].mxu1  ;;  %8959 = vmatpush3.bf16.msra.mxu1 %v9587_v13  ;;  %8940 = vmatprep.subr.bf16.mxu0 %v9774_v1  ;;  %v5244_v54 = vshrl.u32 %v11507_v34, 16  ;;  %v5254_v13 = vrot.slane %v5252_v61, 1  ;;  %v9609_v16 = vld [vmem:[%s11953_s1 + $0xa38] sm:$0xff]   ;;  %v9635_v61 = vld [vmem:[%s11953_s1 + $0xb10] sm:$0xff]  }
 0x289   : > { %8960 = vmatprep.subr.bf16.mxu1 %v9774_v1  ;;  %v8687_v36 = vpop.f32.mrb[51].mxu1  ;;  %v5128_v18 = vrot.slane %v11486_v11, 1  ;;  %v9610_v19 = vld [vmem:[%s11953_s1 + $0xa78] sm:$0xff]   ;;  %v9617_v29 = vld [vmem:[%s11953_s1 + $0xa90] sm:$0xff]  }
 0x28a   : > { %v11510_v26 = vadd.f32 %v3370_v30, %v3259_v25  ;;  %v5246_v7 = vrot.slane %v5244_v54, 1  ;;  %v9615_v25 = vld [vmem:[%s11953_s1 + $0xa88] sm:$0xff]   ;;  %v9618_v30 = vld [vmem:[%s11953_s1 + $0xad0] sm:$0xff]   ;;  %v9620_v34 = vld [vmem:[%s11953_s1 + $0xad8] sm:$0xff]  }
 0x28b   : > { %8941 = vmatpush3.bf16.msra.mxu0 %v9588_v21  ;;  %v5258_v21 = vor.u32 %v5257_v14, %v5254_v13  ;;  %v5129_v22 = vsel %vm685_vm2, %v5127_v17, %v5128_v18  ;;  %v9621_v36 = vld [vmem:[%s11953_s1 + $0xaa0] sm:$0xff]   ;;  %v9631_v54 = vld [vmem:[%s9918_s28 + $0x1ec] sm:$0xff]  }
 0x28c   : > { %8961 = vmatpush3.bf16.msra.mxu1 %v9589_v33  ;;  %8942 = vmatprep.subr.bf16.mxu0 %v9774_v1  ;;  %v5250_v20 = vor.u32 %v5249_v58, %v5246_v7  ;;  %v9619_v33 = vld [vmem:[%s11953_s1 + $0xa98] sm:$0xff]   ;;  %v9640_v7 = vld [vmem:[%s11953_s1 + $0xb60] sm:$0xff]   ;;  %v9643_v17 = vld [vmem:[%s11953_s1 + $0xb30] sm:$0xff]  }
 0x28d   : > { %8962 = vmatprep.subr.bf16.mxu1 %v9774_v1 }
 0x28e   : > { %v5259_v11 = vsel %vm918_vm3, %v5250_v20, %v5258_v21 }
 0x28f   : > { %8943 = vmatpush3.bf16.msra.mxu0 %v9590_v38  ;;  %v9623_v38 = vld [vmem:[%s11953_s1 + $0xaa8] sm:$0xff]  }
 0x290   : > { %8963 = vmatpush3.bf16.msra.mxu1 %v9591_v32  ;;  %8968 = vmatprep.subr.bf16.mxu0 %v9774_v1 }
 0x291   : > { %8988 = vmatprep.subr.bf16.mxu1 %v9774_v1 }
 0x292   : > { %8945 = vmatmul.mubr.bf16.vlgmr.msra.gmra.mrb[76].mxu0 %v4897_v43 }
 0x293   : > { %8969 = vmatpush3.bf16.msra.mxu0 %v9594_v44  ;;  %8965 = vmatmul.mubr.bf16.vlgmr.msra.gmra.mrb[76].mxu1 %v5013_v35  ;;  %v9625_v35 = vld [vmem:[%s11953_s1 + $0xab0] sm:$0xff]  }
 0x294   : > { %8989 = vmatpush3.bf16.msra.mxu1 %v9596_v45  ;;  %8970 = vmatprep.subr.bf16.mxu0 %v9774_v1 }
 0x295   : > { %8990 = vmatprep.subr.bf16.mxu1 %v9774_v1  ;;  %8984 = vmatprep.mubr.msk.bf16.mxu0 %vm9775_vm0, %v9774_v1 }
 0x296   : > { %9004 = vmatprep.mubr.msk.bf16.mxu1 %vm9775_vm0, %v9774_v1 }
 0x297   : > { %8971 = vmatpush3.bf16.msra.mxu0 %v9597_v40 }
 0x298   : > { %8991 = vmatpush3.bf16.msra.mxu1 %v9598_v39  ;;  %8972 = vmatprep.subr.bf16.mxu0 %v9774_v1 }
 0x299   : > { %8992 = vmatprep.subr.bf16.mxu1 %v9774_v1 }
 0x29b   : > { %8973 = vmatpush3.bf16.msra.mxu0 %v9599_v46 }
 0x29c   : > { %8993 = vmatpush3.bf16.msra.mxu1 %v9600_v47  ;;  %8974 = vmatprep.subr.bf16.mxu0 %v9774_v1  ;;  %v9626_v47 = vld [vmem:[%s11953_s1 + $0xaf0] sm:$0xff]  }
 0x29d   : > { %8994 = vmatprep.subr.bf16.mxu1 %v9774_v1 }
 0x29f   : > { %8975 = vmatpush3.bf16.msra.mxu0 %v9601_v48 }
 0x2a0   : > { %8995 = vmatpush3.bf16.msra.mxu1 %v9602_v49  ;;  %8976 = vmatprep.subr.bf16.mxu0 %v9774_v1 }
 0x2a1   : > { %8996 = vmatprep.subr.bf16.mxu1 %v9774_v1 }
 0x2a3   : > { %8977 = vmatpush3.bf16.msra.mxu0 %v9603_v50  ;;  %v9627_v50 = vld [vmem:[%s11953_s1 + $0xab8] sm:$0xff]  }
 0x2a4   : > { %8997 = vmatpush3.bf16.msra.mxu1 %v9604_v37  ;;  %8978 = vmatprep.subr.bf16.mxu0 %v9774_v1  ;;  %v9628_v37 = vld [vmem:[%s11953_s1 + $0xaf8] sm:$0xff]  }
 0x2a5   : > { %v3483_v51 = vpop.f32.mrb[52].mxu0  ;;  %8998 = vmatprep.subr.bf16.mxu1 %v9774_v1 }
 0x2a6   : > { %v3490_v2 = vadd.f32 %v3483_v51, %v11500_v27  ;;  %v8706_v3 = vpop.f32.mrb[53].mxu0  ;;  %v3613_v56 = vpop.f32.mrb[52].mxu1  ;;  %v9616_v27 = vld [vmem:[%s11953_s1 + $0xac8] sm:$0xff]   ;;  %v9637_v51 = vld [vmem:[%s11953_s1 + $0xb18] sm:$0xff]  }
 0x2a7   : > { %v3486_v59 = vpop.f32.mrb[54].mxu0  ;;  %8979 = vmatpush3.bf16.msra.mxu0 %v9605_v53  ;;  %v8726_v4 = vpop.f32.mrb[53].mxu1  ;;  %v9630_v53 = vld [vmem:[%s11953_s1 + $0xb00] sm:$0xff]  }
 0x2a8   : > { %v3491_v63 = vadd.f32 %v3486_v59, %v11510_v26  ;;  %v11586_v0 = vadd.f32 %v3613_v56, %v3490_v2  ;;  %v8707_v9 = vpop.f32.mrb[55].mxu0  ;;  %v3616_v10 = vpop.f32.mrb[54].mxu1  ;;  %8999 = vmatpush3.bf16.msra.mxu1 %v9606_v57  ;;  %8980 = vmatprep.subr.bf16.mxu0 %v9774_v1  ;;  %v9622_v26 = vld [vmem:[%s11953_s1 + $0xae0] sm:$0xff]   ;;  %v9633_v57 = vld [vmem:[%s11953_s1 + $0xb08] sm:$0xff]   ;;  %v9638_v2 = vld [vmem:[%s11953_s1 + $0xb58] sm:$0xff]  }
 0x2a9   : > { %9000 = vmatprep.subr.bf16.mxu1 %v9774_v1  ;;  %v8727_v8 = vpop.f32.mrb[55].mxu1  ;;  %v7584_v3 = vld [vmem:[%s9918_s28 + $0x24] sm:$0xf]  ;;  %v11716_v56 = vld [vmem:[%s9918_s28 + $0x28] sm:$0xf] }
 0x2aa   : > { %v3621_v15 = vadd.f32 %v3616_v10, %v3491_v63  ;;  %v7613_v59 = vld [vmem:[%s9918_s28 + $0x1ec] sm:$0xf]  ;;  %v11721_v4 = vld [vmem:[%s9918_s28 + $0x1f0] sm:$0xf]  ;;  %v7603_v6 = vcombine.low %v7584_v3, %v11716_v56 }
 0x2ab   : > { %8981 = vmatpush3.bf16.msra.mxu0 %v9607_v5  ;;  %v9639_v5 = vld [vmem:[%s11953_s1 + $0xb20] sm:$0xff]   ;;  %v7632_v58 = vcombine.low %v7613_v59, %v11721_v4  ;;  %v9641_v63 = vld [vmem:[%s11953_s1 + $0xb28] sm:$0xff]  }
 0x2ac   : > { %9001 = vmatpush3.bf16.msra.mxu1 %v9608_v12  ;;  %8982 = vmatprep.subr.bf16.mxu0 %v9774_v1  ;;  %v5623_v9 = vshll.u32 %v7603_v6, 16  ;;  %v9642_v10 = vld [vmem:[%s11953_s1 + $0xb68] sm:$0xff]   ;;  %v11744_v12 = vld [vmem:[%s9918_s28 + $0x1f4] ss:$0 sps:$4 sm:$0x11]   ;;  %v5621_v20 = vshrl.u32 %v7603_v6, 16 }
 0x2ad   : > { %9002 = vmatprep.subr.bf16.mxu1 %v9774_v1  ;;  %v5755_v13 = vshll.u32 %v7632_v58, 16 }
 0x2ae   : > { %v5625_v21 = vrot.slane %v5623_v9, 1 }
 0x2af   : > { %8983 = vmatpush3.bf16.msra.mxu0 %v9609_v16 }
 0x2b0   : > { %9003 = vmatpush3.bf16.msra.mxu1 %v9610_v19  ;;  %9008 = vmatprep.subr.bf16.mxu0 %v9774_v1 }
 0x2b1   : > { %9028 = vmatprep.subr.bf16.mxu1 %v9774_v1 }
 0x2b2   : > { %8985 = vmatmul.mubr.bf16.vlgmr.msra.gmra.mrb[80].mxu0 %v5129_v22 }
 0x2b3   : > { %9009 = vmatpush3.bf16.msra.mxu0 %v9612_v23  ;;  %9005 = vmatmul.mubr.bf16.vlgmr.msra.gmra.mrb[80].mxu1 %v5259_v11  ;;  %v5753_v23 = vshrl.u32 %v7632_v58, 16  ;;  %v9664_v58 = vld [vmem:[%s11953_s1 + $0xbf0] sm:$0xff]  }
 0x2b4   : > { %9029 = vmatpush3.bf16.msra.mxu1 %v9614_v24  ;;  %9010 = vmatprep.subr.bf16.mxu0 %v9774_v1 }
 0x2b5   : > { %9030 = vmatprep.subr.bf16.mxu1 %v9774_v1  ;;  %9024 = vmatprep.mubr.msk.bf16.mxu0 %vm9775_vm0, %v9774_v1 }
 0x2b6   : > { %9044 = vmatprep.mubr.msk.bf16.mxu1 %vm9775_vm0, %v9774_v1 }
 0x2b7   : > { %9011 = vmatpush3.bf16.msra.mxu0 %v9615_v25 }
 0x2b8   : > { %9031 = vmatpush3.bf16.msra.mxu1 %v9616_v27  ;;  %9012 = vmatprep.subr.bf16.mxu0 %v9774_v1 }
 0x2b9   : > { %9032 = vmatprep.subr.bf16.mxu1 %v9774_v1 }
 0x2bb   : > { %9013 = vmatpush3.bf16.msra.mxu0 %v9617_v29  ;;  %v9644_v29 = vld [vmem:[%s11953_s1 + $0xb70] sm:$0xff]  }
 0x2bc   : > { %9033 = vmatpush3.bf16.msra.mxu1 %v9618_v30  ;;  %9014 = vmatprep.subr.bf16.mxu0 %v9774_v1  ;;  %v5757_v30 = vrot.slane %v5755_v13, 1 }
 0x2bd   : > { %9034 = vmatprep.subr.bf16.mxu1 %v9774_v1 }
 0x2bf   : > { %9015 = vmatpush3.bf16.msra.mxu0 %v9619_v33  ;;  %v5760_v33 = vshll.u32 %v11744_v12, 16 }
 0x2c0   : > { %9035 = vmatpush3.bf16.msra.mxu1 %v9620_v34  ;;  %9016 = vmatprep.subr.bf16.mxu0 %v9774_v1 }
 0x2c1   : > { %9036 = vmatprep.subr.bf16.mxu1 %v9774_v1 }
 0x2c3   : > { %9017 = vmatpush3.bf16.msra.mxu0 %v9621_v36 }
 0x2c4   : > { %9037 = vmatpush3.bf16.msra.mxu1 %v9622_v26  ;;  %9018 = vmatprep.subr.bf16.mxu0 %v9774_v1  ;;  %v9645_v26 = vld [vmem:[%s11953_s1 + $0xb38] sm:$0xff]  }
 0x2c5   : > { %v3734_v28 = vpop.f32.mrb[56].mxu0  ;;  %9038 = vmatprep.subr.bf16.mxu1 %v9774_v1 }
 0x2c6   : > { %v3741_v32 = vadd.f32 %v3734_v28, %v11586_v0  ;;  %v8746_v31 = vpop.f32.mrb[57].mxu0  ;;  %v3853_v42 = vpop.f32.mrb[56].mxu1  ;;  %v11737_v0 = vld [vmem:[%s9918_s28 + $0x2c] ss:$0 sps:$4 sm:$0x11]   ;;  %v9646_v28 = vld [vmem:[%s11953_s1 + $0xb78] sm:$0xff]  }
 0x2c7   : > { %v3737_v43 = vpop.f32.mrb[58].mxu0  ;;  %9019 = vmatpush3.bf16.msra.mxu0 %v9623_v38  ;;  %v8766_v44 = vpop.f32.mrb[57].mxu1  ;;  %v5628_v22 = vshll.u32 %v11737_v0, 16  ;;  %v5626_v38 = vor.u32 %v5625_v21, %v5621_v20  ;;  %v5762_v31 = vrot.slane %v5760_v33, 1  ;;  %v9673_v20 = vld [vmem:[%s11953_s1 + $0xc20] sm:$0xff]  }
 0x2c8   : > { %v3742_v45 = vadd.f32 %v3737_v43, %v3621_v15  ;;  %v11660_v40 = vadd.f32 %v3853_v42, %v3741_v32  ;;  %v8747_v39 = vpop.f32.mrb[59].mxu0  ;;  %v3856_v46 = vpop.f32.mrb[58].mxu1  ;;  %9039 = vmatpush3.bf16.msra.mxu1 %v9624_v41  ;;  %9020 = vmatprep.subr.bf16.mxu0 %v9774_v1  ;;  %v5758_v32 = vor.u32 %v5757_v30, %v5753_v23  ;;  %v9649_v43 = vld [vmem:[%s11953_s1 + $0xb80] sm:$0xff]   ;;  %v9677_v21 = vld [vmem:[%s9918_s28 + $0x2c] ss:$0 sps:$4 sm:$0x33]  }
 0x2c9   : > { %9040 = vmatprep.subr.bf16.mxu1 %v9774_v1  ;;  %v8767_v48 = vpop.f32.mrb[59].mxu1  ;;  %v5630_v41 = vrot.slane %v5628_v22, 1  ;;  %v9655_v39 = vld [vmem:[%s11953_s1 + $0xb90] sm:$0xff]   ;;  %v9674_v22 = vld [vmem:[%s11953_s1 + $0xc28] sm:$0xff]  }
 0x2ca   : > { %v11667_v49 = vadd.f32 %v3856_v46, %v3742_v45  ;;  %v5763_v44 = vsel %vm427_vm1, %v5758_v32, %v5762_v31  ;;  %v9653_v45 = vld [vmem:[%s11953_s1 + $0xb88] sm:$0xff]   ;;  %v9656_v46 = vld [vmem:[%s11953_s1 + $0xbd0] sm:$0xff]   ;;  %v9658_v48 = vld [vmem:[%s11953_s1 + $0xbd8] sm:$0xff]  }
 0x2cb   : > { %9021 = vmatpush3.bf16.msra.mxu0 %v9625_v35  ;;  %v5631_v42 = vsel %vm427_vm1, %v5626_v38, %v5630_v41  ;;  %v9652_v35 = vld [vmem:[%s11953_s1 + $0xbc0] sm:$0xff]  }
 0x2cc   : > { %9041 = vmatpush3.bf16.msra.mxu1 %v9626_v47  ;;  %9022 = vmatprep.subr.bf16.mxu0 %v9774_v1  ;;  %v9657_v47 = vld [vmem:[%s11953_s1 + $0xb98] sm:$0xff]  }
 0x2cd   : > { %9042 = vmatprep.subr.bf16.mxu1 %v9774_v1 }
 0x2cf   : > { %9023 = vmatpush3.bf16.msra.mxu0 %v9627_v50  ;;  %v9660_v50 = vld [vmem:[%s11953_s1 + $0xbe0] sm:$0xff]  }
 0x2d0   : > { %9043 = vmatpush3.bf16.msra.mxu1 %v9628_v37  ;;  %9048 = vmatprep.subr.bf16.mxu0 %v9774_v1  ;;  %v9661_v37 = vld [vmem:[%s11953_s1 + $0xba8] sm:$0xff]  }
 0x2d1   : > { %9068 = vmatprep.subr.bf16.mxu1 %v9774_v1 }
 0x2d2   : > { %9025 = vmatmul.mubr.bf16.vlgmr.msra.gmra.mrb[84].mxu0 %v9629_v52  ;;  %v9662_v52 = vld [vmem:[%s11953_s1 + $0xbe8] sm:$0xff]  }
 0x2d3   : > { %9049 = vmatpush3.bf16.msra.mxu0 %v9630_v53  ;;  %9045 = vmatmul.mubr.bf16.vlgmr.msra.gmra.mrb[84].mxu1 %v9631_v54  ;;  %v7642_v53 = vld [vmem:[%s9918_s28 + $0x24] sm:$0xe] }
 0x2d4   : > { %9069 = vmatpush3.bf16.msra.mxu1 %v9632_v55  ;;  %9050 = vmatprep.subr.bf16.mxu0 %v9774_v1  ;;  %v7668_v55 = vld [vmem:[%s9918_s28 + $0x1ec] sm:$0xe]  ;;  %v7659_v3 = vcombine.low %v7642_v53, %v11716_v56  ;;  %v9665_v56 = vld [vmem:[%s11953_s1 + $0xbb8] sm:$0xff]   ;;  %s9678_s28 = scalar_lea.vmem %s11893_s7, 256 }
 0x2d5   : > { %9070 = vmatprep.subr.bf16.mxu1 %v9774_v1  ;;  %9064 = vmatprep.mubr.msk.bf16.mxu0 %vm9775_vm0, %v9774_v1  ;;  %p9679_p12 = scmp.ne.s32.totalorder %s11893_s7, %s9678_s28  ;;  %p9686_p2 = scmp.lt.s32.totalorder %s9684_s24, %s9678_s28 }
 0x2d6   : > { %9084 = vmatprep.mubr.msk.bf16.mxu1 %vm9775_vm0, %v9774_v1  ;;  %v5877_v13 = vrot.slane %v7659_v3, 1  ;;  %v6110_v23 = vshrl.u32 %v7659_v3, 16 }
 0x2d7   : > { %9051 = vmatpush3.bf16.msra.mxu0 %v9633_v57  ;;  %p9680_p13 = pnand %p9679_p12, %p9850_p3  ;;  %p9687_p4 = por %p9686_p2, %p9685_p1 }
 0x2d8   : > { %9071 = vmatpush3.bf16.msra.mxu1 %v9634_v60  ;;  %9052 = vmatprep.subr.bf16.mxu0 %v9774_v1  ;;  %v6112_v38 = vrot.slane %v6110_v23, 1 }
 0x2d9   : > { %9072 = vmatprep.subr.bf16.mxu1 %v9774_v1  ;;  %p9681_p0 = pneg %p9680_p13 }
 0x2db   : > { %9053 = vmatpush3.bf16.msra.mxu0 %v9635_v61  ;;  %p9688_p5 = pnand %p9687_p4, %p9681_p0 }
 0x2dc   : > { %9073 = vmatpush3.bf16.msra.mxu1 %v9636_v62  ;;  %9054 = vmatprep.subr.bf16.mxu0 %v9774_v1 }
 0x2dd   : > { %9074 = vmatprep.subr.bf16.mxu1 %v9774_v1 }
 0x2df   : > { %9055 = vmatpush3.bf16.msra.mxu0 %v9637_v51 }
 0x2e0   : > { %9075 = vmatpush3.bf16.msra.mxu1 %v9638_v2  ;;  %9056 = vmatprep.subr.bf16.mxu0 %v9774_v1  ;;  %v9663_v2 = vld [vmem:[%s11953_s1 + $0xbb0] sm:$0xff]  }
 0x2e1   : > { %9076 = vmatprep.subr.bf16.mxu1 %v9774_v1 }
 0x2e3   : > { %9057 = vmatpush3.bf16.msra.mxu0 %v9639_v5 }
 0x2e4   : > { %9077 = vmatpush3.bf16.msra.mxu1 %v9640_v7  ;;  %9058 = vmatprep.subr.bf16.mxu0 %v9774_v1 }
 0x2e5   : > { %v3985_v14 = vpop.f32.mrb[60].mxu0  ;;  %9078 = vmatprep.subr.bf16.mxu1 %v9774_v1 }
 0x2e6   : > { %v3992_v8 = vadd.f32 %v3985_v14, %v11660_v40  ;;  %v8786_v15 = vpop.f32.mrb[61].mxu0  ;;  %v4117_v16 = vpop.f32.mrb[60].mxu1  ;;  %v9654_v40 = vld [vmem:[%s11953_s1 + $0xbc8] sm:$0xff]   ;;  %v5878_v14 = vrot.slane %v11737_v0, 1 }
 0x2e7   : > { %v3988_v18 = vpop.f32.mrb[62].mxu0  ;;  %9059 = vmatpush3.bf16.msra.mxu0 %v9641_v63  ;;  %v8806_v19 = vpop.f32.mrb[61].mxu1  ;;  %v7685_v63 = vcombine.low %v7668_v55, %v11721_v4  ;;  %v5994_v15 = vrot.slane %v11744_v12, 1  ;;  %v9670_v12 = vld [vmem:[%s11953_s1 + $0xc08] sm:$0xff]  }
 0x2e8   : > { %v3993_v11 = vadd.f32 %v3988_v18, %v11667_v49  ;;  %v11753_v24 = vadd.f32 %v4117_v16, %v3992_v8  ;;  %v8787_v25 = vpop.f32.mrb[63].mxu0  ;;  %v4120_v27 = vpop.f32.mrb[62].mxu1  ;;  %9079 = vmatpush3.bf16.msra.mxu1 %v9642_v10  ;;  %9060 = vmatprep.subr.bf16.mxu0 %v9774_v1  ;;  %v9659_v49 = vld [vmem:[%s11953_s1 + $0xba0] sm:$0xff]   ;;  %v9666_v8 = vld [vmem:[%s11953_s1 + $0xbf8] sm:$0xff]   ;;  %v5879_v16 = vsel %vm685_vm2, %v5877_v13, %v5878_v14  ;;  %v9671_v18 = vld [vmem:[%s11953_s1 + $0xc10] sm:$0xff]  }
 0x2e9   : > { %9080 = vmatprep.subr.bf16.mxu1 %v9774_v1  ;;  %v8807_v34 = vpop.f32.mrb[63].mxu1  ;;  %v5993_v4 = vrot.slane %v7685_v63, 1  ;;  %v9672_v19 = vld [vmem:[%s11953_s1 + $0xc18] sm:$0xff]   ;;  %v6121_v25 = vshll.u32 %v9677_v21, 16 }
 0x2ea   : > { %v11761_v36 = vadd.f32 %v4120_v27, %v3993_v11  ;;  %v6113_v11 = vshll.u32 %v7659_v3, 16  ;;  %v9675_v34 = vld [vmem:[%s11953_s1 + $0xc30] sm:$0xff]  }
 0x2eb   : > { %9061 = vmatpush3.bf16.msra.mxu0 %v9643_v17  ;;  %v9668_v17 = vld [vmem:[%s11953_s1 + $0xc00] sm:$0xff]   ;;  %v5995_v0 = vsel %vm685_vm2, %v5993_v4, %v5994_v15  ;;  %v6123_v32 = vrot.slane %v6121_v25, 2 }
 0x2ec   : > { %9081 = vmatpush3.bf16.msra.mxu1 %v9644_v29  ;;  %9062 = vmatprep.subr.bf16.mxu0 %v9774_v1  ;;  %v6115_v41 = vrot.slane %v6113_v11, 2 }
 0x2ed   : > { %9082 = vmatprep.subr.bf16.mxu1 %v9774_v1 }
 0x2ef   : > { %9063 = vmatpush3.bf16.msra.mxu0 %v9645_v26 }
 0x2f0   : > { %9083 = vmatpush3.bf16.msra.mxu1 %v9646_v28  ;;  %9088 = vmatprep.subr.bf16.mxu0 %v9774_v1 }
 0x2f1   : > { %9108 = vmatprep.subr.bf16.mxu1 %v9774_v1 }
 0x2f2   : > { %9065 = vmatmul.mubr.bf16.vlgmr.msra.gmra.mrb[88].mxu0 %v5631_v42 }
 0x2f3   : > { %9089 = vmatpush3.bf16.msra.mxu0 %v9649_v43  ;;  %9085 = vmatmul.mubr.bf16.vlgmr.msra.gmra.mrb[88].mxu1 %v5763_v44 }
 0x2f4   : > { %9109 = vmatpush3.bf16.msra.mxu1 %v9652_v35  ;;  %9090 = vmatprep.subr.bf16.mxu0 %v9774_v1 }
 0x2f5   : > { %9110 = vmatprep.subr.bf16.mxu1 %v9774_v1  ;;  %9104 = vmatprep.mubr.msk.bf16.mxu0 %vm9775_vm0, %v9774_v1 }
 0x2f6   : > { %9124 = vmatprep.mubr.msk.bf16.mxu1 %vm9775_vm0, %v9774_v1 }
 0x2f7   : > { %9091 = vmatpush3.bf16.msra.mxu0 %v9653_v45 }
 0x2f8   : > { %9111 = vmatpush3.bf16.msra.mxu1 %v9654_v40  ;;  %9092 = vmatprep.subr.bf16.mxu0 %v9774_v1  ;;  %v9676_v40 = vld [vmem:[%s11953_s1 + $0xc38] sm:$0xff]  }
 0x2f9   : > { %9112 = vmatprep.subr.bf16.mxu1 %v9774_v1 }
 0x2fb   : > { %9093 = vmatpush3.bf16.msra.mxu0 %v9655_v39  ;;  %v6116_v39 = vor.u32 %v6115_v41, %v6112_v38 }
 0x2fc   : > { %9113 = vmatpush3.bf16.msra.mxu1 %v9656_v46  ;;  %9094 = vmatprep.subr.bf16.mxu0 %v9774_v1 }
 0x2fd   : > { %9114 = vmatprep.subr.bf16.mxu1 %v9774_v1 }
 0x2ff   : > { %9095 = vmatpush3.bf16.msra.mxu0 %v9657_v47 }
 0x300   : > { %9115 = vmatpush3.bf16.msra.mxu1 %v9658_v48  ;;  %9096 = vmatprep.subr.bf16.mxu0 %v9774_v1 }
 0x301   : > { %9116 = vmatprep.subr.bf16.mxu1 %v9774_v1 }
 0x303   : > { %9097 = vmatpush3.bf16.msra.mxu0 %v9659_v49 }
 0x304   : > { %9117 = vmatpush3.bf16.msra.mxu1 %v9660_v50  ;;  %9098 = vmatprep.subr.bf16.mxu0 %v9774_v1 }
 0x305   : > { %v4233_v54 = vpop.f32.mrb[64].mxu0  ;;  %9118 = vmatprep.subr.bf16.mxu1 %v9774_v1 }
 0x306   : > { %v4240_v57 = vadd.f32 %v4233_v54, %v11753_v24  ;;  %v8826_v60 = vpop.f32.mrb[65].mxu0  ;;  %v4349_v61 = vpop.f32.mrb[64].mxu1  ;;  %v6118_v24 = vshrl.u32 %v9677_v21, 16 }
 0x307   : > { %v4236_v62 = vpop.f32.mrb[66].mxu0  ;;  %9099 = vmatpush3.bf16.msra.mxu0 %v9661_v37  ;;  %v8846_v51 = vpop.f32.mrb[65].mxu1 }
 0x308   : > { %v4241_v59 = vadd.f32 %v4236_v62, %v11761_v36  ;;  %v4356_v5 = vadd.f32 %v4349_v61, %v4240_v57  ;;  %v8827_v6 = vpop.f32.mrb[67].mxu0  ;;  %v4352_v7 = vpop.f32.mrb[66].mxu1  ;;  %9119 = vmatpush3.bf16.msra.mxu1 %v9662_v52  ;;  %9100 = vmatprep.subr.bf16.mxu0 %v9774_v1  ;;  %v6120_v28 = vrot.slane %v6118_v24, 1 }
 0x309   : > { %9120 = vmatprep.subr.bf16.mxu1 %v9774_v1  ;;  %v8847_v9 = vpop.f32.mrb[67].mxu1 }
 0x30a   : > { %v4357_v10 = vadd.f32 %v4352_v7, %v4241_v59  ;;  %v6124_v46 = vor.u32 %v6123_v32, %v6120_v28 }
 0x30b   : > { %9101 = vmatpush3.bf16.msra.mxu0 %v9663_v2 }
 0x30c   : > { %9121 = vmatpush3.bf16.msra.mxu1 %v9664_v58  ;;  %9102 = vmatprep.subr.bf16.mxu0 %v9774_v1  ;;  %v6125_v47 = vsel %vm918_vm3, %v6116_v39, %v6124_v46 }
 0x30d   : > { %9122 = vmatprep.subr.bf16.mxu1 %v9774_v1 }
 0x30f   : > { %9103 = vmatpush3.bf16.msra.mxu0 %v9665_v56 }
 0x310   : > { %9123 = vmatpush3.bf16.msra.mxu1 %v9666_v8  ;;  %9128 = vmatprep.subr.bf16.mxu0 %v9774_v1 }
 0x312   : > { %9105 = vmatmul.mubr.bf16.vlgmr.msra.gmra.mrb[92].mxu0 %v5879_v16 }
 0x313   : > { %9129 = vmatpush3.bf16.msra.mxu0 %v9668_v17  ;;  %9125 = vmatmul.mubr.bf16.vlgmr.msra.gmra.mrb[92].mxu1 %v5995_v0 }
 0x314   : > { %9130 = vmatprep.subr.bf16.mxu0 %v9774_v1  ;;  %9144 = vmatprep.mubr.msk.bf16.mxu0 %vm9775_vm0, %v9774_v1 }
 0x317   : > { %9131 = vmatpush3.bf16.msra.mxu0 %v9670_v12 }
 0x318   : > { %9132 = vmatprep.subr.bf16.mxu0 %v9774_v1 }
 0x31b   : > { %9133 = vmatpush3.bf16.msra.mxu0 %v9671_v18 }
 0x31c   : > { %9134 = vmatprep.subr.bf16.mxu0 %v9774_v1 }
 0x31f   : > { %9135 = vmatpush3.bf16.msra.mxu0 %v9672_v19 }
 0x320   : > { %9136 = vmatprep.subr.bf16.mxu0 %v9774_v1 }
 0x323   : > { %9137 = vmatpush3.bf16.msra.mxu0 %v9673_v20 }
 0x324   : > { %9138 = vmatprep.subr.bf16.mxu0 %v9774_v1 }
 0x325   : > { %v4479_v27 = vpop.f32.mrb[68].mxu0 }
 0x326   : > { %v4486_v29 = vadd.f32 %v4479_v27, %v4356_v5  ;;  %v8866_v30 = vpop.f32.mrb[69].mxu0  ;;  %v4598_v33 = vpop.f32.mrb[68].mxu1 }
 0x327   : > { %v4482_v36 = vpop.f32.mrb[70].mxu0  ;;  %9139 = vmatpush3.bf16.msra.mxu0 %v9674_v22  ;;  %v8886_v26 = vpop.f32.mrb[69].mxu1 }
 0x328   : > { %v4487_v31 = vadd.f32 %v4482_v36, %v4357_v10  ;;  %v4605_v42 = vadd.f32 %v4598_v33, %v4486_v29  ;;  %v8867_v43 = vpop.f32.mrb[71].mxu0  ;;  %v4601_v44 = vpop.f32.mrb[70].mxu1  ;;  %9140 = vmatprep.subr.bf16.mxu0 %v9774_v1 }
 0x329   : > { %v8887_v35 = vpop.f32.mrb[71].mxu1 }
 0x32a   : > { %v4606_v45 = vadd.f32 %v4601_v44, %v4487_v31 }
 0x32b   : > { %9141 = vmatpush3.bf16.msra.mxu0 %v9675_v34 }
 0x32c   : > { %9142 = vmatprep.subr.bf16.mxu0 %v9774_v1 }
 0x32f   : > { %9143 = vmatpush3.bf16.msra.mxu0 %v9676_v40 }
 0x332   : > { %9145 = vmatmul.mubr.bf16.vlgmr.msra.gmra.mrb[96].mxu0 %v6125_v47 }
 0x345   : > { %v4717_v48 = vpop.f32.mrb[72].mxu0 }
 0x346   : > { %v4724_v49 = vadd.f32 %v4717_v48, %v4605_v42  ;;  %v8906_v50 = vpop.f32.mrb[73].mxu0  ;;  %v4849_v37 = vpop.f32.mrb[72].mxu1 }
 0x347   : > { %v4720_v52 = vpop.f32.mrb[74].mxu0  ;;  %v8926_v53 = vpop.f32.mrb[73].mxu1 }
 0x348   : > { %v4725_v54 = vadd.f32 %v4720_v52, %v4606_v45  ;;  %v4856_v55 = vadd.f32 %v4849_v37, %v4724_v49  ;;  %v8907_v57 = vpop.f32.mrb[75].mxu0  ;;  %v4852_v60 = vpop.f32.mrb[74].mxu1 }
 0x349   : > { %v8927_v61 = vpop.f32.mrb[75].mxu1 }
 0x34a   : > { %v4857_v62 = vadd.f32 %v4852_v60, %v4725_v54  ;;  %v7720_v60 = vld [vmem:[%s11954_s2] ss:$0 sm:$0xff] }
 0x365   : > { %v4981_v51 = vpop.f32.mrb[76].mxu0 }
 0x366   : > { %v4988_v2 = vadd.f32 %v4981_v51, %v4856_v55  ;;  %v8946_v3 = vpop.f32.mrb[77].mxu0  ;;  %v5097_v1 = vpop.f32.mrb[76].mxu1 }
 0x367   : > { %v4984_v59 = vpop.f32.mrb[78].mxu0  ;;  %v8966_v5 = vpop.f32.mrb[77].mxu1 }
 0x368   : > { %v4989_v6 = vadd.f32 %v4984_v59, %v4857_v62  ;;  %v5104_v7 = vadd.f32 %v5097_v1, %v4988_v2  ;;  %v8947_v58 = vpop.f32.mrb[79].mxu0  ;;  %v5100_v63 = vpop.f32.mrb[78].mxu1 }
 0x369   : > { %v8967_v9 = vpop.f32.mrb[79].mxu1 }
 0x36a   : > { %v5105_v10 = vadd.f32 %v5100_v63, %v4989_v6 }
 0x385   : > { %v5213_v56 = vpop.f32.mrb[80].mxu0 }
 0x386   : > { %v5220_v13 = vadd.f32 %v5213_v56, %v5104_v7  ;;  %v8986_v14 = vpop.f32.mrb[81].mxu0  ;;  %v5343_v8 = vpop.f32.mrb[80].mxu1 }
 0x387   : > { %v5216_v4 = vpop.f32.mrb[82].mxu0  ;;  %v9006_v15 = vpop.f32.mrb[81].mxu1 }
 0x388   : > { %v5221_v16 = vadd.f32 %v5216_v4, %v5105_v10  ;;  %v5350_v17 = vadd.f32 %v5343_v8, %v5220_v13  ;;  %v8987_v0 = vpop.f32.mrb[83].mxu0  ;;  %v5346_v12 = vpop.f32.mrb[82].mxu1 }
 0x389   : > { %v9007_v18 = vpop.f32.mrb[83].mxu1 }
 0x38a   : > { %v5351_v19 = vadd.f32 %v5346_v12, %v5221_v16 }
 0x3a5   : > { %v5464_v20 = vpop.f32.mrb[84].mxu0 }
 0x3a6   : > { %v5471_v21 = vadd.f32 %v5464_v20, %v5350_v17  ;;  %v9026_v22 = vpop.f32.mrb[85].mxu0  ;;  %v5583_v23 = vpop.f32.mrb[84].mxu1 }
 0x3a7   : > { %v5467_v11 = vpop.f32.mrb[86].mxu0  ;;  %v9046_v24 = vpop.f32.mrb[85].mxu1 }
 0x3a8   : > { %v5472_v25 = vadd.f32 %v5467_v11, %v5351_v19  ;;  %v5590_v27 = vadd.f32 %v5583_v23, %v5471_v21  ;;  %v9027_v29 = vpop.f32.mrb[87].mxu0  ;;  %v5586_v30 = vpop.f32.mrb[86].mxu1 }
 0x3a9   : > { %v9047_v33 = vpop.f32.mrb[87].mxu1 }
 0x3aa   : > { %v5591_v34 = vadd.f32 %v5586_v30, %v5472_v25 }
 0x3c5   : > { %v5715_v36 = vpop.f32.mrb[88].mxu0 }
 0x3c6   : > { %v5722_v26 = vadd.f32 %v5715_v36, %v5590_v27  ;;  %v9066_v38 = vpop.f32.mrb[89].mxu0  ;;  %v5847_v41 = vpop.f32.mrb[88].mxu1 }
 0x3c7   : > { %v5718_v28 = vpop.f32.mrb[90].mxu0  ;;  %v9086_v32 = vpop.f32.mrb[89].mxu1 }
 0x3c8   : > { %v5723_v31 = vadd.f32 %v5718_v28, %v5591_v34  ;;  %v5854_v42 = vadd.f32 %v5847_v41, %v5722_v26  ;;  %v9067_v43 = vpop.f32.mrb[91].mxu0  ;;  %v5850_v44 = vpop.f32.mrb[90].mxu1 }
 0x3c9   : > { %v9087_v35 = vpop.f32.mrb[91].mxu1 }
 0x3ca   : > { %v5855_v45 = vadd.f32 %v5850_v44, %v5723_v31 }
 0x3e5   : > { %v5963_v40 = vpop.f32.mrb[92].mxu0 }
 0x3e6   : > { %v5970_v39 = vadd.f32 %v5963_v40, %v5854_v42  ;;  %v9106_v46 = vpop.f32.mrb[93].mxu0  ;;  %v6079_v47 = vpop.f32.mrb[92].mxu1 }
 0x3e7   : > { %v5966_v48 = vpop.f32.mrb[94].mxu0  ;;  %v9126_v49 = vpop.f32.mrb[93].mxu1 }
 0x3e8   : > { %v5971_v50 = vadd.f32 %v5966_v48, %v5855_v45  ;;  %v6086_v37 = vadd.f32 %v6079_v47, %v5970_v39  ;;  %v9107_v52 = vpop.f32.mrb[95].mxu0  ;;  %v6082_v53 = vpop.f32.mrb[94].mxu1 }
 0x3e9   : > { %v9127_v54 = vpop.f32.mrb[95].mxu1 }
 0x3ea   : > { %v6087_v55 = vadd.f32 %v6082_v53, %v5971_v50 }
 0x405   : > { %v6209_v57 = vpop.f32.mrb[96].mxu0 }
 0x406   : > { %v6216_v61 = vadd.f32 %v6209_v57, %v6086_v37  ;;  %v9146_v62 = vpop.f32.mrb[97].mxu0 }
 0x407   : > { %v6212_v51 = vpop.f32.mrb[98].mxu0 }
 0x408   : > { %v6225_v2 = vadd.f32 %v7720_v60, %v6216_v61  ;;  %v6217_v3 = vadd.f32 %v6212_v51, %v6087_v55  ;;  %v9147_v1 = vpop.f32.mrb[99].mxu0 }
 0x40a   : > { %v6227_v59 = vmax.f32 %v6225_v2, 0.0  ;;  %v6226_v5 = vadd.f32 %v7720_v60, %v6217_v3 }
 0x40c   : > { %6229 = vst [vmem:[%s162_s6] sm:$0xff] %v6227_v59  ;;  %v6228_v6 = vmax.f32 %v6226_v5, 0.0 }
 0x40e   : > { %6230 = vst [vmem:[%s162_s6 + $0x8] sm:$0xff] %v6228_v6 }
 0x40f   : > { %9691 = shalt.err (!%p9688_p5)
}
 0x410   : > { %s9692_s20 = scalar_lea.hbm %s11898_s9, 256  ;;  %s9696_s4 = scalar_lea.hbm %s11955_s3, 8192 }
 0x411   : > { %p9693_p6 = scmp.ne.s32.totalorder %s11898_s9, %s9692_s20  ;;  %p9697_p10 = scmp.lt.u32.totalorder %s11898_s9, %s11955_s3 }
 0x412   : > { %p9698_p11 = scmp.lt.u32.totalorder %s9696_s4, %s9692_s20  ;;  %p9700_p13 = scmp.lt.u32.totalorder %s9692_s20, %s11898_s9 }
 0x413   : > { %p9694_p7 = pnand %p9693_p6, %p9850_p3 }
 0x414   : > { %p9699_p12 = por %p9698_p11, %p9697_p10 }
 0x415   : > { %p9695_p9 = pneg %p9694_p7 }
 0x416   : > { %p9701_p0 = por %p9700_p13, %p9699_p12 }
 0x418   : > { %p9702_p1 = pnand %p9701_p0, %p9695_p9 }
 0x41a   : > { %9705 = shalt.err (!%p9702_p1)
}
 0x41b   : > { %s9777_s8 = smov 128   ;;  %s9778_s15 = smov 8  }
 0x41c   : > { %9148 = dma.vmem_to_hbm [thread:$0]  (%p9850_p3), %s11893_s7, 256, %s11898_s9, %s11900_s10, %s9777_s8, %s9777_s8, %s9778_s15  }
 0x41d PF: > { %p9154_p2 = scmp.ge.s32.totalorder %s9772_s19, 2  ;;  %s6262_s16 = sand.u32 1, %s9744_s12  }
 0x41e   : > { %s6263_s28 = scalar_lea.sflag [#allocation3], %s6262_s16 }
 0x41f   : > { %p9151_p4 = pnand %p9154_p2, %p9859_p8 }
 0x421   : > { %9739 = dma.done.wait (!%p9151_p4), %s6263_s28, 256  }
 0x422   : > { %9741 = vsyncadd (!%p9151_p4), %s6263_s28, 4294967040  ;;  %s16_s19 = sadd.s32 1, %s9772_s19   ;;  %s11958_s12 = smov %s9748_s13 }
 0x423   : > { %p13_p5 = scmp.ge.s32.totalorder %s16_s19, 34   ;;  %s11959_s13 = smov %s9752_s14 }
 0x424   : > { %s11960_s14 = smov %s9868_s30  ;;  %s11961_s15 = smov %s9764_s17 }
 0x425   : > { %s11962_s16 = smov %s9768_s18  ;;  %s11963_s17 = smov %s11966_s22 }
 0x426   : > { %s11964_s18 = smov %s11970_s23  ;;  %15 = sbr.rel (!%p13_p5) target bundleno = 5 (0x5), region = 126 }
 0x42d   :  { %6268 = vsyncpa [#allocation3], 1 }
 0x42e   :  { %6270 = vsyncpa [#allocation3 + $0x1], 1 }

</bundles_post_ra>
